<compile_context>
chip_gen: v7x
topology: tpu7x:2x2x1
jax: 0.10.0
libtpu: 0.0.40
codegen_flags: <defaults>
</compile_context>

<pallas_src>
import functools
import math

import jax
import jax.numpy as jnp
from jax.experimental import pallas as pl
from jax.experimental.pallas import tpu as pltpu


# ---------------------------------------------------------------------------
# Fused kernel: embedding + one MemoryAttentionBlock per grid step + final LN
# ---------------------------------------------------------------------------
def _fused_kernel(x_ref, emb_w_ref, emb_b_ref, w_ref, b_ref, ln_ref,
                  mem_ref, memT_ref, sel_ref, selt_ref, fg_ref, fb_ref,
                  o_ref, *, num_heads, buf_size):
    """One grid step = (batch tile i, layer l).

    w_ref:   [7, D, D] bf16 packed per-layer weights ([in, out]):
        0: fused self-attn (V@Out)   1: episodic Q
        2: mem-attn Q  3: mem-attn K  4: mem-attn V  5: mem-attn Out
        6: fused linear-attn (V@Out)
    b_ref:   [7, 1, D] f32 matching biases.
    ln_ref:  [6, 1, D] f32 = (gamma1, beta1, gamma2, beta2, gamma3, beta3).
    mem_ref: [M, D] bf16 episodic memory bank; memT_ref: [D, M] bf16 transpose.
    sel_ref: [D, H] f32 head-sum matrix; selt_ref: [H, D] f32 head-broadcast.
    """
    l = pl.program_id(1)
    n_layers = pl.num_programs(1)

    # ---- input embedding, only on the first layer step ----------------------
    @pl.when(l == 0)
    def _():
        x0 = x_ref[...].astype(jnp.bfloat16)
        o_ref[...] = (
            jnp.dot(x0, emb_w_ref[...], preferred_element_type=jnp.float32)
            + emb_b_ref[...]
        )

    x = o_ref[...]                                   # [TB, D] f32 (resident)
    D = x.shape[-1]
    H = num_heads
    Dh = D // H

    def linear(v, i):
        # bf16 MXU matmul, f32 accumulation + f32 bias.
        return (
            jnp.dot(v.astype(jnp.bfloat16), w_ref[i],
                    preferred_element_type=jnp.float32)
            + b_ref[i]
        )

    def layer_norm(v, gi, bi):
        mu = jnp.mean(v, axis=-1, keepdims=True)
        var = jnp.mean((v - mu) ** 2, axis=-1, keepdims=True)
        return (v - mu) * jax.lax.rsqrt(var + 1e-5) * ln_ref[gi] + ln_ref[bi]

    # ---- 1. self-attention (len-1 seq => softmax weight == 1), pre-fused ----
    attended = linear(x, 0)                           # out_proj(v_proj(x)) exact
    x = layer_norm(x + attended, 0, 1)

    # ---- 2. episodic memory read ---------------------------------------------
    q_e = linear(x, 1)                                # [TB, D]
    s_e = jnp.dot(q_e.astype(jnp.bfloat16), memT_ref[...],
                  preferred_element_type=jnp.float32) * (1.0 / math.sqrt(D))
    m_e = jnp.max(s_e, axis=-1, keepdims=True)
    p_e = jnp.exp(s_e - m_e)
    a_e = p_e * pl.reciprocal(jnp.sum(p_e, axis=-1, keepdims=True), approx=True)
    episodic_mem = jnp.dot(a_e.astype(jnp.bfloat16), mem_ref[...],
                           preferred_element_type=jnp.float32)    # [TB, D]

    # ---- 3. working memory: x written to slot 0 of a zero buffer, then read -
    # closed form of the softmax over [s0, 0, ..., 0]; s0 >= 0 so exp(-s0)<=1.
    s0 = jnp.sum(x * x, axis=-1, keepdims=True) * (1.0 / math.sqrt(D))
    a0 = pl.reciprocal(1.0 + (buf_size - 1) * jnp.exp(-s0), approx=True)
    working_mem = a0 * x                              # [TB, D] exact read result

    # ---- 4. multi-head attention of x over {episodic, working} + norm2 ------
    q = linear(x, 2)
    ke = linear(episodic_mem, 3)
    kw = linear(working_mem, 3)
    ve = linear(episodic_mem, 4)
    vw = linear(working_mem, 4)

    sel = sel_ref[...]                                # [D, H] per-head sum
    selt = selt_ref[...]                              # [H, D] per-head broadcast
    inv_sqrt_dh = 1.0 / math.sqrt(Dh)
    se = jnp.dot(q * ke, sel, preferred_element_type=jnp.float32) * inv_sqrt_dh
    sw = jnp.dot(q * kw, sel, preferred_element_type=jnp.float32) * inv_sqrt_dh
    m2 = jnp.maximum(se, sw)                          # softmax over the 2 slots
    pe = jnp.exp(se - m2)
    pw = jnp.exp(sw - m2)
    inv = pl.reciprocal(pe + pw, approx=True)
    ae = jnp.dot(pe * inv, selt, preferred_element_type=jnp.float32)   # [TB, D]
    aw = jnp.dot(pw * inv, selt, preferred_element_type=jnp.float32)   # [TB, D]
    ctx = ae * ve + aw * vw
    memory_context = linear(ctx, 5)
    x = layer_norm(x + memory_context, 2, 3)

    # ---- 5. linear (kernelised) attention + norm3, pre-fused -----------------
    # len-1 sequence: phi(q).(phi(k) v^T) / (phi(q).phi(k)) == v exactly.
    local = linear(x, 6)
    x = layer_norm(x + local, 4, 5)

    o_ref[...] = x

    # ---- final LayerNorm after the last layer --------------------------------
    @pl.when(l == n_layers - 1)
    def _():
        v = o_ref[...]
        mu = jnp.mean(v, axis=-1, keepdims=True)
        var = jnp.mean((v - mu) ** 2, axis=-1, keepdims=True)
        o_ref[...] = (v - mu) * jax.lax.rsqrt(var + 1e-5) * fg_ref[...] + fb_ref[...]


# ---------------------------------------------------------------------------
# Wrapper: single pallas_call over (batch tiles, layers)
# ---------------------------------------------------------------------------
def memory_augmented_transformer(x, params, *, num_heads, buf_size, tile_b=128):
    (emb_w, emb_b, w, b, ln, mem, mem_t, sel, sel_t, fg, fb) = params
    B, D = x.shape
    H = num_heads
    M = mem.shape[-1] and mem.shape[0]  # placeholder, reset below
    n_layers = ln.shape[0] // 6
    M = mem.shape[0] // n_layers
    assert B % tile_b == 0, "batch must be a multiple of the batch tile"
    assert D % H == 0

    grid = (B // tile_b, n_layers)
    kern = functools.partial(_fused_kernel, num_heads=num_heads,
                             buf_size=buf_size)
    return pl.pallas_call(
        kern,
        out_shape=jax.ShapeDtypeStruct((B, D), jnp.float32),
        grid_spec=pltpu.PrefetchScalarGridSpec(
            num_scalar_prefetch=0,
            grid=grid,
            in_specs=[
                pl.BlockSpec((tile_b, D), lambda i, l: (i, 0)),   # x
                pl.BlockSpec((D, D), lambda i, l: (0, 0)),        # emb_w
                pl.BlockSpec((1, D), lambda i, l: (0, 0)),        # emb_b
                pl.BlockSpec((7, D, D), lambda i, l: (l, 0, 0)),  # layer weights
                pl.BlockSpec((7, 1, D), lambda i, l: (l, 0, 0)),  # layer biases
                pl.BlockSpec((6, 1, D), lambda i, l: (l, 0, 0)),  # LN params
                pl.BlockSpec((M, D), lambda i, l: (l, 0)),        # episodic mem
                pl.BlockSpec((D, M), lambda i, l: (l, 0)),        # episodic mem^T
                pl.BlockSpec((D, H), lambda i, l: (0, 0)),        # head-sum
                pl.BlockSpec((H, D), lambda i, l: (0, 0)),        # head-broadcast
                pl.BlockSpec((1, D), lambda i, l: (0, 0)),        # final gamma
                pl.BlockSpec((1, D), lambda i, l: (0, 0)),        # final beta
            ],
            out_specs=pl.BlockSpec((tile_b, D), lambda i, l: (i, 0)),
        ),
        compiler_params=pltpu.CompilerParams(
            dimension_semantics=("parallel", "arbitrary"),
            vmem_limit_bytes=32 * 1024 * 1024,
        ),
    )(x, emb_w, emb_b, w, b, ln, mem, mem_t, sel, sel_t, fg, fb)


# ---------------------------------------------------------------------------
# Parameter construction (deterministic synthetic weights, PyTorch shapes)
# ---------------------------------------------------------------------------
def init_params(key, input_dim, num_layers, memory_size, num_heads):
    D = input_dim
    H = num_heads
    Dh = D // H
    scale = 0.05
    keys = jax.random.split(key, 2 + num_layers)
    emb_w = jax.random.normal(keys[0], (D, D), jnp.float32) * scale   # [in,out]
    emb_b = jax.random.normal(keys[1], (1, D), jnp.float32) * scale

    ones = jnp.ones((1, D), jnp.float32)
    zeros = jnp.zeros((1, D), jnp.float32)
    ln_layer = jnp.stack([ones, zeros, ones, zeros, ones, zeros], axis=0)

    ws, bs, lns, mems, mem_ts = [], [], [], [], []
    for l in range(num_layers):
        lk = jax.random.split(keys[2 + l], 3)
        raw_w = jax.random.normal(lk[0], (9, D, D), jnp.float32) * scale
        raw_b = jax.random.normal(lk[1], (9, 1, D), jnp.float32) * scale
        # raw slots: 0 saV 1 saOut 2 epiQ 3 maQ 4 maK 5 maV 6 maOut 7 laV 8 laOut
        w_sa = raw_w[0] @ raw_w[1]                      # fuse self-attn V@Out
        b_sa = raw_b[0] @ raw_w[1] + raw_b[1]
        w_la = raw_w[7] @ raw_w[8]                      # fuse linear-attn V@Out
        b_la = raw_b[7] @ raw_w[8] + raw_b[8]
        w = jnp.stack([w_sa, raw_w[2], raw_w[3], raw_w[4],
                       raw_w[5], raw_w[6], w_la], axis=0)       # [7, D, D]
        bb = jnp.stack([b_sa, raw_b[2], raw_b[3], raw_b[4],
                        raw_b[5], raw_b[6], b_la], axis=0)      # [7, 1, D]
        mem = jax.random.normal(lk[2], (memory_size, D), jnp.float32) * scale
        ws.append(w)
        bs.append(bb)
        lns.append(ln_layer)
        mems.append(mem)
        mem_ts.append(mem.T)

    w = jnp.concatenate(ws, axis=0).astype(jnp.bfloat16)        # [L*7, D, D]
    b = jnp.concatenate(bs, axis=0)                              # [L*7, 1, D]
    ln = jnp.concatenate(lns, axis=0)                            # [L*6, 1, D]
    mem = jnp.concatenate(mems, axis=0).astype(jnp.bfloat16)     # [L*M, D]
    mem_t = jnp.concatenate(mem_ts, axis=0).astype(jnp.bfloat16)  # [L*D, M]
    emb_w = emb_w.astype(jnp.bfloat16)

    d_i = jnp.arange(D)[:, None]
    h_i = jnp.arange(H)[None, :]
    sel = (d_i // Dh == h_i).astype(jnp.float32)                 # [D, H]
    sel_t = sel.T                                                # [H, D]

    final_g = jnp.ones((1, D), jnp.float32)
    final_b = jnp.zeros((1, D), jnp.float32)
    return (emb_w, emb_b, w, b, ln, mem, mem_t, sel, sel_t, final_g, final_b)


# ---------------------------------------------------------------------------
if __name__ == "__main__":
    B, D = 256, 128                 # batch, input_dim (lane-dense feature dim)
    NUM_LAYERS = 2
    MEMORY_SIZE = 32
    NUM_HEADS = 8                   # head_dim = 16
    BUF_SIZE = MEMORY_SIZE // 2
    TILE_B = 128                    # batch tile (full MXU rows / lane-dense out)

    key = jax.random.PRNGKey(0)
    pkey, xkey = jax.random.split(key)
    params = init_params(pkey, D, NUM_LAYERS, MEMORY_SIZE, NUM_HEADS)
    x = jax.random.normal(xkey, (B, D), jnp.float32)

    fwd = jax.jit(
        functools.partial(
            memory_augmented_transformer,
            num_heads=NUM_HEADS, buf_size=BUF_SIZE, tile_b=TILE_B,
        )
    )
    out = fwd(x, params)
    jax.block_until_ready(out)

    assert out.shape == (B, D) and out.dtype == jnp.float32
    assert bool(jnp.all(jnp.isfinite(out)))
    print("KERNEL_OK")
</pallas_src>

<mosaic_0001>
module attributes {stable_mosaic.version = 11 : i64} {
  func.func @_fused_kernel(%arg0: i32, %arg1: i32, %arg2: memref<128x128xf32, #tpu.memory_space<vmem>>, %arg3: memref<128x128xbf16, #tpu.memory_space<vmem>>, %arg4: memref<1x128xf32, #tpu.memory_space<vmem>>, %arg5: memref<7x128x128xbf16, #tpu.memory_space<vmem>>, %arg6: memref<7x1x128xf32, #tpu.memory_space<vmem>>, %arg7: memref<6x1x128xf32, #tpu.memory_space<vmem>>, %arg8: memref<32x128xbf16, #tpu.memory_space<vmem>>, %arg9: memref<128x32xbf16, #tpu.memory_space<vmem>>, %arg10: memref<128x8xf32, #tpu.memory_space<vmem>>, %arg11: memref<8x128xf32, #tpu.memory_space<vmem>>, %arg12: memref<1x128xf32, #tpu.memory_space<vmem>>, %arg13: memref<1x128xf32, #tpu.memory_space<vmem>>, %arg14: memref<128x128xf32, #tpu.memory_space<vmem>>) attributes {dimension_semantics = [#tpu.dimension_semantics<parallel>, #tpu.dimension_semantics<arbitrary>], iteration_bounds = array<i64: 2, 2>, scalar_prefetch = 0 : i64, scratch_operands = 0 : i64, tpu.core_type = #tpu.core_type<tc>, window_params = [{transform_indices = @transform_0, window_bounds = array<i64: 128, 128>}, {pipeline_mode = #tpu.pipeline_mode<synchronous>, transform_indices = @transform_1, window_bounds = array<i64: 128, 128>}, {pipeline_mode = #tpu.pipeline_mode<synchronous>, transform_indices = @transform_2, window_bounds = array<i64: 1, 128>}, {transform_indices = @transform_3, window_bounds = array<i64: 7, 128, 128>}, {transform_indices = @transform_4, window_bounds = array<i64: 7, 1, 128>}, {transform_indices = @transform_5, window_bounds = array<i64: 6, 1, 128>}, {transform_indices = @transform_6, window_bounds = array<i64: 32, 128>}, {transform_indices = @transform_7, window_bounds = array<i64: 128, 32>}, {pipeline_mode = #tpu.pipeline_mode<synchronous>, transform_indices = @transform_8, window_bounds = array<i64: 128, 8>}, {pipeline_mode = #tpu.pipeline_mode<synchronous>, transform_indices = @transform_9, window_bounds = array<i64: 8, 128>}, {pipeline_mode = #tpu.pipeline_mode<synchronous>, transform_indices = @transform_10, window_bounds = array<i64: 1, 128>}, {pipeline_mode = #tpu.pipeline_mode<synchronous>, transform_indices = @transform_11, window_bounds = array<i64: 1, 128>}, {transform_indices = @transform_12, window_bounds = array<i64: 128, 128>}]} {
    %c0_i32 = arith.constant 0 : i32
    %0 = arith.cmpi eq, %arg1, %c0_i32 : i32
    %1 = arith.extui %0 : i1 to i32
    %c0_i32_0 = arith.constant 0 : i32
    %2 = arith.cmpi ne, %1, %c0_i32_0 : i32
    scf.if %2 {
      %c0_118 = arith.constant 0 : index
      %c0_119 = arith.constant 0 : index
      %218 = vector.load %arg2[%c0_118, %c0_119] : memref<128x128xf32, #tpu.memory_space<vmem>>, vector<128x128xf32>
      %219 = arith.truncf %218 : vector<128x128xf32> to vector<128x128xbf16>
      %c0_120 = arith.constant 0 : index
      %c0_121 = arith.constant 0 : index
      %220 = vector.load %arg3[%c0_120, %c0_121] : memref<128x128xbf16, #tpu.memory_space<vmem>>, vector<128x128xbf16>
      %cst_122 = arith.constant dense<0.000000e+00> : vector<128x128xf32>
      %221 = tpu.matmul %219, %220, %cst_122 {dimension_numbers = #tpu.dot_dimension_numbers<[1], [0], [0], [1], [0, 0, 1, 1], [], []>} : vector<128x128xbf16>, vector<128x128xbf16>, vector<128x128xf32> -> vector<128x128xf32>
      %c0_123 = arith.constant 0 : index
      %c0_124 = arith.constant 0 : index
      %222 = vector.load %arg4[%c0_123, %c0_124] : memref<1x128xf32, #tpu.memory_space<vmem>>, vector<1x128xf32>
      %223 = vector.broadcast %222 : vector<1x128xf32> to vector<128x128xf32>
      %224 = arith.addf %221, %223 : vector<128x128xf32>
      %c0_125 = arith.constant 0 : index
      %c0_126 = arith.constant 0 : index
      %225 = vector.load %arg14[%c0_125, %c0_126] : memref<128x128xf32, #tpu.memory_space<vmem>>, vector<128x128xf32>
      tpu.vector_store %arg14[%c0_125, %c0_126], %224 {strides = array<i32>} : memref<128x128xf32, #tpu.memory_space<vmem>>, vector<128x128xf32>,
    } else {
    }
    %c0 = arith.constant 0 : index
    %c0_1 = arith.constant 0 : index
    %3 = vector.load %arg14[%c0, %c0_1] : memref<128x128xf32, #tpu.memory_space<vmem>>, vector<128x128xf32>
    %4 = arith.truncf %3 : vector<128x128xf32> to vector<128x128xbf16>
    %c0_2 = arith.constant 0 : index
    %c0_3 = arith.constant 0 : index
    %c0_4 = arith.constant 0 : index
    %5 = vector.load %arg5[%c0_2, %c0_3, %c0_4] : memref<7x128x128xbf16, #tpu.memory_space<vmem>>, vector<1x128x128xbf16>
    %6 = vector.shape_cast %5 : vector<1x128x128xbf16> to vector<128x128xbf16>
    %cst = arith.constant dense<0.000000e+00> : vector<128x128xf32>
    %7 = tpu.matmul %4, %6, %cst {dimension_numbers = #tpu.dot_dimension_numbers<[1], [0], [0], [1], [0, 0, 1, 1], [], []>} : vector<128x128xbf16>, vector<128x128xbf16>, vector<128x128xf32> -> vector<128x128xf32>
    %c0_5 = arith.constant 0 : index
    %c0_6 = arith.constant 0 : index
    %c0_7 = arith.constant 0 : index
    %8 = vector.load %arg6[%c0_5, %c0_6, %c0_7] : memref<7x1x128xf32, #tpu.memory_space<vmem>>, vector<1x1x128xf32>
    %9 = vector.shape_cast %8 : vector<1x1x128xf32> to vector<1x128xf32>
    %10 = vector.broadcast %9 : vector<1x128xf32> to vector<128x128xf32>
    %11 = arith.addf %7, %10 : vector<128x128xf32>
    %12 = arith.addf %3, %11 : vector<128x128xf32>
    %cst_8 = arith.constant dense<0.000000e+00> : vector<128xf32>
    %13 = vector.multi_reduction <add>, %12, %cst_8 [1] : vector<128x128xf32> to vector<128xf32>
    %14 = vector.shape_cast %13 : vector<128xf32> to vector<128x1xf32>
    %cst_9 = arith.constant 1.280000e+02 : f32
    %15 = vector.broadcast %cst_9 : f32 to vector<128x1xf32>
    %16 = arith.divf %14, %15 : vector<128x1xf32>
    %17 = vector.broadcast %16 : vector<128x1xf32> to vector<128x128xf32>
    %18 = arith.subf %12, %17 : vector<128x128xf32>
    %19 = arith.mulf %18, %18 : vector<128x128xf32>
    %cst_10 = arith.constant dense<0.000000e+00> : vector<128xf32>
    %20 = vector.multi_reduction <add>, %19, %cst_10 [1] : vector<128x128xf32> to vector<128xf32>
    %21 = vector.shape_cast %20 : vector<128xf32> to vector<128x1xf32>
    %cst_11 = arith.constant 1.280000e+02 : f32
    %22 = vector.broadcast %cst_11 : f32 to vector<128x1xf32>
    %23 = arith.divf %21, %22 : vector<128x1xf32>
    %24 = vector.broadcast %16 : vector<128x1xf32> to vector<128x128xf32>
    %25 = arith.subf %12, %24 : vector<128x128xf32>
    %cst_12 = arith.constant 9.99999974E-6 : f32
    %26 = vector.broadcast %cst_12 : f32 to vector<128x1xf32>
    %27 = arith.addf %23, %26 : vector<128x1xf32>
    %28 = math.rsqrt %27 : vector<128x1xf32>
    %29 = vector.broadcast %28 : vector<128x1xf32> to vector<128x128xf32>
    %30 = arith.mulf %25, %29 : vector<128x128xf32>
    %c0_13 = arith.constant 0 : index
    %c0_14 = arith.constant 0 : index
    %c0_15 = arith.constant 0 : index
    %31 = vector.load %arg7[%c0_13, %c0_14, %c0_15] : memref<6x1x128xf32, #tpu.memory_space<vmem>>, vector<1x1x128xf32>
    %32 = vector.shape_cast %31 : vector<1x1x128xf32> to vector<1x128xf32>
    %33 = vector.broadcast %32 : vector<1x128xf32> to vector<128x128xf32>
    %34 = arith.mulf %30, %33 : vector<128x128xf32>
    %c1 = arith.constant 1 : index
    %c0_16 = arith.constant 0 : index
    %c0_17 = arith.constant 0 : index
    %35 = vector.load %arg7[%c1, %c0_16, %c0_17] : memref<6x1x128xf32, #tpu.memory_space<vmem>>, vector<1x1x128xf32>
    %36 = vector.shape_cast %35 : vector<1x1x128xf32> to vector<1x128xf32>
    %37 = vector.broadcast %36 : vector<1x128xf32> to vector<128x128xf32>
    %38 = arith.addf %34, %37 : vector<128x128xf32>
    %39 = arith.truncf %38 : vector<128x128xf32> to vector<128x128xbf16>
    %c1_18 = arith.constant 1 : index
    %c0_19 = arith.constant 0 : index
    %c0_20 = arith.constant 0 : index
    %40 = vector.load %arg5[%c1_18, %c0_19, %c0_20] : memref<7x128x128xbf16, #tpu.memory_space<vmem>>, vector<1x128x128xbf16>
    %41 = vector.shape_cast %40 : vector<1x128x128xbf16> to vector<128x128xbf16>
    %cst_21 = arith.constant dense<0.000000e+00> : vector<128x128xf32>
    %42 = tpu.matmul %39, %41, %cst_21 {dimension_numbers = #tpu.dot_dimension_numbers<[1], [0], [0], [1], [0, 0, 1, 1], [], []>} : vector<128x128xbf16>, vector<128x128xbf16>, vector<128x128xf32> -> vector<128x128xf32>
    %c1_22 = arith.constant 1 : index
    %c0_23 = arith.constant 0 : index
    %c0_24 = arith.constant 0 : index
    %43 = vector.load %arg6[%c1_22, %c0_23, %c0_24] : memref<7x1x128xf32, #tpu.memory_space<vmem>>, vector<1x1x128xf32>
    %44 = vector.shape_cast %43 : vector<1x1x128xf32> to vector<1x128xf32>
    %45 = vector.broadcast %44 : vector<1x128xf32> to vector<128x128xf32>
    %46 = arith.addf %42, %45 : vector<128x128xf32>
    %47 = arith.truncf %46 : vector<128x128xf32> to vector<128x128xbf16>
    %c0_25 = arith.constant 0 : index
    %c0_26 = arith.constant 0 : index
    %48 = vector.load %arg9[%c0_25, %c0_26] : memref<128x32xbf16, #tpu.memory_space<vmem>>, vector<128x32xbf16>
    %cst_27 = arith.constant dense<0.000000e+00> : vector<128x32xf32>
    %49 = tpu.matmul %47, %48, %cst_27 {dimension_numbers = #tpu.dot_dimension_numbers<[1], [0], [0], [1], [0, 0, 1, 1], [], []>} : vector<128x128xbf16>, vector<128x32xbf16>, vector<128x32xf32> -> vector<128x32xf32>
    %cst_28 = arith.constant 0.0883883461 : f32
    %50 = vector.broadcast %cst_28 : f32 to vector<128x32xf32>
    %51 = arith.mulf %49, %50 : vector<128x32xf32>
    %cst_29 = arith.constant dense<0xFF800000> : vector<128xf32>
    %52 = vector.multi_reduction <maximumf>, %51, %cst_29 [1] : vector<128x32xf32> to vector<128xf32>
    %53 = vector.shape_cast %52 : vector<128xf32> to vector<128x1xf32>
    %54 = vector.broadcast %53 : vector<128x1xf32> to vector<128x32xf32>
    %55 = arith.subf %51, %54 : vector<128x32xf32>
    %56 = math.exp %55 : vector<128x32xf32>
    %cst_30 = arith.constant dense<0.000000e+00> : vector<128xf32>
    %57 = vector.multi_reduction <add>, %56, %cst_30 [1] : vector<128x32xf32> to vector<128xf32>
    %58 = vector.shape_cast %57 : vector<128xf32> to vector<128x1xf32>
    %59 = tpu.reciprocal %58 {approx = true} : vector<128x1xf32> -> vector<128x1xf32>
    %60 = vector.broadcast %59 : vector<128x1xf32> to vector<128x32xf32>
    %61 = arith.mulf %56, %60 : vector<128x32xf32>
    %62 = arith.truncf %61 : vector<128x32xf32> to vector<128x32xbf16>
    %c0_31 = arith.constant 0 : index
    %c0_32 = arith.constant 0 : index
    %63 = vector.load %arg8[%c0_31, %c0_32] : memref<32x128xbf16, #tpu.memory_space<vmem>>, vector<32x128xbf16>
    %cst_33 = arith.constant dense<0.000000e+00> : vector<128x128xf32>
    %64 = tpu.matmul %62, %63, %cst_33 {dimension_numbers = #tpu.dot_dimension_numbers<[1], [0], [0], [1], [0, 0, 1, 1], [], []>} : vector<128x32xbf16>, vector<32x128xbf16>, vector<128x128xf32> -> vector<128x128xf32>
    %65 = arith.mulf %38, %38 : vector<128x128xf32>
    %cst_34 = arith.constant dense<0.000000e+00> : vector<128xf32>
    %66 = vector.multi_reduction <add>, %65, %cst_34 [1] : vector<128x128xf32> to vector<128xf32>
    %67 = vector.shape_cast %66 : vector<128xf32> to vector<128x1xf32>
    %cst_35 = arith.constant 0.0883883461 : f32
    %68 = vector.broadcast %cst_35 : f32 to vector<128x1xf32>
    %69 = arith.mulf %67, %68 : vector<128x1xf32>
    %cst_36 = arith.constant 0.000000e+00 : f32
    %70 = vector.broadcast %cst_36 : f32 to vector<128x1xf32>
    %71 = arith.subf %70, %69 : vector<128x1xf32>
    %72 = math.exp %71 : vector<128x1xf32>
    %cst_37 = arith.constant 1.500000e+01 : f32
    %73 = vector.broadcast %cst_37 : f32 to vector<128x1xf32>
    %74 = arith.mulf %73, %72 : vector<128x1xf32>
    %cst_38 = arith.constant 1.000000e+00 : f32
    %75 = vector.broadcast %cst_38 : f32 to vector<128x1xf32>
    %76 = arith.addf %75, %74 : vector<128x1xf32>
    %77 = tpu.reciprocal %76 {approx = true} : vector<128x1xf32> -> vector<128x1xf32>
    %78 = vector.broadcast %77 : vector<128x1xf32> to vector<128x128xf32>
    %79 = arith.mulf %78, %38 : vector<128x128xf32>
    %80 = arith.truncf %38 : vector<128x128xf32> to vector<128x128xbf16>
    %c2 = arith.constant 2 : index
    %c0_39 = arith.constant 0 : index
    %c0_40 = arith.constant 0 : index
    %81 = vector.load %arg5[%c2, %c0_39, %c0_40] : memref<7x128x128xbf16, #tpu.memory_space<vmem>>, vector<1x128x128xbf16>
    %82 = vector.shape_cast %81 : vector<1x128x128xbf16> to vector<128x128xbf16>
    %cst_41 = arith.constant dense<0.000000e+00> : vector<128x128xf32>
    %83 = tpu.matmul %80, %82, %cst_41 {dimension_numbers = #tpu.dot_dimension_numbers<[1], [0], [0], [1], [0, 0, 1, 1], [], []>} : vector<128x128xbf16>, vector<128x128xbf16>, vector<128x128xf32> -> vector<128x128xf32>
    %c2_42 = arith.constant 2 : index
    %c0_43 = arith.constant 0 : index
    %c0_44 = arith.constant 0 : index
    %84 = vector.load %arg6[%c2_42, %c0_43, %c0_44] : memref<7x1x128xf32, #tpu.memory_space<vmem>>, vector<1x1x128xf32>
    %85 = vector.shape_cast %84 : vector<1x1x128xf32> to vector<1x128xf32>
    %86 = vector.broadcast %85 : vector<1x128xf32> to vector<128x128xf32>
    %87 = arith.addf %83, %86 : vector<128x128xf32>
    %88 = arith.truncf %64 : vector<128x128xf32> to vector<128x128xbf16>
    %c3 = arith.constant 3 : index
    %c0_45 = arith.constant 0 : index
    %c0_46 = arith.constant 0 : index
    %89 = vector.load %arg5[%c3, %c0_45, %c0_46] : memref<7x128x128xbf16, #tpu.memory_space<vmem>>, vector<1x128x128xbf16>
    %90 = vector.shape_cast %89 : vector<1x128x128xbf16> to vector<128x128xbf16>
    %cst_47 = arith.constant dense<0.000000e+00> : vector<128x128xf32>
    %91 = tpu.matmul %88, %90, %cst_47 {dimension_numbers = #tpu.dot_dimension_numbers<[1], [0], [0], [1], [0, 0, 1, 1], [], []>} : vector<128x128xbf16>, vector<128x128xbf16>, vector<128x128xf32> -> vector<128x128xf32>
    %c3_48 = arith.constant 3 : index
    %c0_49 = arith.constant 0 : index
    %c0_50 = arith.constant 0 : index
    %92 = vector.load %arg6[%c3_48, %c0_49, %c0_50] : memref<7x1x128xf32, #tpu.memory_space<vmem>>, vector<1x1x128xf32>
    %93 = vector.shape_cast %92 : vector<1x1x128xf32> to vector<1x128xf32>
    %94 = vector.broadcast %93 : vector<1x128xf32> to vector<128x128xf32>
    %95 = arith.addf %91, %94 : vector<128x128xf32>
    %96 = arith.truncf %79 : vector<128x128xf32> to vector<128x128xbf16>
    %c3_51 = arith.constant 3 : index
    %c0_52 = arith.constant 0 : index
    %c0_53 = arith.constant 0 : index
    %97 = vector.load %arg5[%c3_51, %c0_52, %c0_53] : memref<7x128x128xbf16, #tpu.memory_space<vmem>>, vector<1x128x128xbf16>
    %98 = vector.shape_cast %97 : vector<1x128x128xbf16> to vector<128x128xbf16>
    %cst_54 = arith.constant dense<0.000000e+00> : vector<128x128xf32>
    %99 = tpu.matmul %96, %98, %cst_54 {dimension_numbers = #tpu.dot_dimension_numbers<[1], [0], [0], [1], [0, 0, 1, 1], [], []>} : vector<128x128xbf16>, vector<128x128xbf16>, vector<128x128xf32> -> vector<128x128xf32>
    %c3_55 = arith.constant 3 : index
    %c0_56 = arith.constant 0 : index
    %c0_57 = arith.constant 0 : index
    %100 = vector.load %arg6[%c3_55, %c0_56, %c0_57] : memref<7x1x128xf32, #tpu.memory_space<vmem>>, vector<1x1x128xf32>
    %101 = vector.shape_cast %100 : vector<1x1x128xf32> to vector<1x128xf32>
    %102 = vector.broadcast %101 : vector<1x128xf32> to vector<128x128xf32>
    %103 = arith.addf %99, %102 : vector<128x128xf32>
    %104 = arith.truncf %64 : vector<128x128xf32> to vector<128x128xbf16>
    %c4 = arith.constant 4 : index
    %c0_58 = arith.constant 0 : index
    %c0_59 = arith.constant 0 : index
    %105 = vector.load %arg5[%c4, %c0_58, %c0_59] : memref<7x128x128xbf16, #tpu.memory_space<vmem>>, vector<1x128x128xbf16>
    %106 = vector.shape_cast %105 : vector<1x128x128xbf16> to vector<128x128xbf16>
    %cst_60 = arith.constant dense<0.000000e+00> : vector<128x128xf32>
    %107 = tpu.matmul %104, %106, %cst_60 {dimension_numbers = #tpu.dot_dimension_numbers<[1], [0], [0], [1], [0, 0, 1, 1], [], []>} : vector<128x128xbf16>, vector<128x128xbf16>, vector<128x128xf32> -> vector<128x128xf32>
    %c4_61 = arith.constant 4 : index
    %c0_62 = arith.constant 0 : index
    %c0_63 = arith.constant 0 : index
    %108 = vector.load %arg6[%c4_61, %c0_62, %c0_63] : memref<7x1x128xf32, #tpu.memory_space<vmem>>, vector<1x1x128xf32>
    %109 = vector.shape_cast %108 : vector<1x1x128xf32> to vector<1x128xf32>
    %110 = vector.broadcast %109 : vector<1x128xf32> to vector<128x128xf32>
    %111 = arith.addf %107, %110 : vector<128x128xf32>
    %112 = arith.truncf %79 : vector<128x128xf32> to vector<128x128xbf16>
    %c4_64 = arith.constant 4 : index
    %c0_65 = arith.constant 0 : index
    %c0_66 = arith.constant 0 : index
    %113 = vector.load %arg5[%c4_64, %c0_65, %c0_66] : memref<7x128x128xbf16, #tpu.memory_space<vmem>>, vector<1x128x128xbf16>
    %114 = vector.shape_cast %113 : vector<1x128x128xbf16> to vector<128x128xbf16>
    %cst_67 = arith.constant dense<0.000000e+00> : vector<128x128xf32>
    %115 = tpu.matmul %112, %114, %cst_67 {dimension_numbers = #tpu.dot_dimension_numbers<[1], [0], [0], [1], [0, 0, 1, 1], [], []>} : vector<128x128xbf16>, vector<128x128xbf16>, vector<128x128xf32> -> vector<128x128xf32>
    %c4_68 = arith.constant 4 : index
    %c0_69 = arith.constant 0 : index
    %c0_70 = arith.constant 0 : index
    %116 = vector.load %arg6[%c4_68, %c0_69, %c0_70] : memref<7x1x128xf32, #tpu.memory_space<vmem>>, vector<1x1x128xf32>
    %117 = vector.shape_cast %116 : vector<1x1x128xf32> to vector<1x128xf32>
    %118 = vector.broadcast %117 : vector<1x128xf32> to vector<128x128xf32>
    %119 = arith.addf %115, %118 : vector<128x128xf32>
    %c0_71 = arith.constant 0 : index
    %c0_72 = arith.constant 0 : index
    %120 = vector.load %arg10[%c0_71, %c0_72] : memref<128x8xf32, #tpu.memory_space<vmem>>, vector<128x8xf32>
    %c0_73 = arith.constant 0 : index
    %c0_74 = arith.constant 0 : index
    %121 = vector.load %arg11[%c0_73, %c0_74] : memref<8x128xf32, #tpu.memory_space<vmem>>, vector<8x128xf32>
    %122 = arith.mulf %87, %95 : vector<128x128xf32>
    %cst_75 = arith.constant dense<0.000000e+00> : vector<128x8xf32>
    %123 = tpu.matmul %122, %120, %cst_75 {dimension_numbers = #tpu.dot_dimension_numbers<[1], [0], [0], [1], [0, 0, 1, 1], [], []>} : vector<128x128xf32>, vector<128x8xf32>, vector<128x8xf32> -> vector<128x8xf32>
    %cst_76 = arith.constant 2.500000e-01 : f32
    %124 = vector.broadcast %cst_76 : f32 to vector<128x8xf32>
    %125 = arith.mulf %123, %124 : vector<128x8xf32>
    %126 = arith.mulf %87, %103 : vector<128x128xf32>
    %cst_77 = arith.constant dense<0.000000e+00> : vector<128x8xf32>
    %127 = tpu.matmul %126, %120, %cst_77 {dimension_numbers = #tpu.dot_dimension_numbers<[1], [0], [0], [1], [0, 0, 1, 1], [], []>} : vector<128x128xf32>, vector<128x8xf32>, vector<128x8xf32> -> vector<128x8xf32>
    %cst_78 = arith.constant 2.500000e-01 : f32
    %128 = vector.broadcast %cst_78 : f32 to vector<128x8xf32>
    %129 = arith.mulf %127, %128 : vector<128x8xf32>
    %130 = arith.maximumf %125, %129 : vector<128x8xf32>
    %131 = arith.subf %125, %130 : vector<128x8xf32>
    %132 = math.exp %131 : vector<128x8xf32>
    %133 = arith.subf %129, %130 : vector<128x8xf32>
    %134 = math.exp %133 : vector<128x8xf32>
    %135 = arith.addf %132, %134 : vector<128x8xf32>
    %136 = tpu.reciprocal %135 {approx = true} : vector<128x8xf32> -> vector<128x8xf32>
    %137 = arith.mulf %132, %136 : vector<128x8xf32>
    %cst_79 = arith.constant dense<0.000000e+00> : vector<128x128xf32>
    %138 = tpu.matmul %137, %121, %cst_79 {dimension_numbers = #tpu.dot_dimension_numbers<[1], [0], [0], [1], [0, 0, 1, 1], [], []>} : vector<128x8xf32>, vector<8x128xf32>, vector<128x128xf32> -> vector<128x128xf32>
    %139 = arith.mulf %134, %136 : vector<128x8xf32>
    %cst_80 = arith.constant dense<0.000000e+00> : vector<128x128xf32>
    %140 = tpu.matmul %139, %121, %cst_80 {dimension_numbers = #tpu.dot_dimension_numbers<[1], [0], [0], [1], [0, 0, 1, 1], [], []>} : vector<128x8xf32>, vector<8x128xf32>, vector<128x128xf32> -> vector<128x128xf32>
    %141 = arith.mulf %138, %111 : vector<128x128xf32>
    %142 = arith.mulf %140, %119 : vector<128x128xf32>
    %143 = arith.addf %141, %142 : vector<128x128xf32>
    %144 = arith.truncf %143 : vector<128x128xf32> to vector<128x128xbf16>
    %c5 = arith.constant 5 : index
    %c0_81 = arith.constant 0 : index
    %c0_82 = arith.constant 0 : index
    %145 = vector.load %arg5[%c5, %c0_81, %c0_82] : memref<7x128x128xbf16, #tpu.memory_space<vmem>>, vector<1x128x128xbf16>
    %146 = vector.shape_cast %145 : vector<1x128x128xbf16> to vector<128x128xbf16>
    %cst_83 = arith.constant dense<0.000000e+00> : vector<128x128xf32>
    %147 = tpu.matmul %144, %146, %cst_83 {dimension_numbers = #tpu.dot_dimension_numbers<[1], [0], [0], [1], [0, 0, 1, 1], [], []>} : vector<128x128xbf16>, vector<128x128xbf16>, vector<128x128xf32> -> vector<128x128xf32>
    %c5_84 = arith.constant 5 : index
    %c0_85 = arith.constant 0 : index
    %c0_86 = arith.constant 0 : index
    %148 = vector.load %arg6[%c5_84, %c0_85, %c0_86] : memref<7x1x128xf32, #tpu.memory_space<vmem>>, vector<1x1x128xf32>
    %149 = vector.shape_cast %148 : vector<1x1x128xf32> to vector<1x128xf32>
    %150 = vector.broadcast %149 : vector<1x128xf32> to vector<128x128xf32>
    %151 = arith.addf %147, %150 : vector<128x128xf32>
    %152 = arith.addf %38, %151 : vector<128x128xf32>
    %cst_87 = arith.constant dense<0.000000e+00> : vector<128xf32>
    %153 = vector.multi_reduction <add>, %152, %cst_87 [1] : vector<128x128xf32> to vector<128xf32>
    %154 = vector.shape_cast %153 : vector<128xf32> to vector<128x1xf32>
    %cst_88 = arith.constant 1.280000e+02 : f32
    %155 = vector.broadcast %cst_88 : f32 to vector<128x1xf32>
    %156 = arith.divf %154, %155 : vector<128x1xf32>
    %157 = vector.broadcast %156 : vector<128x1xf32> to vector<128x128xf32>
    %158 = arith.subf %152, %157 : vector<128x128xf32>
    %159 = arith.mulf %158, %158 : vector<128x128xf32>
    %cst_89 = arith.constant dense<0.000000e+00> : vector<128xf32>
    %160 = vector.multi_reduction <add>, %159, %cst_89 [1] : vector<128x128xf32> to vector<128xf32>
    %161 = vector.shape_cast %160 : vector<128xf32> to vector<128x1xf32>
    %cst_90 = arith.constant 1.280000e+02 : f32
    %162 = vector.broadcast %cst_90 : f32 to vector<128x1xf32>
    %163 = arith.divf %161, %162 : vector<128x1xf32>
    %164 = vector.broadcast %156 : vector<128x1xf32> to vector<128x128xf32>
    %165 = arith.subf %152, %164 : vector<128x128xf32>
    %cst_91 = arith.constant 9.99999974E-6 : f32
    %166 = vector.broadcast %cst_91 : f32 to vector<128x1xf32>
    %167 = arith.addf %163, %166 : vector<128x1xf32>
    %168 = math.rsqrt %167 : vector<128x1xf32>
    %169 = vector.broadcast %168 : vector<128x1xf32> to vector<128x128xf32>
    %170 = arith.mulf %165, %169 : vector<128x128xf32>
    %c2_92 = arith.constant 2 : index
    %c0_93 = arith.constant 0 : index
    %c0_94 = arith.constant 0 : index
    %171 = vector.load %arg7[%c2_92, %c0_93, %c0_94] : memref<6x1x128xf32, #tpu.memory_space<vmem>>, vector<1x1x128xf32>
    %172 = vector.shape_cast %171 : vector<1x1x128xf32> to vector<1x128xf32>
    %173 = vector.broadcast %172 : vector<1x128xf32> to vector<128x128xf32>
    %174 = arith.mulf %170, %173 : vector<128x128xf32>
    %c3_95 = arith.constant 3 : index
    %c0_96 = arith.constant 0 : index
    %c0_97 = arith.constant 0 : index
    %175 = vector.load %arg7[%c3_95, %c0_96, %c0_97] : memref<6x1x128xf32, #tpu.memory_space<vmem>>, vector<1x1x128xf32>
    %176 = vector.shape_cast %175 : vector<1x1x128xf32> to vector<1x128xf32>
    %177 = vector.broadcast %176 : vector<1x128xf32> to vector<128x128xf32>
    %178 = arith.addf %174, %177 : vector<128x128xf32>
    %179 = arith.truncf %178 : vector<128x128xf32> to vector<128x128xbf16>
    %c6 = arith.constant 6 : index
    %c0_98 = arith.constant 0 : index
    %c0_99 = arith.constant 0 : index
    %180 = vector.load %arg5[%c6, %c0_98, %c0_99] : memref<7x128x128xbf16, #tpu.memory_space<vmem>>, vector<1x128x128xbf16>
    %181 = vector.shape_cast %180 : vector<1x128x128xbf16> to vector<128x128xbf16>
    %cst_100 = arith.constant dense<0.000000e+00> : vector<128x128xf32>
    %182 = tpu.matmul %179, %181, %cst_100 {dimension_numbers = #tpu.dot_dimension_numbers<[1], [0], [0], [1], [0, 0, 1, 1], [], []>} : vector<128x128xbf16>, vector<128x128xbf16>, vector<128x128xf32> -> vector<128x128xf32>
    %c6_101 = arith.constant 6 : index
    %c0_102 = arith.constant 0 : index
    %c0_103 = arith.constant 0 : index
    %183 = vector.load %arg6[%c6_101, %c0_102, %c0_103] : memref<7x1x128xf32, #tpu.memory_space<vmem>>, vector<1x1x128xf32>
    %184 = vector.shape_cast %183 : vector<1x1x128xf32> to vector<1x128xf32>
    %185 = vector.broadcast %184 : vector<1x128xf32> to vector<128x128xf32>
    %186 = arith.addf %182, %185 : vector<128x128xf32>
    %187 = arith.addf %178, %186 : vector<128x128xf32>
    %cst_104 = arith.constant dense<0.000000e+00> : vector<128xf32>
    %188 = vector.multi_reduction <add>, %187, %cst_104 [1] : vector<128x128xf32> to vector<128xf32>
    %189 = vector.shape_cast %188 : vector<128xf32> to vector<128x1xf32>
    %cst_105 = arith.constant 1.280000e+02 : f32
    %190 = vector.broadcast %cst_105 : f32 to vector<128x1xf32>
    %191 = arith.divf %189, %190 : vector<128x1xf32>
    %192 = vector.broadcast %191 : vector<128x1xf32> to vector<128x128xf32>
    %193 = arith.subf %187, %192 : vector<128x128xf32>
    %194 = arith.mulf %193, %193 : vector<128x128xf32>
    %cst_106 = arith.constant dense<0.000000e+00> : vector<128xf32>
    %195 = vector.multi_reduction <add>, %194, %cst_106 [1] : vector<128x128xf32> to vector<128xf32>
    %196 = vector.shape_cast %195 : vector<128xf32> to vector<128x1xf32>
    %cst_107 = arith.constant 1.280000e+02 : f32
    %197 = vector.broadcast %cst_107 : f32 to vector<128x1xf32>
    %198 = arith.divf %196, %197 : vector<128x1xf32>
    %199 = vector.broadcast %191 : vector<128x1xf32> to vector<128x128xf32>
    %200 = arith.subf %187, %199 : vector<128x128xf32>
    %cst_108 = arith.constant 9.99999974E-6 : f32
    %201 = vector.broadcast %cst_108 : f32 to vector<128x1xf32>
    %202 = arith.addf %198, %201 : vector<128x1xf32>
    %203 = math.rsqrt %202 : vector<128x1xf32>
    %204 = vector.broadcast %203 : vector<128x1xf32> to vector<128x128xf32>
    %205 = arith.mulf %200, %204 : vector<128x128xf32>
    %c4_109 = arith.constant 4 : index
    %c0_110 = arith.constant 0 : index
    %c0_111 = arith.constant 0 : index
    %206 = vector.load %arg7[%c4_109, %c0_110, %c0_111] : memref<6x1x128xf32, #tpu.memory_space<vmem>>, vector<1x1x128xf32>
    %207 = vector.shape_cast %206 : vector<1x1x128xf32> to vector<1x128xf32>
    %208 = vector.broadcast %207 : vector<1x128xf32> to vector<128x128xf32>
    %209 = arith.mulf %205, %208 : vector<128x128xf32>
    %c5_112 = arith.constant 5 : index
    %c0_113 = arith.constant 0 : index
    %c0_114 = arith.constant 0 : index
    %210 = vector.load %arg7[%c5_112, %c0_113, %c0_114] : memref<6x1x128xf32, #tpu.memory_space<vmem>>, vector<1x1x128xf32>
    %211 = vector.shape_cast %210 : vector<1x1x128xf32> to vector<1x128xf32>
    %212 = vector.broadcast %211 : vector<1x128xf32> to vector<128x128xf32>
    %213 = arith.addf %209, %212 : vector<128x128xf32>
    %c0_115 = arith.constant 0 : index
    %c0_116 = arith.constant 0 : index
    %214 = vector.load %arg14[%c0_115, %c0_116] : memref<128x128xf32, #tpu.memory_space<vmem>>, vector<128x128xf32>
    tpu.vector_store %arg14[%c0_115, %c0_116], %213 {strides = array<i32>} : memref<128x128xf32, #tpu.memory_space<vmem>>, vector<128x128xf32>,
    %c1_i32 = arith.constant 1 : i32
    %215 = arith.cmpi eq, %arg1, %c1_i32 : i32
    %216 = arith.extui %215 : i1 to i32
    %c0_i32_117 = arith.constant 0 : i32
    %217 = arith.cmpi ne, %216, %c0_i32_117 : i32
    scf.if %217 {
      %c0_118 = arith.constant 0 : index
      %c0_119 = arith.constant 0 : index
      %218 = vector.load %arg14[%c0_118, %c0_119] : memref<128x128xf32, #tpu.memory_space<vmem>>, vector<128x128xf32>
      %cst_120 = arith.constant dense<0.000000e+00> : vector<128xf32>
      %219 = vector.multi_reduction <add>, %218, %cst_120 [1] : vector<128x128xf32> to vector<128xf32>
      %220 = vector.shape_cast %219 : vector<128xf32> to vector<128x1xf32>
      %cst_121 = arith.constant 1.280000e+02 : f32
      %221 = vector.broadcast %cst_121 : f32 to vector<128x1xf32>
      %222 = arith.divf %220, %221 : vector<128x1xf32>
      %223 = vector.broadcast %222 : vector<128x1xf32> to vector<128x128xf32>
      %224 = arith.subf %218, %223 : vector<128x128xf32>
      %225 = arith.mulf %224, %224 : vector<128x128xf32>
      %cst_122 = arith.constant dense<0.000000e+00> : vector<128xf32>
      %226 = vector.multi_reduction <add>, %225, %cst_122 [1] : vector<128x128xf32> to vector<128xf32>
      %227 = vector.shape_cast %226 : vector<128xf32> to vector<128x1xf32>
      %cst_123 = arith.constant 1.280000e+02 : f32
      %228 = vector.broadcast %cst_123 : f32 to vector<128x1xf32>
      %229 = arith.divf %227, %228 : vector<128x1xf32>
      %230 = vector.broadcast %222 : vector<128x1xf32> to vector<128x128xf32>
      %231 = arith.subf %218, %230 : vector<128x128xf32>
      %cst_124 = arith.constant 9.99999974E-6 : f32
      %232 = vector.broadcast %cst_124 : f32 to vector<128x1xf32>
      %233 = arith.addf %229, %232 : vector<128x1xf32>
      %234 = math.rsqrt %233 : vector<128x1xf32>
      %235 = vector.broadcast %234 : vector<128x1xf32> to vector<128x128xf32>
      %236 = arith.mulf %231, %235 : vector<128x128xf32>
      %c0_125 = arith.constant 0 : index
      %c0_126 = arith.constant 0 : index
      %237 = vector.load %arg12[%c0_125, %c0_126] : memref<1x128xf32, #tpu.memory_space<vmem>>, vector<1x128xf32>
      %238 = vector.broadcast %237 : vector<1x128xf32> to vector<128x128xf32>
      %239 = arith.mulf %236, %238 : vector<128x128xf32>
      %c0_127 = arith.constant 0 : index
      %c0_128 = arith.constant 0 : index
      %240 = vector.load %arg13[%c0_127, %c0_128] : memref<1x128xf32, #tpu.memory_space<vmem>>, vector<1x128xf32>
      %241 = vector.broadcast %240 : vector<1x128xf32> to vector<128x128xf32>
      %242 = arith.addf %239, %241 : vector<128x128xf32>
      %c0_129 = arith.constant 0 : index
      %c0_130 = arith.constant 0 : index
      %243 = vector.load %arg14[%c0_129, %c0_130] : memref<128x128xf32, #tpu.memory_space<vmem>>, vector<128x128xf32>
      tpu.vector_store %arg14[%c0_129, %c0_130], %242 {strides = array<i32>} : memref<128x128xf32, #tpu.memory_space<vmem>>, vector<128x128xf32>,
    } else {
    }
    return
  }
  func.func @transform_0(%arg0: i32, %arg1: i32) -> (i32, i32) {
    %c0_i32 = arith.constant 0 : i32
    %c0_i32_0 = arith.constant 0 : i32
    return %arg0, %c0_i32 : i32, i32
  }
  func.func @transform_1(%arg0: i32, %arg1: i32) -> (i32, i32) {
    %c0_i32 = arith.constant 0 : i32
    %c0_i32_0 = arith.constant 0 : i32
    %c0_i32_1 = arith.constant 0 : i32
    return %c0_i32, %c0_i32_0 : i32, i32
  }
  func.func @transform_2(%arg0: i32, %arg1: i32) -> (i32, i32) {
    %c0_i32 = arith.constant 0 : i32
    %c0_i32_0 = arith.constant 0 : i32
    %c0_i32_1 = arith.constant 0 : i32
    return %c0_i32, %c0_i32_0 : i32, i32
  }
  func.func @transform_3(%arg0: i32, %arg1: i32) -> (i32, i32, i32) {
    %c0_i32 = arith.constant 0 : i32
    %c0_i32_0 = arith.constant 0 : i32
    %c0_i32_1 = arith.constant 0 : i32
    return %arg1, %c0_i32, %c0_i32_0 : i32, i32, i32
  }
  func.func @transform_4(%arg0: i32, %arg1: i32) -> (i32, i32, i32) {
    %c0_i32 = arith.constant 0 : i32
    %c0_i32_0 = arith.constant 0 : i32
    %c0_i32_1 = arith.constant 0 : i32
    return %arg1, %c0_i32, %c0_i32_0 : i32, i32, i32
  }
  func.func @transform_5(%arg0: i32, %arg1: i32) -> (i32, i32, i32) {
    %c0_i32 = arith.constant 0 : i32
    %c0_i32_0 = arith.constant 0 : i32
    %c0_i32_1 = arith.constant 0 : i32
    return %arg1, %c0_i32, %c0_i32_0 : i32, i32, i32
  }
  func.func @transform_6(%arg0: i32, %arg1: i32) -> (i32, i32) {
    %c0_i32 = arith.constant 0 : i32
    %c0_i32_0 = arith.constant 0 : i32
    return %arg1, %c0_i32 : i32, i32
  }
  func.func @transform_7(%arg0: i32, %arg1: i32) -> (i32, i32) {
    %c0_i32 = arith.constant 0 : i32
    %c0_i32_0 = arith.constant 0 : i32
    return %arg1, %c0_i32 : i32, i32
  }
  func.func @transform_8(%arg0: i32, %arg1: i32) -> (i32, i32) {
    %c0_i32 = arith.constant 0 : i32
    %c0_i32_0 = arith.constant 0 : i32
    %c0_i32_1 = arith.constant 0 : i32
    return %c0_i32, %c0_i32_0 : i32, i32
  }
  func.func @transform_9(%arg0: i32, %arg1: i32) -> (i32, i32) {
    %c0_i32 = arith.constant 0 : i32
    %c0_i32_0 = arith.constant 0 : i32
    %c0_i32_1 = arith.constant 0 : i32
    return %c0_i32, %c0_i32_0 : i32, i32
  }
  func.func @transform_10(%arg0: i32, %arg1: i32) -> (i32, i32) {
    %c0_i32 = arith.constant 0 : i32
    %c0_i32_0 = arith.constant 0 : i32
    %c0_i32_1 = arith.constant 0 : i32
    return %c0_i32, %c0_i32_0 : i32, i32
  }
  func.func @transform_11(%arg0: i32, %arg1: i32) -> (i32, i32) {
    %c0_i32 = arith.constant 0 : i32
    %c0_i32_0 = arith.constant 0 : i32
    %c0_i32_1 = arith.constant 0 : i32
    return %c0_i32, %c0_i32_0 : i32, i32
  }
  func.func @transform_12(%arg0: i32, %arg1: i32) -> (i32, i32) {
    %c0_i32 = arith.constant 0 : i32
    %c0_i32_0 = arith.constant 0 : i32
    return %arg0, %c0_i32 : i32, i32
  }
}

</mosaic_0001>

<bundles_post_ra>
// kernel: memory_augmented_transformer.1
= control target key start
LH: loop header
LB: loop body
LE: loop exit
PB: predicated region body
PF: predicated region fallthrough
CT: control target
= control target key end

     0   :  { %s9296_s0 = inlined_call_operand.vmem [shape: f32[256,128], index: 0, kind: input, shape index: {}]   ;;  %s9297_s1 = inlined_call_operand.hbm [shape: bf16[128,128], index: 1, kind: input, shape index: {}]   ;;  %s9298_s2 = inlined_call_operand.hbm [shape: f32[1,128], index: 2, kind: input, shape index: {}]   ;;  %s9299_s3 = inlined_call_operand.hbm [shape: bf16[14,128,128], index: 3, kind: input, shape index: {}]   ;;  %s9300_s4 = inlined_call_operand.vmem [shape: f32[14,1,128], index: 4, kind: input, shape index: {}]   ;;  %s9301_s5 = inlined_call_operand.vmem [shape: f32[12,1,128], index: 5, kind: input, shape index: {}]   ;;  %s9302_s6 = inlined_call_operand.vmem [shape: bf16[64,128], index: 6, kind: input, shape index: {}]   ;;  %s9303_s7 = inlined_call_operand.vmem [shape: bf16[256,32], index: 7, kind: input, shape index: {}]   ;;  %s9304_s8 = inlined_call_operand.vmem [shape: f32[128,8], index: 8, kind: input, shape index: {}]   ;;  %s9305_s9 = inlined_call_operand.vmem [shape: f32[8,128], index: 9, kind: input, shape index: {}]   ;;  %s9306_s10 = inlined_call_operand.vmem [shape: f32[1,128], index: 10, kind: input, shape index: {}]   ;;  %s9307_s11 = inlined_call_operand.vmem [shape: f32[1,128], index: 11, kind: input, shape index: {}]   ;;  %s9308_s12 = inlined_call_operand.hbm [shape: f32[256,128], index: 12, kind: output, shape index: {}]  }
   0x1   :  { %9349 = sst [smem:[#allocation48_spill]] %s9296_s0 }
   0x2   :  { %9350 = sst [smem:[#allocation49_spill]] %s9297_s1 }
   0x3   :  { %9351 = sst [smem:[#allocation50_spill]] %s9298_s2 }
   0x4   :  { %9352 = sst [smem:[#allocation51_spill]] %s9299_s3 }
   0x5   :  { %9353 = sst [smem:[#allocation52_spill]] %s9300_s4 }
   0x6   :  { %9354 = sst [smem:[#allocation53_spill]] %s9301_s5 }
   0x7   :  { %9355 = sst [smem:[#allocation54_spill]] %s9302_s6 }
   0x8   :  { %9356 = sst [smem:[#allocation55_spill]] %s9303_s7 }
   0x9   :  { %9357 = sst [smem:[#allocation56_spill]] %s9304_s8 }
   0xa   :  { %9358 = sst [smem:[#allocation57_spill]] %s9305_s9 }
   0xb   :  { %9359 = sst [smem:[#allocation58_spill]] %s9306_s10 }
   0xc   :  { %9360 = sst [smem:[#allocation59_spill]] %s9307_s11 }
   0xd   :  { %9361 = sst [smem:[#allocation60_spill]] %s9308_s12 }
   0xe   :  { %17 = vsyncpa [#allocation3], 0 }
   0xf   :  { %18 = vsyncpa [#allocation6], 0 }
  0x10   :  { %19 = vsyncpa [#allocation4], 0 }
  0x11   :  { %21 = vsyncpa [#allocation4 + $0x1], 0  ;;  %s7094_s21 = smov 0   ;;  %s7096_s22 = smov 0  }
  0x12   :  { %s7098_s23 = smov 0   ;;  %s7100_s24 = smov 0  }
  0x13   :  { %s7102_s25 = smov 0   ;;  %s7104_s26 = smov 0  }
  0x14   :  { %s7106_s27 = smov 0   ;;  %s7108_s28 = smov 0  }
  0x15   :  { %s7110_s29 = smov 0   ;;  %s7112_s30 = smov 0  }
  0x16   :  { %s7114_s13 = smov 0  }
  0x17 LB: > { %9362 = sst [smem:[#allocation13_spill]] %s6979_s21  ;;  %s7148_s14 = sadd.s32 4294967295, %s7019_s13   ;;  %s7019_s13 = sphi %s7114_s13, %s27_s13   ;;  %s7015_s30 = sphi %s7112_s30, %s9478_s30   ;;  %s7011_s29 = sphi %s7110_s29, %s9477_s29   ;;  %s7007_s28 = sphi %s7108_s28, %s9476_s28   ;;  %s7003_s27 = sphi %s7106_s27, %s9475_s27   ;;  %s6999_s26 = sphi %s7104_s26, %s9484_s26   ;;  %s6995_s25 = sphi %s7102_s25, %s9483_s25   ;;  %s6991_s24 = sphi %s7100_s24, %s9482_s24   ;;  %s6987_s23 = sphi %s7098_s23, %s9481_s23   ;;  %s6983_s22 = sphi %s7096_s22, %s9480_s22   ;;  %s6979_s21 = sphi %s7094_s21, %s9479_s21  }
  0x18   : > { %9363 = sst [smem:[#allocation14_spill]] %s7011_s29  ;;  %p121_p0 = scmp.ne.s32.totalorder %s6999_s26, %s6995_s25 }
  0x19   : > { %9364 = sst [smem:[#allocation15_spill]] %s7015_s30  ;;  %p122_p1 = scmp.eq.s32.totalorder %s7019_s13, 0 }
  0x1a   : > { %p127_p2 = scmp.ne.s32.totalorder %s6995_s25, %s6991_s24  ;;  %s5066_s15 = sadd.s32 4294967294, %s7019_s13  }
  0x1b   : > { %p9315_p3 = scmp.eq.s32.totalorder %s7148_s14, 0  ;;  %p7156_p4 = por %p122_p1, %p121_p0 }
  0x1c   : > { %p338_p5 = scmp.ne.s32.totalorder %s6987_s23, %s6983_s22  ;;  %p339_p7 = scmp.eq.s32.totalorder %s7148_s14, 3 }
  0x1d   : > { %p7164_p6 = por %p9315_p3, %p127_p2  ;;  %p344_p8 = scmp.ne.s32.totalorder %s6983_s22, %s6979_s21 }
  0x1e   : > { %p345_p9 = scmp.eq.s32.totalorder %s5066_s15, 3  ;;  %p7171_p10 = por %p339_p7, %p338_p5 }
  0x1f   : > { %s9366_s17 = scalar_select %p7164_p6, 1, 0 }
  0x20   : > { %s9367_s18 = scalar_select %p7171_p10, 1, 0 }
  0x21   : > { %p5067_p11 = scmp.ge.s32.totalorder %s7019_s13, 1  ;;  %p7176_p12 = por %p345_p9, %p344_p8 }
  0x22   : > { %9368 = sst [smem:[#allocation16_spill]] %s9367_s18  ;;  %p352_p13 = scmp.lt.s32.totalorder %s7019_s13, 5 }
  0x23   : > { %s9369_s19 = scalar_select %p7176_p12, 1, 0 }
  0x24   : > { %p7181_p0 = pnand %p5067_p11, %p352_p13  ;;  %s7021_s24 = smov [#allocation2]  }
  0x25   : > { %9370 = sst [smem:[#allocation17_spill]] %s9369_s19  ;;  %s364_s12 = sshll.u32 %s7021_s24, 4  ;;  %s7185_s12 = int_to_ptr.vmem [resolvable:$true] %s364_s12 }
  0x26   : > { %p6261_p1 = pneg %p7181_p0  ;;  %p6278_p2 = scmp.lt.s32.totalorder %s7019_s13, 4 }
  0x27   : > { %s7022_s21 = smov [#allocation5]   ;;  %s9374_s1 = sld [smem:[#allocation49_spill]] }
  0x28   : > { %p7192_p5 = pnand %p6261_p1, %p9315_p3  ;;  %p7198_p7 = pnand %p6278_p2, %p7156_p4 }
  0x29   : > { %s378_s18 = sshll.u32 %s7022_s21, 4  ;;  %s7202_s18 = int_to_ptr.vmem [resolvable:$true] %s378_s18 }
  0x2a   : > { %p6805_p9 = pneg %p7192_p5 }
  0x2d   : > { %s6803_s10 = scalar_lea.hbm %s9374_s1, 1024 }
  0x2e   : > { %p6804_p8 = scmp.ne.s32.totalorder %s9374_s1, %s6803_s10  ;;  %p6810_p13 = scmp.lt.u32.totalorder %s6803_s10, %s9374_s1 }
  0x30   : > { %p6806_p4 = pnand %p6805_p9, %p6804_p8 }
  0x32   : > { %p6807_p11 = pneg %p6806_p4 }
  0x34   : > { %p6812_p1 = pnand %p6810_p13, %p6807_p11 }
  0x36   : > { %6815 = shalt.err (!%p6812_p1)
}
  0x37   : > { %s6816_s11 = scalar_lea.vmem %s7185_s12, 1024  ;;  %p6824_p10 = scmp.lt.s32.totalorder %s7185_s12, %s7185_s12 }
  0x38   : > { %p6817_p2 = scmp.ne.s32.totalorder %s7185_s12, %s6816_s11  ;;  %p6825_p8 = scmp.lt.s32.totalorder %s6816_s11, %s6816_s11 }
  0x3a   : > { %p6819_p3 = pnand %p6817_p2, %p6805_p9  ;;  %p6826_p4 = por %p6825_p8, %p6824_p10 }
  0x3c   : > { %p6820_p12 = pneg %p6819_p3 }
  0x3e   : > { %p6827_p6 = pnand %p6826_p4, %p6820_p12 }
  0x40   : > { %6830 = shalt.err (!%p6827_p6)
}
  0x41   : > { %s9318_s7 = smov 64   ;;  %s9319_s8 = smov 4  }
  0x42   : > { %6264 = dma.hbm_to_vmem [thread:$0]  (!%p7192_p5), %s9374_s1, 1024, %s7185_s12, [#allocation3], %s9318_s7, %s9318_s7, %s9319_s8  }
  0x43   : > { %s9375_s2 = sld [smem:[#allocation50_spill]] }
  0x49   : > { %s6831_s16 = scalar_lea.hbm %s9375_s2, 16 }
  0x4a   : > { %p6832_p3 = scmp.ne.s32.totalorder %s9375_s2, %s6831_s16  ;;  %p6838_p12 = scmp.lt.u32.totalorder %s6831_s16, %s9375_s2 }
  0x4c   : > { %p6834_p6 = pnand %p6832_p3, %p6805_p9 }
  0x4e   : > { %p6835_p10 = pneg %p6834_p6 }
  0x50   : > { %p6840_p11 = pnand %p6838_p12, %p6835_p10 }
  0x52   : > { %6843 = shalt.err (!%p6840_p11)
}
  0x53   : > { %s6844_s12 = scalar_lea.vmem %s7202_s18, 16  ;;  %s6851_s6 = scalar_lea.vmem %s7202_s18, 32 }
  0x54   : > { %p6845_p13 = scmp.ne.s32.totalorder %s7202_s18, %s6844_s12  ;;  %p6852_p8 = scmp.lt.s32.totalorder %s7202_s18, %s7202_s18 }
  0x55   : > { %p6853_p4 = scmp.lt.s32.totalorder %s6851_s6, %s6844_s12 }
  0x56   : > { %p6847_p1 = pnand %p6845_p13, %p6805_p9 }
  0x57   : > { %p6854_p3 = por %p6853_p4, %p6852_p8 }
  0x58   : > { %p6848_p2 = pneg %p6847_p1 }
  0x5a   : > { %p6855_p6 = pnand %p6854_p3, %p6848_p2 }
  0x5c   : > { %6858 = shalt.err (!%p6855_p6)
}
  0x5d   : > { %6267 = dma.hbm_to_vmem [thread:$0]  (!%p7192_p5), %s9375_s2, 16, %s7202_s18, [#allocation6]  }
  0x5e   : > { %s36_s9 = sadd.s32 1, %s7011_s29  ;;  %s39_s10 = sadd.s32 1, %s7015_s30 }
  0x5f   : > { %p37_p9 = scmp.ge.s32.totalorder %s36_s9, 2  ;;  %s114_s15 = sadd.s32 1, %s6999_s26 }
  0x60   : > { %s412_s21 = sand.u32 1, %s6999_s26   ;;  %s328_s24 = sadd.s32 1, %s6987_s23 }
  0x61   : > { %s9486_s9 = smov (%p37_p9, %s36_s9), 0  ;;  %s9488_s10 = smov (!%p37_p9, %s39_s10), %s7015_s30 }
  0x62   : > { %9376 = sst [smem:[#allocation18_spill]] %s9486_s9  ;;  %s111_s16 = ssub.s32 %s7011_s29, %s9486_s9 }
  0x63   : > { %p41_p10 = scmp.ge.s32.totalorder %s9488_s10, 2  ;;  %p112_p12 = scmp.eq.s32.totalorder %s111_s16, 0 }
  0x64   : > { %s410_s11 = sand.u32 1, %s7019_s13   ;;  %s6247_s18 = smul.u32 448, %s412_s21 }
  0x65   : > { %s9490_s10 = smov (%p41_p10, %s9488_s10), 0  ;;  %s5330_s4 = smul.u32 7168, %s7011_s29 }
  0x66   : > { %9377 = sst [smem:[#allocation19_spill]] %s9490_s10  ;;  %s325_s6 = ssub.s32 %s7015_s30, %s9490_s10 }
  0x67   : > { %s7274_s12 = scalar_select %p112_p12, %s6999_s26, %s114_s15  }
  0x68   : > { %p326_p5 = scmp.eq.s32.totalorder %s325_s6, 0  ;;  %s414_s5 = scalar_lea.vmem [#allocation7], %s6247_s18 }
  0x69   : > { %s422_s7 = sshll.u32 %s414_s5, 4  ;;  %s9378_s3 = sld [smem:[#allocation51_spill]]  ;;  %s7287_s7 = int_to_ptr.vmem [resolvable:$true] %s422_s7 }
  0x6a   : > { %s7280_s8 = scalar_select %p326_p5, %s6987_s23, %s328_s24  }
  0x6b   : > { %s7289_s15 = scalar_lea.sflag [#allocation3], %s410_s11  ;;  %p6861_p13 = pneg %p7198_p7 }
  0x6f   : > { %s7285_s16 = scalar_lea.hbm %s9378_s3, %s5330_s4  ;;  %s6864_s2 = scalar_lea.hbm %s9378_s3, 14336 }
  0x70   : > { %s6859_s21 = scalar_lea.hbm %s7285_s16, 7168  ;;  %p6865_p8 = scmp.lt.u32.totalorder %s7285_s16, %s9378_s3 }
  0x71   : > { %p6860_p11 = scmp.ne.s32.totalorder %s7285_s16, %s6859_s21  ;;  %p6866_p4 = scmp.lt.u32.totalorder %s6864_s2, %s6859_s21 }
  0x72   : > { %p6868_p6 = scmp.lt.u32.totalorder %s6859_s21, %s7285_s16 }
  0x73   : > { %p6862_p1 = pnand %p6861_p13, %p6860_p11  ;;  %p6867_p3 = por %p6866_p4, %p6865_p8 }
  0x75   : > { %p6863_p2 = pneg %p6862_p1  ;;  %p6869_p9 = por %p6868_p6, %p6867_p3 }
  0x77   : > { %p6870_p10 = pnand %p6869_p9, %p6863_p2 }
  0x79   : > { %6873 = shalt.err (!%p6870_p10)
}
  0x7a   : > { %s6874_s11 = scalar_lea.vmem %s7287_s7, 7168  ;;  %s7025_s4 = smov [#allocation7]  }
  0x7b   : > { %p6875_p12 = scmp.ne.s32.totalorder %s7287_s7, %s6874_s11  ;;  %s6879_s5 = sshll.u32 %s7025_s4, 4  ;;  %s6880_s5 = int_to_ptr.vmem [resolvable:$false] %s6879_s5 }
  0x7c   : > { %s6881_s24 = scalar_lea.vmem %s6880_s5, 14336  ;;  %p6882_p1 = scmp.lt.s32.totalorder %s7287_s7, %s6880_s5 }
  0x7d   : > { %p6877_p5 = pnand %p6875_p12, %p6861_p13  ;;  %p6883_p8 = scmp.lt.s32.totalorder %s6881_s24, %s6874_s11 }
  0x7f   : > { %p6878_p11 = pneg %p6877_p5  ;;  %p6884_p4 = por %p6883_p8, %p6882_p1 }
  0x81   : > { %p6885_p3 = pnand %p6884_p4, %p6878_p11 }
  0x83   : > { %6888 = shalt.err (!%p6885_p3)
}
  0x84   : > { %s9379_s21 = smov 4   ;;  %s9380_s1 = smov 64  }
  0x85   : > { %6271 = dma.hbm_to_vmem [thread:$0]  (!%p7198_p7), %s7285_s16, 7168, %s7287_s7, %s7289_s15, %s9380_s1, %s9380_s1, %s9379_s21  }
  0x86   : > { %468 = sbr.rel (%p7181_p0) target bundleno = 4145 (0x1031), region = 68 }
  0x8d   : > { %p9381_p13 = scmp.eq.s32.totalorder %s7148_s14, 0 }
  0x8f   : > { %6962 = dma.done.wait (%p9381_p13), [#allocation3], 1024   ;;  %p9382_p2 = pmov %p9381_p13 }
  0x91   : > { %6964 = vsyncadd (%p9382_p2), [#allocation3], 4294966272  ;;  %p9383_p6 = pmov %p9382_p2 }
  0x92   : > { %p9384_p9 = pmov %p9382_p2 }
  0x93   : > { %6966 = dma.done.wait (%p9383_p6), [#allocation6], 16  }
  0x94   : > { %6968 = vsyncadd (%p9384_p9), [#allocation6], 4294967280  ;;  %s478_s19 = sand.u32 1, %s7148_s14   ;;  %s480_s7 = sand.u32 1, %s6995_s25  }
  0x95   : > { %s6248_s16 = smul.u32 448, %s480_s7  ;;  %s479_s20 = scalar_lea.sflag [#allocation3], %s478_s19 }
  0x96   : > { %p9385_p0 = scmp.ne.s32.totalorder %s9366_s17, 0 }
  0x97   : > { %s7332_s15 = scalar_lea.vmem [#allocation7], %s6248_s16 }
  0x98   : > { %6970 = dma.done.wait (%p9385_p0), %s479_s20, 7168  }
  0x99   : > { %6972 = vsyncadd (%p9385_p0), %s479_s20, 4294960128  ;;  %s9320_s2 = sand.u32 1, %s6983_s22   ;;  %s5077_s18 = sshll.u32 %s7007_s28, 4 }
  0x9a   : > { %s5076_s14 = sshll.u32 %s9320_s2, 7  ;;  %p547_p7 = scmp.lt.s32.totalorder %s5077_s18, 31 }
  0x9b   : > { %s553_s6 = smul.u32 7, %s7003_s27  ;;  %s5079_s5 = sshll.u32 %s7003_s27, 2 }
  0x9c   : > { %s9492_s18 = smov (!%p547_p7, %s5077_s18), 31  ;;  %s558_s11 = smul.u32 6, %s7003_s27 }
  0x9d   : > { %p554_p10 = scmp.lt.s32.totalorder %s553_s6, 13  ;;  %s5078_s4 = sshll.u32 %s9492_s18, 3 }
  0x9e   : > { %s9386_s0 = sld [smem:[#allocation48_spill]]  ;;  %p559_p12 = scmp.lt.s32.totalorder %s558_s11, 11 }
  0x9f   : > { %s9494_s6 = smov (!%p554_p10, %s553_s6), 13  ;;  %s9387_s7 = sld [smem:[#allocation52_spill]] }
  0xa0   : > { %s9496_s11 = smov (!%p559_p12, %s558_s11), 11  ;;  %p564_p5 = scmp.lt.s32.totalorder %s5079_s5, 7 }
  0xa1   : > { %s9388_s3 = sld [smem:[#allocation53_spill]]  ;;  %s5081_s18 = sshll.u32 %s7003_s27, 4 }
  0xa2   : > { %s9498_s5 = smov (!%p564_p5, %s5079_s5), 7  ;;  %p570_p11 = scmp.lt.s32.totalorder %s5081_s18, 31 }
  0xa3   : > { %s5080_s17 = sshll.u32 %s9498_s5, 2  ;;  %s9390_s19 = sld [smem:[#allocation55_spill]] }
  0xa4   : > { %s7348_s21 = scalar_lea.vmem %s9386_s0, %s5078_s4  ;;  %s9389_s0 = sld [smem:[#allocation54_spill]] }
  0xa5   : > { %s7353_s16 = scalar_lea.vmem %s9387_s7, %s9494_s6  ;;  %s9500_s18 = smov (!%p570_p11, %s5081_s18), 31 }
  0xa6   : > { %s5082_s30 = sshll.u32 %s9500_s18, 2  ;;  %s7371_s29 = scalar_lea.vmem [#allocation8], %s5076_s14 }
  0xa7   : > { %s7358_s10 = scalar_lea.vmem %s9388_s3, %s9496_s11  ;;  %p5083_p1 = scmp.ne.s32.totalorder %s7003_s27, 0 }
  0xa8   : > { %v6376_v0 = vld [vmem:[#allocation2] sm:$0xff] (!%p5083_p1)   ;;  %v6377_v1 = vld [vmem:[#allocation2 + $0x8] sm:$0xff] (!%p5083_p1)   ;;  %v6378_v2 = vld [vmem:[#allocation2 + $0x10] sm:$0xff] (!%p5083_p1)  }
  0xa9   : > { %s7369_s7 = scalar_lea.vmem %s9390_s19, %s5082_s30  ;;  %580 = sbr.rel (%p5083_p1) target bundleno = 427 (0x1ab), region = 84  ;;  %5615 = vmatprep.subr.bf16.mxu0 (!%p5083_p1), %v6376_v0  ;;  %6215 = vmatprep.subr.bf16.mxu1 (!%p5083_p1), %v6376_v0  ;;  %v6379_v3 = vld [vmem:[#allocation2 + $0x18] sm:$0xff] (!%p5083_p1)   ;;  %v581_v4 = vld [vmem:[%s7348_s21] sm:$0xff] (!%p5083_p1)  ;;  %v582_v5 = vld [vmem:[%s7348_s21 + $0x8] sm:$0xff] (!%p5083_p1) }
  0xaa   : > { %s7364_s9 = scalar_lea.vmem %s9389_s0, %s5080_s17  ;;  %5616 = vmatpush3.bf16.msra.mxu0 (!%p5083_p1), %v6376_v0  ;;  %6223 = vmatpush3.bf16.msra.mxu1 (!%p5083_p1), %v6376_v0  ;;  %v589_v6 = vld [vmem:[%s7348_s21 + $0x40] sm:$0xff] (!%p5083_p1)  ;;  %v597_v7 = vpack.c.bf16 (!%p5083_p1), %v582_v5, %v581_v4  ;;  %v590_v8 = vld [vmem:[%s7348_s21 + $0x48] sm:$0xff] (!%p5083_p1)  ;;  %v6382_v12 = vld [vmem:[#allocation2 + $0x30] sm:$0xff] (!%p5083_p1)  }
  0xab   : > { %5617 = vmatprep.subr.bf16.mxu0 (!%p5083_p1), %v6377_v1  ;;  %6216 = vmatprep.subr.bf16.mxu1 (!%p5083_p1), %v6377_v1  ;;  %v601_v9 = vpack.c.bf16 (!%p5083_p1), %v590_v8, %v589_v6  ;;  %v6380_v10 = vld [vmem:[#allocation2 + $0x20] sm:$0xff] (!%p5083_p1)   ;;  %v6381_v11 = vld [vmem:[#allocation2 + $0x28] sm:$0xff] (!%p5083_p1)   ;;  %v6383_v13 = vld [vmem:[#allocation2 + $0x38] sm:$0xff] (!%p5083_p1)  }
  0xac   : > { %5631 = vmatprep.mubr.bf16.mxu0 (!%p5083_p1), %v597_v7  ;;  %v583_v14 = vld [vmem:[%s7348_s21 + $0x10] sm:$0xff] (!%p5083_p1)  ;;  %v584_v15 = vld [vmem:[%s7348_s21 + $0x18] sm:$0xff] (!%p5083_p1)  ;;  %v585_v18 = vld [vmem:[%s7348_s21 + $0x20] sm:$0xff] (!%p5083_p1) }
  0xad   : > { %5639 = vmatprep.mubr.bf16.mxu1 (!%p5083_p1), %v601_v9  ;;  %v591_v16 = vld [vmem:[%s7348_s21 + $0x50] sm:$0xff] (!%p5083_p1)  ;;  %v592_v17 = vld [vmem:[%s7348_s21 + $0x58] sm:$0xff] (!%p5083_p1)  ;;  %v586_v19 = vld [vmem:[%s7348_s21 + $0x28] sm:$0xff] (!%p5083_p1)  ;;  %v598_v22 = vpack.c.bf16 (!%p5083_p1), %v584_v15, %v583_v14 }
  0xae   : > { %5618 = vmatpush3.bf16.msra.mxu0 (!%p5083_p1), %v6377_v1  ;;  %6224 = vmatpush3.bf16.msra.mxu1 (!%p5083_p1), %v6377_v1  ;;  %v593_v20 = vld [vmem:[%s7348_s21 + $0x60] sm:$0xff] (!%p5083_p1)  ;;  %v594_v21 = vld [vmem:[%s7348_s21 + $0x68] sm:$0xff] (!%p5083_p1)  ;;  %v602_v23 = vpack.c.bf16 (!%p5083_p1), %v592_v17, %v591_v16  ;;  %v599_v24 = vpack.c.bf16 (!%p5083_p1), %v586_v19, %v585_v18  ;;  %v587_v26 = vld [vmem:[%s7348_s21 + $0x30] sm:$0xff] (!%p5083_p1) }
  0xaf   : > { %5619 = vmatprep.subr.bf16.mxu0 (!%p5083_p1), %v6378_v2  ;;  %6217 = vmatprep.subr.bf16.mxu1 (!%p5083_p1), %v6378_v2  ;;  %v603_v25 = vpack.c.bf16 (!%p5083_p1), %v594_v21, %v593_v20  ;;  %v588_v27 = vld [vmem:[%s7348_s21 + $0x38] sm:$0xff] (!%p5083_p1)  ;;  %v595_v28 = vld [vmem:[%s7348_s21 + $0x70] sm:$0xff] (!%p5083_p1)  ;;  %v5084_v32 = vld [vmem:[#allocation5] ss:$0 sm:$0xff] (!%p5083_p1) }
  0xb0   : > { %v596_v29 = vld [vmem:[%s7348_s21 + $0x78] sm:$0xff]  ;;  %v600_v30 = vpack.c.bf16 %v588_v27, %v587_v26 }
  0xb1   : > { %v604_v31 = vpack.c.bf16 %v596_v29, %v595_v28 }
  0xb2   : > { %5620 = vmatpush3.bf16.msra.mxu0 %v6378_v2  ;;  %6225 = vmatpush3.bf16.msra.mxu1 %v6378_v2 }
  0xb3   : > { %5621 = vmatprep.subr.bf16.mxu0 %v6379_v3  ;;  %6218 = vmatprep.subr.bf16.mxu1 %v6379_v3 }
  0xb6   : > { %5622 = vmatpush3.bf16.msra.mxu0 %v6379_v3  ;;  %6226 = vmatpush3.bf16.msra.mxu1 %v6379_v3 }
  0xb7   : > { %5623 = vmatprep.subr.bf16.mxu0 %v6380_v10  ;;  %6219 = vmatprep.subr.bf16.mxu1 %v6380_v10 }
  0xba   : > { %5624 = vmatpush3.bf16.msra.mxu0 %v6380_v10  ;;  %6227 = vmatpush3.bf16.msra.mxu1 %v6380_v10 }
  0xbb   : > { %5625 = vmatprep.subr.bf16.mxu0 %v6381_v11  ;;  %6220 = vmatprep.subr.bf16.mxu1 %v6381_v11 }
  0xbe   : > { %5626 = vmatpush3.bf16.msra.mxu0 %v6381_v11  ;;  %6228 = vmatpush3.bf16.msra.mxu1 %v6381_v11 }
  0xbf   : > { %5627 = vmatprep.subr.bf16.mxu0 %v6382_v12  ;;  %6221 = vmatprep.subr.bf16.mxu1 %v6382_v12 }
  0xc2   : > { %5628 = vmatpush3.bf16.msra.mxu0 %v6382_v12  ;;  %6229 = vmatpush3.bf16.msra.mxu1 %v6382_v12 }
  0xc3   : > { %5629 = vmatprep.subr.bf16.mxu0 %v6383_v13  ;;  %6222 = vmatprep.subr.bf16.mxu1 %v6383_v13 }
  0xc6   : > { %5630 = vmatpush3.bf16.msra.mxu0 %v6383_v13  ;;  %6230 = vmatpush3.bf16.msra.mxu1 %v6383_v13 }
  0xc9   : > { %5632 = vmatmul.mubr.bf16.vlgmr.msra.gmra.mrb[0].mxu0 %v598_v22  ;;  %5640 = vmatmul.mubr.bf16.vlgmr.msra.gmra.mrb[0].mxu1 %v602_v23 }
  0xca   : > { %5635 = vmatprep.mubr.bf16.mxu0 %v599_v24  ;;  %5643 = vmatprep.mubr.bf16.mxu1 %v603_v25 }
  0xd1   : > { %5636 = vmatmul.mubr.bf16.gmra.mrb[4].mxu0 %v600_v30  ;;  %5644 = vmatmul.mubr.bf16.gmra.mrb[4].mxu1 %v604_v31 }
 0x19c   : > { %v5633_v33 = vpop.f32.mrb[0].mxu0  ;;  %v5641_v34 = vpop.f32.mrb[0].mxu1 }
 0x19d   : > { %v719_v35 = vadd.f32 %v5633_v33, %v5084_v32  ;;  %v751_v36 = vadd.f32 %v5641_v34, %v5084_v32  ;;  %v710_v37 = vpop.f32.mrb[1].mxu0  ;;  %v742_v38 = vpop.f32.mrb[1].mxu1 }
 0x19e   : > { %v711_v39 = vadd.f32 %v5084_v32, %v710_v37  ;;  %v743_v40 = vadd.f32 %v5084_v32, %v742_v38  ;;  %v5634_v41 = vpop.f32.mrb[2].mxu0  ;;  %v5642_v42 = vpop.f32.mrb[2].mxu1 }
 0x19f   : > { %775 = vst [vmem:[%s7371_s29 + $0x10] sm:$0xff] %v719_v35  ;;  %783 = vst [vmem:[%s7371_s29 + $0x50] sm:$0xff] %v751_v36  ;;  %v722_v43 = vadd.f32 %v5634_v41, %v5084_v32  ;;  %v754_v44 = vadd.f32 %v5642_v42, %v5084_v32  ;;  %v713_v45 = vpop.f32.mrb[3].mxu0  ;;  %v745_v46 = vpop.f32.mrb[3].mxu1 }
 0x1a0   : > { %773 = vst [vmem:[%s7371_s29] sm:$0xff] %v711_v39  ;;  %781 = vst [vmem:[%s7371_s29 + $0x40] sm:$0xff] %v743_v40  ;;  %v714_v47 = vadd.f32 %v5084_v32, %v713_v45  ;;  %v746_v48 = vadd.f32 %v5084_v32, %v745_v46 }
 0x1a1   : > { %776 = vst [vmem:[%s7371_s29 + $0x18] sm:$0xff] %v722_v43  ;;  %784 = vst [vmem:[%s7371_s29 + $0x58] sm:$0xff] %v754_v44 }
 0x1a2   : > { %774 = vst [vmem:[%s7371_s29 + $0x8] sm:$0xff] %v714_v47  ;;  %782 = vst [vmem:[%s7371_s29 + $0x48] sm:$0xff] %v746_v48 }
 0x1a4   : > { %v5637_v49 = vpop.f32.mrb[4].mxu0  ;;  %v5645_v50 = vpop.f32.mrb[4].mxu1 }
 0x1a5   : > { %v735_v51 = vadd.f32 %v5637_v49, %v5084_v32  ;;  %v767_v52 = vadd.f32 %v5645_v50, %v5084_v32  ;;  %v726_v53 = vpop.f32.mrb[5].mxu0  ;;  %v758_v54 = vpop.f32.mrb[5].mxu1 }
 0x1a6   : > { %v727_v55 = vadd.f32 %v5084_v32, %v726_v53  ;;  %v759_v56 = vadd.f32 %v5084_v32, %v758_v54  ;;  %v5638_v57 = vpop.f32.mrb[6].mxu0  ;;  %v5646_v58 = vpop.f32.mrb[6].mxu1 }
 0x1a7   : > { %779 = vst [vmem:[%s7371_s29 + $0x30] sm:$0xff] %v735_v51  ;;  %787 = vst [vmem:[%s7371_s29 + $0x70] sm:$0xff] %v767_v52  ;;  %v738_v59 = vadd.f32 %v5638_v57, %v5084_v32  ;;  %v770_v60 = vadd.f32 %v5646_v58, %v5084_v32  ;;  %v729_v61 = vpop.f32.mrb[7].mxu0  ;;  %v761_v62 = vpop.f32.mrb[7].mxu1 }
 0x1a8   : > { %777 = vst [vmem:[%s7371_s29 + $0x20] sm:$0xff] %v727_v55  ;;  %785 = vst [vmem:[%s7371_s29 + $0x60] sm:$0xff] %v759_v56  ;;  %v730_v63 = vadd.f32 %v5084_v32, %v729_v61  ;;  %v762_v0 = vadd.f32 %v5084_v32, %v761_v62 }
 0x1a9   : > { %780 = vst [vmem:[%s7371_s29 + $0x38] sm:$0xff] %v738_v59  ;;  %788 = vst [vmem:[%s7371_s29 + $0x78] sm:$0xff] %v770_v60 }
 0x1aa   : > { %778 = vst [vmem:[%s7371_s29 + $0x28] sm:$0xff] %v730_v63  ;;  %786 = vst [vmem:[%s7371_s29 + $0x68] sm:$0xff] %v762_v0 }
 0x1ab PF: > { %v6384_v1 = vld [vmem:[%s7332_s15] sm:$0xff]   ;;  %v6385_v2 = vld [vmem:[%s7332_s15 + $0x8] sm:$0xff]   ;;  %v6386_v3 = vld [vmem:[%s7332_s15 + $0x10] sm:$0xff]   ;;  %vm1584_vm0 = vcmask 261120   ;;  %s9415_s30 = sld [smem:[#allocation56_spill]]  ;;  %s9437_s3 = sld [smem:[#allocation57_spill]] }
 0x1ac   : > { %5647 = vmatprep.subr.bf16.mxu0 %v6384_v1  ;;  %v6387_v4 = vld [vmem:[%s7332_s15 + $0x18] sm:$0xff]   ;;  %v789_v5 = vld [vmem:[%s7371_s29] sm:$0xff]  ;;  %v790_v6 = vld [vmem:[%s7371_s29 + $0x8] sm:$0xff]  ;;  %vm3333_vm1 = vcmask 64512   ;;  %p5319_p8 = scmp.ne.s32.totalorder %s7003_s27, 1 }
 0x1ad   : > { %5648 = vmatpush3.bf16.msra.mxu0 %v6384_v1  ;;  %v805_v7 = vpack.c.bf16 %v790_v6, %v789_v5  ;;  %v6388_v8 = vld [vmem:[%s7332_s15 + $0x20] sm:$0xff]   ;;  %v6389_v9 = vld [vmem:[%s7332_s15 + $0x28] sm:$0xff]   ;;  %v6390_v10 = vld [vmem:[%s7332_s15 + $0x30] sm:$0xff]   ;;  %s9467_s2 = sld [smem:[#allocation59_spill]] (!%p5319_p8) }
 0x1ae   : > { %5649 = vmatprep.subr.bf16.mxu0 %v6385_v2  ;;  %v6391_v11 = vld [vmem:[%s7332_s15 + $0x38] sm:$0xff]   ;;  %v791_v12 = vld [vmem:[%s7371_s29 + $0x10] sm:$0xff]  ;;  %v797_v20 = vld [vmem:[%s7371_s29 + $0x40] sm:$0xff] }
 0x1af   : > { %5663 = vmatprep.mubr.bf16.mxu0 %v805_v7  ;;  %v792_v13 = vld [vmem:[%s7371_s29 + $0x18] sm:$0xff]  ;;  %v793_v14 = vld [vmem:[%s7371_s29 + $0x20] sm:$0xff]  ;;  %v795_v18 = vld [vmem:[%s7371_s29 + $0x30] sm:$0xff] }
 0x1b0   : > { %v806_v16 = vpack.c.bf16 %v792_v13, %v791_v12  ;;  %v796_v19 = vld [vmem:[%s7371_s29 + $0x38] sm:$0xff]  ;;  %v798_v21 = vld [vmem:[%s7371_s29 + $0x48] sm:$0xff]  ;;  %v799_v24 = vld [vmem:[%s7371_s29 + $0x50] sm:$0xff] }
 0x1b1   : > { %5650 = vmatpush3.bf16.msra.mxu0 %v6385_v2  ;;  %v794_v15 = vld [vmem:[%s7371_s29 + $0x28] sm:$0xff]  ;;  %v808_v22 = vpack.c.bf16 %v796_v19, %v795_v18  ;;  %v809_v23 = vpack.c.bf16 %v798_v21, %v797_v20  ;;  %v7426_v25 = vld [vmem:[%s7371_s29 + $0x58] sm:$0xff]  ;;  %v7429_v26 = vld [vmem:[%s7371_s29 + $0x60] sm:$0xff] }
 0x1b2   : > { %5651 = vmatprep.subr.bf16.mxu0 %v6386_v3  ;;  %v807_v17 = vpack.c.bf16 %v794_v15, %v793_v14  ;;  %v7432_v27 = vld [vmem:[%s7371_s29 + $0x68] sm:$0xff]  ;;  %v810_v28 = vpack.c.bf16 %v7426_v25, %v799_v24  ;;  %v7438_v30 = vld [vmem:[%s7371_s29 + $0x70] sm:$0xff]  ;;  %v7441_v31 = vld [vmem:[%s7371_s29 + $0x78] sm:$0xff] }
 0x1b3   : > { %v811_v29 = vpack.c.bf16 %v7432_v27, %v7429_v26  ;;  %v812_v32 = vpack.c.bf16 %v7441_v31, %v7438_v30  ;;  %v5093_v33 = vld [vmem:[%s7353_s16] ss:$0 sm:$0xff] }
 0x1b5   : > { %5652 = vmatpush3.bf16.msra.mxu0 %v6386_v3 }
 0x1b6   : > { %5653 = vmatprep.subr.bf16.mxu0 %v6387_v4 }
 0x1b9   : > { %5654 = vmatpush3.bf16.msra.mxu0 %v6387_v4 }
 0x1ba   : > { %5655 = vmatprep.subr.bf16.mxu0 %v6388_v8 }
 0x1bd   : > { %5656 = vmatpush3.bf16.msra.mxu0 %v6388_v8 }
 0x1be   : > { %5657 = vmatprep.subr.bf16.mxu0 %v6389_v9 }
 0x1c1   : > { %5658 = vmatpush3.bf16.msra.mxu0 %v6389_v9 }
 0x1c2   : > { %5659 = vmatprep.subr.bf16.mxu0 %v6390_v10 }
 0x1c5   : > { %5660 = vmatpush3.bf16.msra.mxu0 %v6390_v10 }
 0x1c6   : > { %5661 = vmatprep.subr.bf16.mxu0 %v6391_v11 }
 0x1c9   : > { %5662 = vmatpush3.bf16.msra.mxu0 %v6391_v11 }
 0x1cc   : > { %5664 = vmatmul.mubr.bf16.vlgmr.msra.gmra.mrb[0].mxu0 %v806_v16 }
 0x1cd   : > { %5667 = vmatprep.mubr.bf16.mxu0 %v807_v17 }
 0x1d4   : > { %5668 = vmatmul.mubr.bf16.gmra.mrb[4].mxu0 %v808_v22 }
 0x1d5   : > { %5671 = vmatprep.mubr.bf16.mxu0 %v809_v23 }
 0x1dc   : > { %5672 = vmatmul.mubr.bf16.gmra.mrb[8].mxu0 %v810_v28 }
 0x1dd   : > { %5675 = vmatprep.mubr.bf16.mxu0 %v811_v29 }
 0x1e4   : > { %5676 = vmatmul.mubr.bf16.gmra.mrb[12].mxu0 %v812_v32 }
 0x29f   : > { %v5665_v34 = vpop.f32.mrb[0].mxu0 }
 0x2a0   : > { %v927_v35 = vadd.f32 %v5665_v34, %v5093_v33  ;;  %v918_v36 = vpop.f32.mrb[1].mxu0 }
 0x2a1   : > { %v919_v37 = vadd.f32 %v5093_v33, %v918_v36  ;;  %v5666_v38 = vpop.f32.mrb[2].mxu0 }
 0x2a2   : > { %v930_v39 = vadd.f32 %v5666_v38, %v5093_v33  ;;  %v921_v40 = vpop.f32.mrb[3].mxu0  ;;  %v7446_v41 = vadd.f32 %v927_v35, %v791_v12 }
 0x2a3   : > { %v922_v42 = vadd.f32 %v5093_v33, %v921_v40  ;;  %v7448_v43 = vadd.f32 %v919_v37, %v789_v5 }
 0x2a4   : > { %1001 = vadd.xlane.f32.xlu1 %v7446_v41  ;;  %v7452_v44 = vadd.f32 %v930_v39, %v792_v13 }
 0x2a5   : > { %997 = vadd.xlane.f32.xlu0 %v7448_v43  ;;  %v7454_v46 = vadd.f32 %v922_v42, %v790_v6 }
 0x2a7   : > { %v5669_v45 = vpop.f32.mrb[4].mxu0 }
 0x2a8   : > { %1003 = vadd.xlane.f32.xlu1 %v7452_v44  ;;  %v934_v47 = vpop.f32.mrb[5].mxu0  ;;  %v943_v51 = vadd.f32 %v5669_v45, %v5093_v33 }
 0x2a9   : > { %v935_v48 = vadd.f32 %v5093_v33, %v934_v47  ;;  %v5670_v49 = vpop.f32.mrb[6].mxu0  ;;  %999 = vadd.xlane.f32.xlu0 %v7454_v46 }
 0x2aa   : > { %v937_v50 = vpop.f32.mrb[7].mxu0  ;;  %v946_v54 = vadd.f32 %v5670_v49, %v5093_v33  ;;  %v7464_v57 = vadd.f32 %v943_v51, %v795_v18  ;;  %v6392_v18 = vld [vmem:[%s7332_s15 + $0x40] sm:$0xff]  }
 0x2ab   : > { %v938_v52 = vadd.f32 %v5093_v33, %v937_v50  ;;  %v7458_v53 = vadd.f32 %v935_v48, %v793_v14  ;;  %5679 = vmatprep.subr.bf16.mxu1 %v6392_v18 }
 0x2ac   : > { %v7467_v61 = vadd.f32 %v946_v54, %v796_v19  ;;  %5680 = vmatpush3.bf16.msra.mxu1 %v6392_v18 }
 0x2ad   : > { %1005 = vadd.xlane.f32.xlu0 %v7458_v53  ;;  %v7461_v55 = vadd.f32 %v938_v52, %v794_v15 }
 0x2af   : > { %v5673_v56 = vpop.f32.mrb[8].mxu0  ;;  %1007 = vadd.xlane.f32.xlu1 %v7461_v55 }
 0x2b0   : > { %v950_v58 = vpop.f32.mrb[9].mxu0  ;;  %v959_v63 = vadd.f32 %v5673_v56, %v5093_v33 }
 0x2b1   : > { %v951_v59 = vadd.f32 %v5093_v33, %v950_v58  ;;  %v5674_v60 = vpop.f32.mrb[10].mxu0  ;;  %1009 = vadd.xlane.f32.xlu0 %v7464_v57 }
 0x2b2   : > { %v953_v62 = vpop.f32.mrb[11].mxu0  ;;  %v962_v2 = vadd.f32 %v5674_v60, %v5093_v33  ;;  %v7476_v5 = vadd.f32 %v959_v63, %v799_v24 }
 0x2b3   : > { %v954_v0 = vadd.f32 %v5093_v33, %v953_v62  ;;  %1011 = vadd.xlane.f32.xlu1 %v7467_v61  ;;  %v7470_v1 = vadd.f32 %v951_v59, %v797_v20 }
 0x2b4   : > { %v7480_v9 = vadd.f32 %v962_v2, %v7426_v25 }
 0x2b5   : > { %1013 = vadd.xlane.f32.xlu0 %v7470_v1  ;;  %v7473_v3 = vadd.f32 %v954_v0, %v798_v21 }
 0x2b7   : > { %v5677_v4 = vpop.f32.mrb[12].mxu0  ;;  %1015 = vadd.xlane.f32.xlu1 %v7473_v3 }
 0x2b8   : > { %v966_v6 = vpop.f32.mrb[13].mxu0  ;;  %v975_v11 = vadd.f32 %v5677_v4, %v5093_v33 }
 0x2b9   : > { %v967_v7 = vadd.f32 %v5093_v33, %v966_v6  ;;  %v5678_v8 = vpop.f32.mrb[14].mxu0  ;;  %1017 = vadd.xlane.f32.xlu0 %v7476_v5 }
 0x2ba   : > { %v969_v10 = vpop.f32.mrb[15].mxu0  ;;  %v978_v14 = vadd.f32 %v5678_v8, %v5093_v33  ;;  %v7492_v16 = vadd.f32 %v975_v11, %v7438_v30  ;;  %v6394_v8 = vld [vmem:[%s7332_s15 + $0x50] sm:$0xff]  }
 0x2bb   : > { %v970_v12 = vadd.f32 %v5093_v33, %v969_v10  ;;  %1019 = vadd.xlane.f32.xlu1 %v7480_v9  ;;  %v7484_v13 = vadd.f32 %v967_v7, %v7429_v26 }
 0x2bc   : > { %v7496_v17 = vadd.f32 %v978_v14, %v7441_v31 }
 0x2bd   : > { %1021 = vadd.xlane.f32.xlu0 %v7484_v13  ;;  %v7488_v15 = vadd.f32 %v970_v12, %v7432_v27 }
 0x2bf   : > { %1023 = vadd.xlane.f32.xlu1 %v7488_v15 }
 0x2c1   : > { %1025 = vadd.xlane.f32.xlu0 %v7492_v16 }
 0x2c3   : > { %1027 = vadd.xlane.f32.xlu1 %v7496_v17 }
 0x331   : > { %v1002_v19 = vpop.xlane.xlu1 %1001 }
 0x332   : > { %v998_v20 = vpop.xlane.xlu0 %997  ;;  %v1032_v21 = vmul.f32 0.0078125, %v1002_v19 }
 0x333   : > { %v1030_v22 = vmul.f32 0.0078125, %v998_v20  ;;  %v6395_v20 = vld [vmem:[%s7332_s15 + $0x58] sm:$0xff]  }
 0x334   : > { %v7506_v29 = vsub.f32 %v7446_v41, %v1032_v21 }
 0x335   : > { %v1004_v23 = vpop.xlane.xlu1 %1003  ;;  %v7501_v24 = vsub.f32 %v7448_v43, %v1030_v22 }
 0x336   : > { %v1000_v25 = vpop.xlane.xlu0 %999  ;;  %v1033_v26 = vmul.f32 0.0078125, %v1004_v23  ;;  %v1064_v33 = vmul.f32 %v7506_v29, %v7506_v29 }
 0x337   : > { %v1031_v27 = vmul.f32 0.0078125, %v1000_v25  ;;  %v1062_v28 = vmul.f32 %v7501_v24, %v7501_v24  ;;  %v6397_v25 = vld [vmem:[%s7332_s15 + $0x68] sm:$0xff]  }
 0x338   : > { %v7516_v35 = vsub.f32 %v7452_v44, %v1033_v26  ;;  %v6399_v26 = vld [vmem:[%s7332_s15 + $0x78] sm:$0xff]  }
 0x339   : > { %1078 = vadd.xlane.f32.xlu0 %v1062_v28  ;;  %v7509_v30 = vsub.f32 %v7454_v46, %v1031_v27  ;;  %v6400_v27 = vld [vmem:[%s7369_s7] sm:$0xff]   ;;  %v6401_v28 = vld [vmem:[%s7369_s7 + $0x8] sm:$0xff]  }
 0x33a   : > { %v1006_v31 = vpop.xlane.xlu0 %1005  ;;  %v1065_v41 = vmul.f32 %v7516_v35, %v7516_v35  ;;  %5711 = vmatprep.subr.bf16.mxu0 %v6400_v27 }
 0x33b   : > { %v1034_v32 = vmul.f32 0.0078125, %v1006_v31  ;;  %v1063_v34 = vmul.f32 %v7509_v30, %v7509_v30  ;;  %5712 = vmatpush3.bf16.msra.mxu0 %v6400_v27  ;;  %v6402_v31 = vld [vmem:[%s7369_s7 + $0x10] sm:$0xff]  }
 0x33c   : > { %v1008_v36 = vpop.xlane.xlu1 %1007  ;;  %5713 = vmatprep.subr.bf16.mxu0 %v6401_v28 }
 0x33d   : > { %v1035_v37 = vmul.f32 0.0078125, %v1008_v36  ;;  %1082 = vadd.xlane.f32.xlu0 %v1064_v33  ;;  %1080 = vadd.xlane.f32.xlu1 %v1063_v34  ;;  %v7519_v38 = vsub.f32 %v7458_v53, %v1034_v32  ;;  %v6403_v32 = vld [vmem:[%s7369_s7 + $0x18] sm:$0xff]   ;;  %v6404_v33 = vld [vmem:[%s7369_s7 + $0x20] sm:$0xff]   ;;  %v6405_v34 = vld [vmem:[%s7369_s7 + $0x28] sm:$0xff]  }
 0x33e   : > { %v1010_v39 = vpop.xlane.xlu0 %1009 }
 0x33f   : > { %v1036_v40 = vmul.f32 0.0078125, %v1010_v39  ;;  %v1066_v42 = vmul.f32 %v7519_v38, %v7519_v38  ;;  %v7526_v43 = vsub.f32 %v7461_v55, %v1035_v37  ;;  %5714 = vmatpush3.bf16.msra.mxu0 %v6401_v28 }
 0x340   : > { %v1012_v44 = vpop.xlane.xlu1 %1011  ;;  %5715 = vmatprep.subr.bf16.mxu0 %v6402_v31 }
 0x341   : > { %v1037_v45 = vmul.f32 0.0078125, %v1012_v44  ;;  %1084 = vadd.xlane.f32.xlu1 %v1065_v41  ;;  %1086 = vadd.xlane.f32.xlu0 %v1066_v42  ;;  %v7529_v46 = vsub.f32 %v7464_v57, %v1036_v40  ;;  %v1067_v49 = vmul.f32 %v7526_v43, %v7526_v43 }
 0x342   : > { %v1014_v47 = vpop.xlane.xlu0 %1013 }
 0x343   : > { %v1038_v48 = vmul.f32 0.0078125, %v1014_v47  ;;  %v1068_v50 = vmul.f32 %v7529_v46, %v7529_v46  ;;  %v7536_v51 = vsub.f32 %v7467_v61, %v1037_v45  ;;  %v6393_v61 = vld [vmem:[%s7332_s15 + $0x48] sm:$0xff]   ;;  %5716 = vmatpush3.bf16.msra.mxu0 %v6402_v31 }
 0x344   : > { %v1016_v52 = vpop.xlane.xlu1 %1015  ;;  %5681 = vmatprep.subr.bf16.mxu1 %v6393_v61  ;;  %5717 = vmatprep.subr.bf16.mxu0 %v6403_v32 }
 0x345   : > { %v1039_v53 = vmul.f32 0.0078125, %v1016_v52  ;;  %1088 = vadd.xlane.f32.xlu1 %v1067_v49  ;;  %1090 = vadd.xlane.f32.xlu0 %v1068_v50  ;;  %v7539_v54 = vsub.f32 %v7470_v1, %v1038_v48  ;;  %v1069_v57 = vmul.f32 %v7536_v51, %v7536_v51 }
 0x346   : > { %v1018_v55 = vpop.xlane.xlu0 %1017  ;;  %5682 = vmatpush3.bf16.msra.mxu1 %v6393_v61 }
 0x347   : > { %v1040_v56 = vmul.f32 0.0078125, %v1018_v55  ;;  %v1070_v58 = vmul.f32 %v7539_v54, %v7539_v54  ;;  %v7546_v59 = vsub.f32 %v7473_v3, %v1039_v53  ;;  %5683 = vmatprep.subr.bf16.mxu1 %v6394_v8  ;;  %5718 = vmatpush3.bf16.msra.mxu0 %v6403_v32 }
 0x348   : > { %v1020_v60 = vpop.xlane.xlu1 %1019  ;;  %5719 = vmatprep.subr.bf16.mxu0 %v6404_v33 }
 0x349   : > { %v1041_v62 = vmul.f32 0.0078125, %v1020_v60  ;;  %1092 = vadd.xlane.f32.xlu1 %v1069_v57  ;;  %1094 = vadd.xlane.f32.xlu0 %v1070_v58  ;;  %v7550_v63 = vsub.f32 %v7476_v5, %v1040_v56  ;;  %v1071_v2 = vmul.f32 %v7546_v59, %v7546_v59 }
 0x34a   : > { %v1022_v0 = vpop.xlane.xlu0 %1021  ;;  %5684 = vmatpush3.bf16.msra.mxu1 %v6394_v8  ;;  %v7595_v8 = vld [vmem:[%s7358_s10] ss:$0 sm:$0xff] }
 0x34b   : > { %v1042_v1 = vmul.f32 0.0078125, %v1022_v0  ;;  %v1072_v4 = vmul.f32 %v7550_v63, %v7550_v63  ;;  %v7557_v3 = vsub.f32 %v7480_v9, %v1041_v62  ;;  %5685 = vmatprep.subr.bf16.mxu1 %v6395_v20  ;;  %5720 = vmatpush3.bf16.msra.mxu0 %v6404_v33 }
 0x34c   : > { %v1024_v6 = vpop.xlane.xlu1 %1023  ;;  %5721 = vmatprep.subr.bf16.mxu0 %v6405_v34 }
 0x34d   : > { %v1043_v7 = vmul.f32 0.0078125, %v1024_v6  ;;  %1096 = vadd.xlane.f32.xlu1 %v1071_v2  ;;  %1098 = vadd.xlane.f32.xlu0 %v1072_v4  ;;  %v7560_v5 = vsub.f32 %v7484_v13, %v1042_v1  ;;  %v1073_v12 = vmul.f32 %v7557_v3, %v7557_v3 }
 0x34e   : > { %v1026_v10 = vpop.xlane.xlu0 %1025  ;;  %5686 = vmatpush3.bf16.msra.mxu1 %v6395_v20 }
 0x34f   : > { %v1044_v11 = vmul.f32 0.0078125, %v1026_v10  ;;  %v1074_v14 = vmul.f32 %v7560_v5, %v7560_v5  ;;  %v7568_v9 = vsub.f32 %v7488_v15, %v1043_v7  ;;  %5722 = vmatpush3.bf16.msra.mxu0 %v6405_v34 }
 0x350   : > { %v1028_v18 = vpop.xlane.xlu1 %1027 }
 0x351   : > { %v1045_v19 = vmul.f32 0.0078125, %v1028_v18  ;;  %1100 = vadd.xlane.f32.xlu1 %v1073_v12  ;;  %1102 = vadd.xlane.f32.xlu0 %v1074_v14  ;;  %v7571_v13 = vsub.f32 %v7492_v16, %v1044_v11  ;;  %v1075_v21 = vmul.f32 %v7568_v9, %v7568_v9  ;;  %v6396_v16 = vld [vmem:[%s7332_s15 + $0x60] sm:$0xff]  }
 0x352   : > { %5687 = vmatprep.subr.bf16.mxu1 %v6396_v16 }
 0x353   : > { %v1076_v15 = vmul.f32 %v7571_v13, %v7571_v13  ;;  %v7579_v22 = vsub.f32 %v7496_v17, %v1045_v19  ;;  %5688 = vmatpush3.bf16.msra.mxu1 %v6396_v16  ;;  %v6398_v17 = vld [vmem:[%s7332_s15 + $0x70] sm:$0xff]  }
 0x354   : > { %5689 = vmatprep.subr.bf16.mxu1 %v6397_v25 }
 0x355   : > { %1104 = vadd.xlane.f32.xlu1 %v1075_v21  ;;  %1106 = vadd.xlane.f32.xlu0 %v1076_v15  ;;  %v1077_v23 = vmul.f32 %v7579_v22, %v7579_v22 }
 0x357   : > { %5690 = vmatpush3.bf16.msra.mxu1 %v6397_v25 }
 0x358   : > { %5691 = vmatprep.subr.bf16.mxu1 %v6398_v17 }
 0x359   : > { %1108 = vadd.xlane.f32.xlu1 %v1077_v23  ;;  %v7601_v23 = vld [vmem:[%s7358_s10 + $0x1] ss:$0 sm:$0xff] }
 0x35b   : > { %5692 = vmatpush3.bf16.msra.mxu1 %v6398_v17 }
 0x35c   : > { %5693 = vmatprep.subr.bf16.mxu1 %v6399_v26 }
 0x35f   : > { %5694 = vmatpush3.bf16.msra.mxu1 %v6399_v26 }
 0x3c6   : > { %v1079_v36 = vpop.xlane.xlu0 %1078 }
 0x3c7   : > { %v1110_v37 = vmul.f32 0.0078125, %v1079_v36 }
 0x3c9   : > { %v1126_v39 = vadd.f32 1e-05, %v1110_v37 }
 0x3ca   : > { %v1081_v40 = vpop.xlane.xlu1 %1080  ;;  %v1083_v41 = vpop.xlane.xlu0 %1082 }
 0x3cb   : > { %6450 = vrsqrt.f32 %v1126_v39  ;;  %v1111_v42 = vmul.f32 0.0078125, %v1081_v40  ;;  %v1112_v44 = vmul.f32 0.0078125, %v1083_v41 }
 0x3cd   : > { %v1127_v45 = vadd.f32 1e-05, %v1111_v42  ;;  %v1128_v47 = vadd.f32 1e-05, %v1112_v44 }
 0x3ce   : > { %v1085_v48 = vpop.xlane.xlu1 %1084  ;;  %v1087_v49 = vpop.xlane.xlu0 %1086 }
 0x3cf   : > { %6452 = vrsqrt.f32 %v1127_v45  ;;  %v1113_v50 = vmul.f32 0.0078125, %v1085_v48  ;;  %v1114_v52 = vmul.f32 0.0078125, %v1087_v49 }
 0x3d0   : > { %6454 = vrsqrt.f32 %v1128_v47 }
 0x3d1   : > { %v1129_v53 = vadd.f32 1e-05, %v1113_v50  ;;  %v1130_v55 = vadd.f32 1e-05, %v1114_v52 }
 0x3d2   : > { %v1089_v56 = vpop.xlane.xlu1 %1088  ;;  %v1091_v57 = vpop.xlane.xlu0 %1090 }
 0x3d3   : > { %6456 = vrsqrt.f32 %v1129_v53  ;;  %v1115_v58 = vmul.f32 0.0078125, %v1089_v56  ;;  %v1116_v60 = vmul.f32 0.0078125, %v1091_v57 }
 0x3d4   : > { %6458 = vrsqrt.f32 %v1130_v55 }
 0x3d5   : > { %v6451_v61 = vpop.eup %6450  ;;  %v1131_v62 = vadd.f32 1e-05, %v1115_v58  ;;  %v1132_v0 = vadd.f32 1e-05, %v1116_v60 }
 0x3d6   : > { %v1093_v1 = vpop.xlane.xlu1 %1092  ;;  %v1095_v2 = vpop.xlane.xlu0 %1094  ;;  %v1158_v4 = vmul.f32 %v6451_v61, %v7501_v24 }
 0x3d7   : > { %6460 = vrsqrt.f32 %v1131_v62  ;;  %v1117_v6 = vmul.f32 0.0078125, %v1093_v1  ;;  %v1118_v7 = vmul.f32 0.0078125, %v1095_v2 }
 0x3d8   : > { %6462 = vrsqrt.f32 %v1132_v0  ;;  %v1181_v21 = vmul.f32 %v7595_v8, %v1158_v4 }
 0x3d9   : > { %v6453_v10 = vpop.eup %6452  ;;  %v1133_v11 = vadd.f32 1e-05, %v1117_v6  ;;  %v1134_v12 = vadd.f32 1e-05, %v1118_v7 }
 0x3da   : > { %v6455_v14 = vpop.eup %6454  ;;  %v1097_v18 = vpop.xlane.xlu1 %1096  ;;  %v1159_v20 = vmul.f32 %v6453_v10, %v7509_v30  ;;  %v7606_v33 = vadd.f32 %v7601_v23, %v1181_v21 }
 0x3db   : > { %v1099_v19 = vpop.xlane.xlu0 %1098  ;;  %v1160_v15 = vmul.f32 %v6455_v14, %v7506_v29  ;;  %6464 = vrsqrt.f32 %v1133_v11  ;;  %v1119_v24 = vmul.f32 0.0078125, %v1097_v18 }
 0x3dc   : > { %v1120_v16 = vmul.f32 0.0078125, %v1099_v19  ;;  %6466 = vrsqrt.f32 %v1134_v12  ;;  %v1182_v25 = vmul.f32 %v7595_v8, %v1159_v20  ;;  %9391 = vst [vmem:[#allocation20_spill] sm:$0xff] %v7606_v33 }
 0x3dd   : > { %v6457_v17 = vpop.eup %6456  ;;  %v1135_v26 = vadd.f32 1e-05, %v1119_v24  ;;  %v1183_v34 = vmul.f32 %v7595_v8, %v1160_v15 }
 0x3de   : > { %v1136_v27 = vadd.f32 1e-05, %v1120_v16  ;;  %v6459_v28 = vpop.eup %6458  ;;  %v1161_v31 = vmul.f32 %v6457_v17, %v7516_v35  ;;  %v1101_v32 = vpop.xlane.xlu1 %1100  ;;  %v7609_v29 = vadd.f32 %v7601_v23, %v1182_v25 }
 0x3df   : > { %v1103_v30 = vpop.xlane.xlu0 %1102  ;;  %v1162_v36 = vmul.f32 %v6459_v28, %v7519_v38  ;;  %6468 = vrsqrt.f32 %v1135_v26  ;;  %v1121_v37 = vmul.f32 0.0078125, %v1101_v32  ;;  %v7621_v49 = vadd.f32 %v7601_v23, %v1183_v34 }
 0x3e0   : > { %9392 = vst [vmem:[#allocation21_spill] sm:$0xff] %v7609_v29  ;;  %v1122_v39 = vmul.f32 0.0078125, %v1103_v30  ;;  %6470 = vrsqrt.f32 %v1136_v27  ;;  %v7615_v40 = vpack.c.bf16 %v7609_v29, %v7606_v33  ;;  %v1184_v35 = vmul.f32 %v7595_v8, %v1161_v31 }
 0x3e1   : > { %v6461_v41 = vpop.eup %6460  ;;  %v1137_v42 = vadd.f32 1e-05, %v1121_v37  ;;  %9393 = vst [vmem:[#allocation22_spill] sm:$0xff] %v7621_v49  ;;  %v1185_v52 = vmul.f32 %v7595_v8, %v1162_v36 }
 0x3e2   : > { %v1138_v44 = vadd.f32 1e-05, %v1122_v39  ;;  %v6463_v45 = vpop.eup %6462  ;;  %v1163_v47 = vmul.f32 %v6461_v41, %v7526_v43  ;;  %v1105_v48 = vpop.xlane.xlu1 %1104  ;;  %5695 = vmatprep.mubr.bf16.mxu1 %v7615_v40  ;;  %v7624_v50 = vadd.f32 %v7601_v23, %v1184_v35 }
 0x3e3   : > { %v1107_v38 = vpop.xlane.xlu0 %1106  ;;  %v1164_v53 = vmul.f32 %v6463_v45, %v7529_v46  ;;  %6472 = vrsqrt.f32 %v1137_v42  ;;  %v1123_v55 = vmul.f32 0.0078125, %v1105_v48  ;;  %v7636_v46 = vadd.f32 %v7601_v23, %v1185_v52  ;;  %v6406_v52 = vld [vmem:[%s7369_s7 + $0x30] sm:$0xff]  }
 0x3e4   : > { %9394 = vst [vmem:[#allocation23_spill] sm:$0xff] %v7624_v50  ;;  %v1124_v56 = vmul.f32 0.0078125, %v1107_v38  ;;  %6474 = vrsqrt.f32 %v1138_v44  ;;  %v7630_v43 = vpack.c.bf16 %v7624_v50, %v7621_v49  ;;  %v1186_v57 = vmul.f32 %v7595_v8, %v1163_v47  ;;  %5723 = vmatprep.subr.bf16.mxu0 %v6406_v52 }
 0x3e5   : > { %v6465_v58 = vpop.eup %6464  ;;  %v1139_v60 = vadd.f32 1e-05, %v1123_v55  ;;  %9395 = vst [vmem:[#allocation24_spill] sm:$0xff] %v7636_v46  ;;  %v1187_v4 = vmul.f32 %v7595_v8, %v1164_v53  ;;  %5724 = vmatpush3.bf16.msra.mxu0 %v6406_v52  ;;  %v6407_v53 = vld [vmem:[%s7369_s7 + $0x38] sm:$0xff]  }
 0x3e6   : > { %v1140_v61 = vadd.f32 1e-05, %v1124_v56  ;;  %v6467_v62 = vpop.eup %6466  ;;  %v1165_v0 = vmul.f32 %v6465_v58, %v7536_v51  ;;  %v1109_v1 = vpop.xlane.xlu1 %1108  ;;  %5696 = vmatmul.mubr.bf16.vlgmr.msra.gmra.mrb[0].mxu1 %v7630_v43  ;;  %v7639_v2 = vadd.f32 %v7601_v23, %v1186_v57  ;;  %5725 = vmatprep.subr.bf16.mxu0 %v6407_v53  ;;  %v5122_v56 = vld [vmem:[%s7353_s16 + $0x1] ss:$0 sm:$0xff] }
 0x3e7   : > { %v1166_v6 = vmul.f32 %v6467_v62, %v7539_v54  ;;  %6476 = vrsqrt.f32 %v1139_v60  ;;  %v1125_v7 = vmul.f32 0.0078125, %v1109_v1  ;;  %v7651_v19 = vadd.f32 %v7601_v23, %v1187_v4 }
 0x3e8   : > { %9396 = vst [vmem:[#allocation25_spill] sm:$0xff] %v7639_v2  ;;  %6478 = vrsqrt.f32 %v1140_v61  ;;  %v7645_v10 = vpack.c.bf16 %v7639_v2, %v7636_v46  ;;  %v1188_v51 = vmul.f32 %v7595_v8, %v1165_v0 }
 0x3e9   : > { %v6469_v11 = vpop.eup %6468  ;;  %v1141_v12 = vadd.f32 1e-05, %v1125_v7  ;;  %9397 = vst [vmem:[#allocation26_spill] sm:$0xff] %v7651_v19  ;;  %v1189_v20 = vmul.f32 %v7595_v8, %v1166_v6  ;;  %5726 = vmatpush3.bf16.msra.mxu0 %v6407_v53  ;;  %v6409_v6 = vld [vmem:[%s7332_s15 + $0x88] sm:$0xff]  }
 0x3ea   : > { %v6471_v14 = vpop.eup %6470  ;;  %v1167_v18 = vmul.f32 %v6469_v11, %v7546_v59  ;;  %5699 = vmatprep.mubr.bf16.mxu1 %v7645_v10  ;;  %v7654_v54 = vadd.f32 %v7601_v23, %v1188_v51 }
 0x3eb   : > { %v1168_v21 = vmul.f32 %v6471_v14, %v7550_v63  ;;  %6480 = vrsqrt.f32 %v1141_v12  ;;  %v7666_v17 = vadd.f32 %v7601_v23, %v1189_v20  ;;  %v6410_v20 = vld [vmem:[%s7332_s15 + $0x90] sm:$0xff]  }
 0x3ec   : > { %9398 = vst [vmem:[#allocation27_spill] sm:$0xff] %v7654_v54  ;;  %v7660_v15 = vpack.c.bf16 %v7654_v54, %v7651_v19  ;;  %v1190_v24 = vmul.f32 %v7595_v8, %v1167_v18 }
 0x3ed   : > { %v6473_v59 = vpop.eup %6472  ;;  %9399 = vst [vmem:[#allocation28_spill] sm:$0xff] %v7666_v17  ;;  %v1191_v63 = vmul.f32 %v7595_v8, %v1168_v21 }
 0x3ee   : > { %v6475_v16 = vpop.eup %6474  ;;  %v1169_v25 = vmul.f32 %v6473_v59, %v7557_v3  ;;  %5700 = vmatmul.mubr.bf16.gmra.mrb[4].mxu1 %v7660_v15  ;;  %v7669_v26 = vadd.f32 %v7601_v23, %v1190_v24 }
 0x3ef   : > { %v1170_v27 = vmul.f32 %v6475_v16, %v7560_v5  ;;  %v7681_v34 = vadd.f32 %v7601_v23, %v1191_v63 }
 0x3f0   : > { %9400 = vst [vmem:[#allocation29_spill] sm:$0xff] %v7669_v26  ;;  %v7675_v28 = vpack.c.bf16 %v7669_v26, %v7666_v17  ;;  %v1192_v31 = vmul.f32 %v7595_v8, %v1169_v25  ;;  %v6411_v25 = vld [vmem:[%s7332_s15 + $0x98] sm:$0xff]  }
 0x3f1   : > { %v6477_v32 = vpop.eup %6476  ;;  %9401 = vst [vmem:[#allocation30_spill] sm:$0xff] %v7681_v34  ;;  %v1193_v5 = vmul.f32 %v7595_v8, %v1170_v27 }
 0x3f2   : > { %v6479_v3 = vpop.eup %6478  ;;  %v1171_v30 = vmul.f32 %v6477_v32, %v7568_v9  ;;  %5703 = vmatprep.mubr.bf16.mxu1 %v7675_v28  ;;  %v7684_v36 = vadd.f32 %v7601_v23, %v1192_v31 }
 0x3f3   : > { %v1172_v37 = vmul.f32 %v6479_v3, %v7571_v13  ;;  %v7696_v42 = vadd.f32 %v7601_v23, %v1193_v5  ;;  %v6412_v5 = vld [vmem:[%s7332_s15 + $0xa0] sm:$0xff]  }
 0x3f4   : > { %9402 = vst [vmem:[#allocation31_spill] sm:$0xff] %v7684_v36  ;;  %v7690_v39 = vpack.c.bf16 %v7684_v36, %v7681_v34  ;;  %v1194_v35 = vmul.f32 %v7595_v8, %v1171_v30 }
 0x3f5   : > { %v6481_v9 = vpop.eup %6480  ;;  %9403 = vst [vmem:[#allocation32_spill] sm:$0xff] %v7696_v42  ;;  %v1195_v13 = vmul.f32 %v7595_v8, %v1172_v37 }
 0x3f6   : > { %v1173_v41 = vmul.f32 %v6481_v9, %v7579_v22  ;;  %5704 = vmatmul.mubr.bf16.gmra.mrb[8].mxu1 %v7690_v39  ;;  %v7699_v44 = vadd.f32 %v7601_v23, %v1194_v35 }
 0x3f7   : > { %v7709_v22 = vadd.f32 %v7601_v23, %v1195_v13  ;;  %v6413_v13 = vld [vmem:[%s7332_s15 + $0xa8] sm:$0xff]  }
 0x3f8   : > { %9404 = vst [vmem:[#allocation33_spill] sm:$0xff] %v7699_v44  ;;  %v7704_v45 = vpack.c.bf16 %v7699_v44, %v7696_v42  ;;  %v1196_v47 = vmul.f32 %v7595_v8, %v1173_v41  ;;  %v6408_v8 = vld [vmem:[%s7332_s15 + $0x80] sm:$0xff]  }
 0x3f9   : > { %9405 = vst [vmem:[#allocation34_spill] sm:$0xff] %v7709_v22  ;;  %5763 = vmatprep.subr.bf16.mxu0 %v6408_v8 }
 0x3fa   : > { %5707 = vmatprep.mubr.bf16.mxu1 %v7704_v45  ;;  %v7712_v48 = vadd.f32 %v7601_v23, %v1196_v47 }
 0x3fc   : > { %9406 = vst [vmem:[#allocation35_spill] sm:$0xff] %v7712_v48  ;;  %v7716_v38 = vpack.c.bf16 %v7712_v48, %v7709_v22 }
 0x3fe   : > { %5708 = vmatmul.mubr.bf16.gmra.mrb[12].mxu1 %v7716_v38 }
 0x4b9   : > { %v5697_v55 = vpop.f32.mrb[0].mxu1 }
 0x4ba   : > { %v1336_v57 = vpop.f32.mrb[1].mxu1  ;;  %v1345_v58 = vadd.f32 %v5697_v55, %v5122_v56 }
 0x4bb   : > { %v5698_v23 = vpop.f32.mrb[2].mxu1  ;;  %v1337_v62 = vadd.f32 %v5122_v56, %v1336_v57 }
 0x4bc   : > { %v1348_v60 = vadd.f32 %v5698_v23, %v5122_v56  ;;  %v1339_v61 = vpop.f32.mrb[3].mxu1  ;;  %v6414_v23 = vld [vmem:[%s7332_s15 + $0xb0] sm:$0xff]  }
 0x4bd   : > { %v1340_v0 = vadd.f32 %v5122_v56, %v1339_v61 }
 0x4be   : > { %v1400_v1 = vpack.c.bf16 %v1348_v60, %v1345_v58 }
 0x4bf   : > { %v1399_v4 = vpack.c.bf16 %v1340_v0, %v1337_v62  ;;  %v6415_v0 = vld [vmem:[%s7332_s15 + $0xb8] sm:$0xff]  }
 0x4c1   : > { %v5701_v7 = vpop.f32.mrb[4].mxu1  ;;  %5727 = vmatprep.mubr.bf16.mxu0 %v1399_v4 }
 0x4c2   : > { %v1352_v51 = vpop.f32.mrb[5].mxu1  ;;  %5728 = vmatmul.mubr.bf16.vlgmr.msra.gmra.mrb[16].mxu0 %v1400_v1  ;;  %v1361_v12 = vadd.f32 %v5701_v7, %v5122_v56 }
 0x4c3   : > { %v5702_v11 = vpop.f32.mrb[6].mxu1  ;;  %5764 = vmatpush3.bf16.msra.mxu0 %v6408_v8  ;;  %v1353_v21 = vadd.f32 %v5122_v56, %v1352_v51 }
 0x4c4   : > { %v1364_v14 = vadd.f32 %v5702_v11, %v5122_v56  ;;  %v1355_v18 = vpop.f32.mrb[7].mxu1  ;;  %5765 = vmatprep.subr.bf16.mxu0 %v6409_v6 }
 0x4c5   : > { %v1356_v24 = vadd.f32 %v5122_v56, %v1355_v18 }
 0x4c6   : > { %v1402_v59 = vpack.c.bf16 %v1364_v14, %v1361_v12 }
 0x4c7   : > { %v1401_v16 = vpack.c.bf16 %v1356_v24, %v1353_v21  ;;  %5766 = vmatpush3.bf16.msra.mxu0 %v6409_v6 }
 0x4c8   : > { %5767 = vmatprep.subr.bf16.mxu0 %v6410_v20 }
 0x4c9   : > { %v5705_v63 = vpop.f32.mrb[8].mxu1  ;;  %5731 = vmatprep.mubr.bf16.mxu0 %v1401_v16 }
 0x4ca   : > { %v1368_v27 = vpop.f32.mrb[9].mxu1  ;;  %5732 = vmatmul.mubr.bf16.gmra.mrb[20].mxu0 %v1402_v59  ;;  %v1377_v32 = vadd.f32 %v5705_v63, %v5122_v56 }
 0x4cb   : > { %v5706_v31 = vpop.f32.mrb[10].mxu1  ;;  %5768 = vmatpush3.bf16.msra.mxu0 %v6410_v20  ;;  %v1369_v37 = vadd.f32 %v5122_v56, %v1368_v27 }
 0x4cc   : > { %v1380_v3 = vadd.f32 %v5706_v31, %v5122_v56  ;;  %v1371_v30 = vpop.f32.mrb[11].mxu1  ;;  %5769 = vmatprep.subr.bf16.mxu0 %v6411_v25 }
 0x4cd   : > { %v1372_v35 = vadd.f32 %v5122_v56, %v1371_v30 }
 0x4ce   : > { %v1404_v9 = vpack.c.bf16 %v1380_v3, %v1377_v32 }
 0x4cf   : > { %v1403_v41 = vpack.c.bf16 %v1372_v35, %v1369_v37  ;;  %5770 = vmatpush3.bf16.msra.mxu0 %v6411_v25 }
 0x4d0   : > { %5771 = vmatprep.subr.bf16.mxu0 %v6412_v5 }
 0x4d1   : > { %v5709_v47 = vpop.f32.mrb[12].mxu1  ;;  %5735 = vmatprep.mubr.bf16.mxu0 %v1403_v41 }
 0x4d2   : > { %v1384_v52 = vpop.f32.mrb[13].mxu1  ;;  %5736 = vmatmul.mubr.bf16.gmra.mrb[24].mxu0 %v1404_v9  ;;  %v1393_v8 = vadd.f32 %v5709_v47, %v5122_v56 }
 0x4d3   : > { %v5710_v53 = vpop.f32.mrb[14].mxu1  ;;  %5772 = vmatpush3.bf16.msra.mxu0 %v6412_v5  ;;  %v1385_v58 = vadd.f32 %v5122_v56, %v1384_v52 }
 0x4d4   : > { %v1396_v55 = vadd.f32 %v5710_v53, %v5122_v56  ;;  %v1387_v57 = vpop.f32.mrb[15].mxu1  ;;  %5773 = vmatprep.subr.bf16.mxu0 %v6413_v13 }
 0x4d5   : > { %v1388_v60 = vadd.f32 %v5122_v56, %v1387_v57 }
 0x4d6   : > { %v1406_v61 = vpack.c.bf16 %v1396_v55, %v1393_v8 }
 0x4d7   : > { %v1405_v62 = vpack.c.bf16 %v1388_v60, %v1385_v58  ;;  %5774 = vmatpush3.bf16.msra.mxu0 %v6413_v13 }
 0x4d8   : > { %5775 = vmatprep.subr.bf16.mxu0 %v6414_v23 }
 0x4d9   : > { %5739 = vmatprep.mubr.bf16.mxu0 %v1405_v62 }
 0x4da   : > { %5740 = vmatmul.mubr.bf16.gmra.mrb[28].mxu0 %v1406_v61 }
 0x4db   : > { %5776 = vmatpush3.bf16.msra.mxu0 %v6414_v23  ;;  %5779 = vmatprep.mubr.bf16.mxu0 %v7615_v40 }
 0x4dc   : > { %5777 = vmatprep.subr.bf16.mxu0 %v6415_v0 }
 0x4df   : > { %5778 = vmatpush3.bf16.msra.mxu0 %v6415_v0 }
 0x4e2   : > { %5780 = vmatmul.mubr.bf16.vlgmr.msra.gmra.mrb[32].mxu0 %v7630_v43 }
 0x4e3   : > { %5783 = vmatprep.mubr.bf16.mxu0 %v7645_v10 }
 0x4ea   : > { %5784 = vmatmul.mubr.bf16.gmra.mrb[36].mxu0 %v7660_v15 }
 0x4eb   : > { %5787 = vmatprep.mubr.bf16.mxu0 %v7675_v28 }
 0x4f2   : > { %5788 = vmatmul.mubr.bf16.gmra.mrb[40].mxu0 %v7690_v39 }
 0x4f3   : > { %5791 = vmatprep.mubr.bf16.mxu0 %v7704_v45 }
 0x4fa   : > { %5792 = vmatmul.mubr.bf16.gmra.mrb[44].mxu0 %v7716_v38 }
 0x595   : > { %v5729_v56 = vpop.f32.mrb[16].mxu0 }
 0x596   : > { %v1505_v1 = vpop.f32.mrb[17].mxu0  ;;  %v7740_v43 = vmul.f32 0.088388346, %v5729_v56 }
 0x597   : > { %v7738_v40 = vmul.f32 0.088388346, %v1505_v1  ;;  %v5730_v4 = vpop.f32.mrb[18].mxu0 }
 0x598   : > { %v1508_v6 = vpop.f32.mrb[19].mxu0  ;;  %v7746_v28 = vmul.f32 0.088388346, %v5730_v4  ;;  %v1591_v38 = vsel %vm1584_vm0, %v7740_v43, -inf }
 0x599   : > { %v7742_v10 = vmul.f32 0.088388346, %v1508_v6  ;;  %v1585_v15 = vsel %vm1584_vm0, %v7738_v40, -inf }
 0x59a   : > { %1586 = vmax.xlane.f32.xlu0 %v1585_v15  ;;  %v1594_v12 = vsel %vm1584_vm0, %v7746_v28, -inf }
 0x59b   : > { %v1588_v39 = vsel %vm1584_vm0, %v7742_v10, -inf }
 0x59c   : > { %1589 = vmax.xlane.f32.xlu1 %v1588_v39 }
 0x59d   : > { %v5733_v45 = vpop.f32.mrb[20].mxu0 }
 0x59e   : > { %1592 = vmax.xlane.f32.xlu0 %v1591_v38  ;;  %v1521_v7 = vpop.f32.mrb[21].mxu0  ;;  %v7756_v18 = vmul.f32 0.088388346, %v5733_v45 }
 0x59f   : > { %v7752_v51 = vmul.f32 0.088388346, %v1521_v7  ;;  %v5734_v11 = vpop.f32.mrb[22].mxu0  ;;  %v5166_v7 = vld [vmem:[%s7353_s16 + $0x2] ss:$0 sm:$0xff] }
 0x5a0   : > { %1595 = vmax.xlane.f32.xlu1 %v1594_v12  ;;  %v1524_v14 = vpop.f32.mrb[23].mxu0  ;;  %v7762_v24 = vmul.f32 0.088388346, %v5734_v11  ;;  %v1603_v25 = vsel %vm1584_vm0, %v7756_v18, -inf }
 0x5a1   : > { %v7758_v20 = vmul.f32 0.088388346, %v1524_v14  ;;  %v1597_v21 = vsel %vm1584_vm0, %v7752_v51, -inf }
 0x5a2   : > { %1598 = vmax.xlane.f32.xlu0 %v1597_v21  ;;  %v1606_v32 = vsel %vm1584_vm0, %v7762_v24, -inf }
 0x5a3   : > { %v1600_v59 = vsel %vm1584_vm0, %v7758_v20, -inf }
 0x5a4   : > { %1601 = vmax.xlane.f32.xlu1 %v1600_v59 }
 0x5a5   : > { %v5737_v16 = vpop.f32.mrb[24].mxu0 }
 0x5a6   : > { %1604 = vmax.xlane.f32.xlu0 %v1603_v25  ;;  %v1537_v63 = vpop.f32.mrb[25].mxu0  ;;  %v7772_v30 = vmul.f32 0.088388346, %v5737_v16 }
 0x5a7   : > { %v7768_v27 = vmul.f32 0.088388346, %v1537_v63  ;;  %v5738_v31 = vpop.f32.mrb[26].mxu0 }
 0x5a8   : > { %1607 = vmax.xlane.f32.xlu1 %v1606_v32  ;;  %v1540_v3 = vpop.f32.mrb[27].mxu0  ;;  %v7778_v35 = vmul.f32 0.088388346, %v5738_v31  ;;  %v1615_v13 = vsel %vm1584_vm0, %v7772_v30, -inf }
 0x5a9   : > { %v7774_v5 = vmul.f32 0.088388346, %v1540_v3  ;;  %v1609_v37 = vsel %vm1584_vm0, %v7768_v27, -inf }
 0x5aa   : > { %1610 = vmax.xlane.f32.xlu0 %v1609_v37  ;;  %v1618_v8 = vsel %vm1584_vm0, %v7778_v35, -inf }
 0x5ab   : > { %v1612_v9 = vsel %vm1584_vm0, %v7774_v5, -inf }
 0x5ac   : > { %1613 = vmax.xlane.f32.xlu1 %v1612_v9 }
 0x5ad   : > { %v5741_v41 = vpop.f32.mrb[28].mxu0 }
 0x5ae   : > { %1616 = vmax.xlane.f32.xlu0 %v1615_v13  ;;  %v1553_v47 = vpop.f32.mrb[29].mxu0  ;;  %v7788_v57 = vmul.f32 0.088388346, %v5741_v41 }
 0x5af   : > { %v7784_v52 = vmul.f32 0.088388346, %v1553_v47  ;;  %v5742_v53 = vpop.f32.mrb[30].mxu0 }
 0x5b0   : > { %1619 = vmax.xlane.f32.xlu1 %v1618_v8  ;;  %v1556_v55 = vpop.f32.mrb[31].mxu0  ;;  %v7794_v60 = vmul.f32 0.088388346, %v5742_v53  ;;  %v1627_v0 = vsel %vm1584_vm0, %v7788_v57, -inf  ;;  %v6416_v53 = vld [vmem:[%s7364_s9] sm:$0xff]  }
 0x5b1   : > { %v7790_v23 = vmul.f32 0.088388346, %v1556_v55  ;;  %v1621_v58 = vsel %vm1584_vm0, %v7784_v52, -inf  ;;  %5743 = vmatprep.subr.bf16.mxu1 %v6416_v53 }
 0x5b2   : > { %1622 = vmax.xlane.f32.xlu0 %v1621_v58  ;;  %v1630_v4 = vsel %vm1584_vm0, %v7794_v60, -inf  ;;  %5744 = vmatpush3.bf16.msra.mxu1 %v6416_v53 }
 0x5b3   : > { %v1624_v61 = vsel %vm1584_vm0, %v7790_v23, -inf }
 0x5b4   : > { %1625 = vmax.xlane.f32.xlu1 %v1624_v61 }
 0x5b5   : > { %v7798_v62 = vpop.f32.mrb[32].mxu0 }
 0x5b6   : > { %1628 = vmax.xlane.f32.xlu0 %v1627_v0  ;;  %v7802_v56 = vpop.f32.mrb[33].mxu0 }
 0x5b7   : > { %v7804_v1 = vpop.f32.mrb[34].mxu0 }
 0x5b8   : > { %v7808_v6 = vpop.f32.mrb[35].mxu0  ;;  %1631 = vmax.xlane.f32.xlu1 %v1630_v4 }
 0x5bd   : > { %v7810_v15 = vpop.f32.mrb[36].mxu0 }
 0x5be   : > { %v7812_v39 = vpop.f32.mrb[37].mxu0 }
 0x5bf   : > { %v7814_v45 = vpop.f32.mrb[38].mxu0 }
 0x5c0   : > { %v7816_v38 = vpop.f32.mrb[39].mxu0 }
 0x5c5   : > { %v5789_v11 = vpop.f32.mrb[40].mxu0 }
 0x5c6   : > { %v7819_v12 = vadd.f32 %v5789_v11, %v5166_v7  ;;  %v2221_v14 = vpop.f32.mrb[41].mxu0 }
 0x5c7   : > { %v7821_v21 = vadd.f32 %v5166_v7, %v2221_v14  ;;  %v5790_v59 = vpop.f32.mrb[42].mxu0 }
 0x5c8   : > { %9407 = vst [vmem:[#allocation36_spill] sm:$0xff] %v7819_v12  ;;  %v7823_v16 = vadd.f32 %v5790_v59, %v5166_v7  ;;  %v2224_v25 = vpop.f32.mrb[43].mxu0 }
 0x5c9   : > { %9408 = vst [vmem:[#allocation37_spill] sm:$0xff] %v7821_v21  ;;  %v7825_v63 = vadd.f32 %v5166_v7, %v2224_v25 }
 0x5ca   : > { %9409 = vst [vmem:[#allocation38_spill] sm:$0xff] %v7823_v16 }
 0x5cb   : > { %9410 = vst [vmem:[#allocation39_spill] sm:$0xff] %v7825_v63 }
 0x5cd   : > { %v5793_v31 = vpop.f32.mrb[44].mxu0 }
 0x5ce   : > { %v7827_v32 = vadd.f32 %v5793_v31, %v5166_v7  ;;  %v2237_v3 = vpop.f32.mrb[45].mxu0 }
 0x5cf   : > { %v7829_v37 = vadd.f32 %v5166_v7, %v2237_v3  ;;  %v5794_v9 = vpop.f32.mrb[46].mxu0 }
 0x5d0   : > { %9411 = vst [vmem:[#allocation40_spill] sm:$0xff] %v7827_v32  ;;  %v7831_v41 = vadd.f32 %v5794_v9, %v5166_v7  ;;  %v2240_v13 = vpop.f32.mrb[47].mxu0 }
 0x5d1   : > { %9412 = vst [vmem:[#allocation41_spill] sm:$0xff] %v7829_v37  ;;  %v7833_v47 = vadd.f32 %v5166_v7, %v2240_v13 }
 0x5d2   : > { %9413 = vst [vmem:[#allocation42_spill] sm:$0xff] %v7831_v41 }
 0x5d3   : > { %9414 = vst [vmem:[#allocation43_spill] sm:$0xff] %v7833_v47 }
 0x627   : > { %v1587_v8 = vpop.xlane.xlu0 %1586 }
 0x628   : > { %v1633_v55 = vsub.f32 %v7738_v40, %v1587_v8 }
 0x629   : > { %v1590_v58 = vpop.xlane.xlu1 %1589 }
 0x62a   : > { %v1649_v61 = vmul.f32 1.442695, %v1633_v55  ;;  %v1634_v0 = vsub.f32 %v7742_v10, %v1590_v58 }
 0x62b   : > { %v1593_v4 = vpop.xlane.xlu0 %1592 }
 0x62c   : > { %6482 = vpow2.f32 %v1649_v61  ;;  %v1651_v11 = vmul.f32 1.442695, %v1634_v0  ;;  %v1635_v14 = vsub.f32 %v7740_v43, %v1593_v4 }
 0x62d   : > { %v1596_v59 = vpop.xlane.xlu1 %1595 }
 0x62e   : > { %6484 = vpow2.f32 %v1651_v11  ;;  %v1653_v25 = vmul.f32 1.442695, %v1635_v14  ;;  %v1636_v7 = vsub.f32 %v7746_v28, %v1596_v59 }
 0x62f   : > { %v1599_v31 = vpop.xlane.xlu0 %1598 }
 0x630   : > { %6486 = vpow2.f32 %v1653_v25  ;;  %v1655_v3 = vmul.f32 1.442695, %v1636_v7  ;;  %v1637_v9 = vsub.f32 %v7752_v51, %v1599_v31 }
 0x631   : > { %v1602_v40 = vpop.xlane.xlu1 %1601 }
 0x632   : > { %6488 = vpow2.f32 %v1655_v3  ;;  %v1657_v13 = vmul.f32 1.442695, %v1637_v9  ;;  %v1638_v10 = vsub.f32 %v7758_v20, %v1602_v40 }
 0x633   : > { %v1605_v53 = vpop.xlane.xlu0 %1604 }
 0x634   : > { %6490 = vpow2.f32 %v1657_v13  ;;  %v1659_v8 = vmul.f32 1.442695, %v1638_v10  ;;  %v1639_v43 = vsub.f32 %v7756_v18, %v1605_v53 }
 0x635   : > { %v1608_v55 = vpop.xlane.xlu1 %1607 }
 0x636   : > { %v7843_v58 = vpop.eup %6482  ;;  %6492 = vpow2.f32 %v1659_v8  ;;  %v1661_v28 = vmul.f32 1.442695, %v1639_v43  ;;  %v1640_v61 = vsub.f32 %v7762_v24, %v1608_v55 }
 0x637   : > { %v1611_v0 = vpop.xlane.xlu0 %1610  ;;  %v1681_v51 = vsel %vm1584_vm0, %v7843_v58, 0.0 }
 0x638   : > { %v7848_v4 = vpop.eup %6484  ;;  %6494 = vpow2.f32 %v1661_v28  ;;  %v1663_v20 = vmul.f32 1.442695, %v1640_v61  ;;  %v1641_v11 = vsub.f32 %v7768_v27, %v1611_v0  ;;  %1682 = vadd.xlane.f32.xlu0 %v1681_v51 }
 0x639   : > { %v1614_v14 = vpop.xlane.xlu1 %1613  ;;  %v1684_v18 = vsel %vm1584_vm0, %v7848_v4, 0.0 }
 0x63a   : > { %v7853_v59 = vpop.eup %6486  ;;  %6496 = vpow2.f32 %v1663_v20  ;;  %v1665_v25 = vmul.f32 1.442695, %v1641_v11  ;;  %v1642_v24 = vsub.f32 %v7774_v5, %v1614_v14  ;;  %1685 = vadd.xlane.f32.xlu1 %v1684_v18 }
 0x63b   : > { %v1617_v7 = vpop.xlane.xlu0 %1616  ;;  %v1687_v31 = vsel %vm1584_vm0, %v7853_v59, 0.0 }
 0x63c   : > { %v7858_v3 = vpop.eup %6488  ;;  %6498 = vpow2.f32 %v1665_v25  ;;  %v1667_v27 = vmul.f32 1.442695, %v1642_v24  ;;  %v1643_v9 = vsub.f32 %v7772_v30, %v1617_v7  ;;  %1688 = vadd.xlane.f32.xlu0 %v1687_v31 }
 0x63d   : > { %v1620_v40 = vpop.xlane.xlu1 %1619  ;;  %v1690_v13 = vsel %vm1584_vm0, %v7858_v3, 0.0 }
 0x63e   : > { %v7863_v10 = vpop.eup %6490  ;;  %6500 = vpow2.f32 %v1667_v27  ;;  %v1669_v5 = vmul.f32 1.442695, %v1643_v9  ;;  %v1644_v53 = vsub.f32 %v7778_v35, %v1620_v40  ;;  %1691 = vadd.xlane.f32.xlu1 %v1690_v13 }
 0x63f   : > { %v1623_v8 = vpop.xlane.xlu0 %1622  ;;  %v1693_v43 = vsel %vm1584_vm0, %v7863_v10, 0.0 }
 0x640   : > { %v7868_v55 = vpop.eup %6492  ;;  %6502 = vpow2.f32 %v1669_v5  ;;  %v1671_v30 = vmul.f32 1.442695, %v1644_v53  ;;  %v1645_v28 = vsub.f32 %v7784_v52, %v1623_v8  ;;  %1694 = vadd.xlane.f32.xlu0 %v1693_v43 }
 0x641   : > { %v1626_v61 = vpop.xlane.xlu1 %1625  ;;  %v1696_v0 = vsel %vm1584_vm0, %v7868_v55, 0.0 }
 0x642   : > { %v7873_v51 = vpop.eup %6494  ;;  %6504 = vpow2.f32 %v1671_v30  ;;  %v1673_v35 = vmul.f32 1.442695, %v1645_v28  ;;  %v1646_v20 = vsub.f32 %v7790_v23, %v1626_v61  ;;  %1697 = vadd.xlane.f32.xlu1 %v1696_v0 }
 0x643   : > { %v1629_v11 = vpop.xlane.xlu0 %1628  ;;  %v1699_v14 = vsel %vm1584_vm0, %v7873_v51, 0.0 }
 0x644   : > { %v7878_v18 = vpop.eup %6496  ;;  %6506 = vpow2.f32 %v1673_v35  ;;  %v1675_v52 = vmul.f32 1.442695, %v1646_v20  ;;  %v1647_v25 = vsub.f32 %v7788_v57, %v1629_v11  ;;  %1700 = vadd.xlane.f32.xlu0 %v1699_v14  ;;  %v6417_v14 = vld [vmem:[%s7364_s9 + $0x8] sm:$0xff]   ;;  %s9416_s9 = smov %s9415_s30 }
 0x645   : > { %v1632_v24 = vpop.xlane.xlu1 %1631  ;;  %v1702_v7 = vsel %vm1584_vm0, %v7878_v18, 0.0  ;;  %5745 = vmatprep.subr.bf16.mxu1 %v6417_v14 }
 0x646   : > { %v7883_v31 = vpop.eup %6498  ;;  %6508 = vpow2.f32 %v1675_v52  ;;  %v1677_v23 = vmul.f32 1.442695, %v1647_v25  ;;  %v1648_v27 = vsub.f32 %v7794_v60, %v1632_v24  ;;  %1703 = vadd.xlane.f32.xlu1 %v1702_v7  ;;  %v1906_v52 = vmul.f32 %v7606_v33, %v7606_v33  ;;  %5746 = vmatpush3.bf16.msra.mxu1 %v6417_v14 }
 0x647   : > { %v1705_v9 = vsel %vm1584_vm0, %v7883_v31, 0.0  ;;  %v1907_v25 = vmul.f32 %v7609_v29, %v7609_v29  ;;  %v1908_v24 = vmul.f32 %v7621_v49, %v7621_v49  ;;  %v1909_v7 = vmul.f32 %v7624_v50, %v7624_v50 }
 0x648   : > { %v7888_v40 = vpop.eup %6500  ;;  %6510 = vpow2.f32 %v1677_v23  ;;  %v1679_v13 = vmul.f32 1.442695, %v1648_v27  ;;  %1706 = vadd.xlane.f32.xlu0 %v1705_v9  ;;  %v1910_v23 = vmul.f32 %v7636_v46, %v7636_v46  ;;  %v1911_v27 = vmul.f32 %v7639_v2, %v7639_v2 }
 0x649   : > { %v1708_v57 = vsel %vm1584_vm0, %v7888_v40, 0.0  ;;  %v1912_v9 = vmul.f32 %v7651_v19, %v7651_v19  ;;  %v1920_v14 = vmul.f32 %v7709_v22, %v7709_v22 }
 0x64a   : > { %v7892_v5 = vpop.eup %6502  ;;  %6512 = vpow2.f32 %v1679_v13  ;;  %1709 = vadd.xlane.f32.xlu1 %v1708_v57  ;;  %v1913_v13 = vmul.f32 %v7654_v54, %v7654_v54  ;;  %v1914_v57 = vmul.f32 %v7666_v17, %v7666_v17 }
 0x64b   : > { %v1711_v53 = vsel %vm1584_vm0, %v7892_v5, 0.0 }
 0x64c   : > { %v7896_v60 = vpop.eup %6504  ;;  %1712 = vadd.xlane.f32.xlu0 %v1711_v53  ;;  %v1915_v53 = vmul.f32 %v7669_v26, %v7669_v26 }
 0x64d   : > { %v1714_v8 = vsel %vm1584_vm0, %v7896_v60, 0.0 }
 0x64e   : > { %v7900_v43 = vpop.eup %6506  ;;  %1715 = vadd.xlane.f32.xlu1 %v1714_v8  ;;  %v1916_v8 = vmul.f32 %v7681_v34, %v7681_v34 }
 0x64f   : > { %v1717_v30 = vsel %vm1584_vm0, %v7900_v43, 0.0 }
 0x650   : > { %v7904_v28 = vpop.eup %6508  ;;  %1718 = vadd.xlane.f32.xlu0 %v1717_v30  ;;  %v1917_v30 = vmul.f32 %v7684_v36, %v7684_v36 }
 0x651   : > { %v1720_v61 = vsel %vm1584_vm0, %v7904_v28, 0.0 }
 0x652   : > { %v7908_v0 = vpop.eup %6510  ;;  %1721 = vadd.xlane.f32.xlu1 %v1720_v61  ;;  %v1918_v61 = vmul.f32 %v7696_v42, %v7696_v42 }
 0x653   : > { %v1723_v35 = vsel %vm1584_vm0, %v7908_v0, 0.0 }
 0x654   : > { %v7912_v20 = vpop.eup %6512  ;;  %1724 = vadd.xlane.f32.xlu0 %v1723_v35  ;;  %v1919_v35 = vmul.f32 %v7699_v44, %v7699_v44 }
 0x655   : > { %v1726_v11 = vsel %vm1584_vm0, %v7912_v20, 0.0 }
 0x656   : > { %1727 = vadd.xlane.f32.xlu1 %v1726_v11  ;;  %v7946_v11 = vld [vmem:[%s7332_s15 + $0xc0] sm:$0xff]  }
 0x657   : > { %5827 = vmatprep.subr.bf16.mxu0 %v7946_v11  ;;  %5795 = vmatprep.subr.bf16.mxu1 %v7946_v11 }
 0x658   : > { %1922 = vadd.xlane.f32.xlu0 %v1906_v52  ;;  %5828 = vmatpush3.bf16.msra.mxu0 %v7946_v11  ;;  %v1921_v52 = vmul.f32 %v7712_v48, %v7712_v48 }
 0x65a   : > { %1924 = vadd.xlane.f32.xlu1 %v1907_v25  ;;  %v7956_v25 = vld [vmem:[%s7332_s15 + $0xc8] sm:$0xff]  }
 0x65b   : > { %5829 = vmatprep.subr.bf16.mxu0 %v7956_v25 }
 0x65c   : > { %1926 = vadd.xlane.f32.xlu0 %v1908_v24  ;;  %5830 = vmatpush3.bf16.msra.mxu0 %v7956_v25  ;;  %v7961_v24 = vld [vmem:[%s7332_s15 + $0xd0] sm:$0xff]  }
 0x65d   : > { %5831 = vmatprep.subr.bf16.mxu0 %v7961_v24 }
 0x65e   : > { %1928 = vadd.xlane.f32.xlu1 %v1909_v7  ;;  %v7966_v7 = vld [vmem:[%s7332_s15 + $0xd8] sm:$0xff]  }
 0x660   : > { %1930 = vadd.xlane.f32.xlu0 %v1910_v23  ;;  %5832 = vmatpush3.bf16.msra.mxu0 %v7961_v24  ;;  %v7971_v23 = vld [vmem:[%s7332_s15 + $0xe0] sm:$0xff]  }
 0x661   : > { %5833 = vmatprep.subr.bf16.mxu0 %v7966_v7 }
 0x662   : > { %1932 = vadd.xlane.f32.xlu1 %v1911_v27  ;;  %v7976_v27 = vld [vmem:[%s7332_s15 + $0xe8] sm:$0xff]  }
 0x664   : > { %1934 = vadd.xlane.f32.xlu0 %v1912_v9  ;;  %5834 = vmatpush3.bf16.msra.mxu0 %v7966_v7  ;;  %v7981_v9 = vld [vmem:[%s7332_s15 + $0xf0] sm:$0xff]  }
 0x665   : > { %5835 = vmatprep.subr.bf16.mxu0 %v7971_v23 }
 0x666   : > { %1936 = vadd.xlane.f32.xlu1 %v1913_v13  ;;  %v7986_v13 = vld [vmem:[%s7332_s15 + $0xf8] sm:$0xff]  }
 0x668   : > { %1938 = vadd.xlane.f32.xlu0 %v1914_v57  ;;  %5836 = vmatpush3.bf16.msra.mxu0 %v7971_v23  ;;  %v7991_v57 = vld [vmem:[%s7332_s15 + $0x100] sm:$0xff]  }
 0x669   : > { %5837 = vmatprep.subr.bf16.mxu0 %v7976_v27 }
 0x66a   : > { %1940 = vadd.xlane.f32.xlu1 %v1915_v53 }
 0x66c   : > { %1942 = vadd.xlane.f32.xlu0 %v1916_v8  ;;  %5838 = vmatpush3.bf16.msra.mxu0 %v7976_v27 }
 0x66d   : > { %5839 = vmatprep.subr.bf16.mxu0 %v7981_v9 }
 0x66e   : > { %1944 = vadd.xlane.f32.xlu1 %v1917_v30 }
 0x670   : > { %1946 = vadd.xlane.f32.xlu0 %v1918_v61  ;;  %5840 = vmatpush3.bf16.msra.mxu0 %v7981_v9 }
 0x671   : > { %5841 = vmatprep.subr.bf16.mxu0 %v7986_v13 }
 0x672   : > { %1948 = vadd.xlane.f32.xlu1 %v1919_v35 }
 0x674   : > { %1950 = vadd.xlane.f32.xlu0 %v1920_v14  ;;  %5842 = vmatpush3.bf16.msra.mxu0 %v7986_v13 }
 0x675   : > { %5891 = vmatprep.subr.bf16.mxu0 %v7991_v57 }
 0x676   : > { %1952 = vadd.xlane.f32.xlu1 %v1921_v52 }
 0x6c5   : > { %v1683_v53 = vpop.xlane.xlu0 %1682 }
 0x6c6   : > { %6514 = vrcp.f32 %v1683_v53 }
 0x6c7   : > { %v1686_v8 = vpop.xlane.xlu1 %1685 }
 0x6c8   : > { %6516 = vrcp.f32 %v1686_v8 }
 0x6c9   : > { %v1689_v30 = vpop.xlane.xlu0 %1688 }
 0x6ca   : > { %6518 = vrcp.f32 %v1689_v30 }
 0x6cb   : > { %v1692_v61 = vpop.xlane.xlu1 %1691 }
 0x6cc   : > { %6520 = vrcp.f32 %v1692_v61 }
 0x6cd   : > { %v1695_v35 = vpop.xlane.xlu0 %1694 }
 0x6ce   : > { %6522 = vrcp.f32 %v1695_v35 }
 0x6cf   : > { %v1698_v14 = vpop.xlane.xlu1 %1697 }
 0x6d0   : > { %v6515_v52 = vpop.eup %6514  ;;  %6524 = vrcp.f32 %v1698_v14 }
 0x6d1   : > { %v1701_v47 = vpop.xlane.xlu0 %1700  ;;  %v1745_v32 = vmul.f32 %v6515_v52, %v7843_v58 }
 0x6d2   : > { %v6517_v41 = vpop.eup %6516  ;;  %6526 = vrcp.f32 %v1701_v47 }
 0x6d3   : > { %v1704_v37 = vpop.xlane.xlu1 %1703  ;;  %v1746_v63 = vmul.f32 %v6517_v41, %v7848_v4 }
 0x6d4   : > { %v6519_v53 = vpop.eup %6518  ;;  %6528 = vrcp.f32 %v1704_v37 }
 0x6d5   : > { %v1707_v8 = vpop.xlane.xlu0 %1706  ;;  %v1761_v16 = vpack.c.bf16 %v1746_v63, %v1745_v32  ;;  %v1747_v61 = vmul.f32 %v6519_v53, %v7853_v59 }
 0x6d6   : > { %v6521_v30 = vpop.eup %6520  ;;  %6530 = vrcp.f32 %v1707_v8 }
 0x6d7   : > { %v1748_v35 = vmul.f32 %v6521_v30, %v7858_v3  ;;  %v1710_v21 = vpop.xlane.xlu1 %1709  ;;  %5747 = vmatprep.mubr.msk.bf16.mxu1 %vm1584_vm0, %v1761_v16 }
 0x6d8   : > { %v6523_v14 = vpop.eup %6522  ;;  %6532 = vrcp.f32 %v1710_v21 }
 0x6d9   : > { %v1762_v47 = vpack.c.bf16 %v1748_v35, %v1747_v61  ;;  %v1713_v12 = vpop.xlane.xlu0 %1712  ;;  %v1749_v63 = vmul.f32 %v6523_v14, %v7863_v10 }
 0x6da   : > { %v6525_v58 = vpop.eup %6524  ;;  %6534 = vrcp.f32 %v1713_v12 }
 0x6db   : > { %v1716_v41 = vpop.xlane.xlu1 %1715  ;;  %5748 = vmatmul.mubr.msk.bf16.vlgmr.msra.gmra.mrb[16].mxu1 %vm1584_vm0, %v1762_v47  ;;  %v1750_v32 = vmul.f32 %v6525_v58, %v7868_v55 }
 0x6dc   : > { %v6527_v37 = vpop.eup %6526  ;;  %6536 = vrcp.f32 %v1716_v41  ;;  %5796 = vmatpush3.bf16.msra.mxu1 %v7946_v11 }
 0x6dd   : > { %v1719_v4 = vpop.xlane.xlu0 %1718  ;;  %v1763_v59 = vpack.c.bf16 %v1750_v32, %v1749_v63  ;;  %5797 = vmatprep.subr.bf16.mxu1 %v7956_v25  ;;  %v1751_v12 = vmul.f32 %v6527_v37, %v7873_v51 }
 0x6de   : > { %v6529_v21 = vpop.eup %6528  ;;  %6538 = vrcp.f32 %v1719_v4 }
 0x6df   : > { %v1722_v16 = vpop.xlane.xlu1 %1721  ;;  %5751 = vmatprep.mubr.msk.bf16.mxu1 %vm1584_vm0, %v1763_v59  ;;  %v1752_v3 = vmul.f32 %v6529_v21, %v7878_v18 }
 0x6e0   : > { %v6531_v10 = vpop.eup %6530  ;;  %6540 = vrcp.f32 %v1722_v16  ;;  %5798 = vmatpush3.bf16.msra.mxu1 %v7956_v25 }
 0x6e1   : > { %v1725_v55 = vpop.xlane.xlu0 %1724  ;;  %v1764_v52 = vpack.c.bf16 %v1752_v3, %v1751_v12  ;;  %5799 = vmatprep.subr.bf16.mxu1 %v7961_v24  ;;  %v1753_v8 = vmul.f32 %v6531_v10, %v7883_v31 }
 0x6e2   : > { %v6533_v11 = vpop.eup %6532  ;;  %6542 = vrcp.f32 %v1725_v55 }
 0x6e3   : > { %v1728_v53 = vpop.xlane.xlu1 %1727  ;;  %5752 = vmatmul.mubr.msk.bf16.gmra.mrb[20].mxu1 %vm1584_vm0, %v1764_v52  ;;  %v1754_v30 = vmul.f32 %v6533_v11, %v7888_v40 }
 0x6e4   : > { %v6535_v51 = vpop.eup %6534  ;;  %6544 = vrcp.f32 %v1728_v53  ;;  %5800 = vmatpush3.bf16.msra.mxu1 %v7961_v24 }
 0x6e5   : > { %v1923_v18 = vpop.xlane.xlu0 %1922  ;;  %v1765_v61 = vpack.c.bf16 %v1754_v30, %v1753_v8  ;;  %5801 = vmatprep.subr.bf16.mxu1 %v7966_v7  ;;  %v1755_v47 = vmul.f32 %v6535_v51, %v7892_v5 }
 0x6e6   : > { %v6537_v25 = vpop.eup %6536  ;;  %v1954_v35 = vmul.f32 0.088388346, %v1923_v18 }
 0x6e7   : > { %v1925_v14 = vpop.xlane.xlu1 %1924  ;;  %5755 = vmatprep.mubr.msk.bf16.mxu1 %vm1584_vm0, %v1765_v61  ;;  %v1756_v58 = vmul.f32 %v6537_v25, %v7896_v60 }
 0x6e8   : > { %v6539_v31 = vpop.eup %6538  ;;  %v1970_v41 = vsub.f32 0.0, %v1954_v35  ;;  %v1955_v40 = vmul.f32 0.088388346, %v1925_v14  ;;  %5802 = vmatpush3.bf16.msra.mxu1 %v7966_v7 }
 0x6e9   : > { %v1927_v63 = vpop.xlane.xlu0 %1926  ;;  %v1766_v24 = vpack.c.bf16 %v1756_v58, %v1755_v47  ;;  %5803 = vmatprep.subr.bf16.mxu1 %v7971_v23  ;;  %v1757_v5 = vmul.f32 %v6539_v31, %v7900_v43 }
 0x6ea   : > { %v6541_v32 = vpop.eup %6540  ;;  %v1986_v37 = vmul.f32 1.442695, %v1970_v41  ;;  %v1971_v4 = vsub.f32 0.0, %v1955_v40  ;;  %v1956_v59 = vmul.f32 0.088388346, %v1927_v63 }
 0x6eb   : > { %v1929_v21 = vpop.xlane.xlu1 %1928  ;;  %5756 = vmatmul.mubr.msk.bf16.gmra.mrb[24].mxu1 %vm1584_vm0, %v1766_v24  ;;  %v1758_v60 = vmul.f32 %v6541_v32, %v7904_v28 }
 0x6ec   : > { %v6543_v16 = vpop.eup %6542  ;;  %6546 = vpow2.f32 %v1986_v37  ;;  %v1988_v12 = vmul.f32 1.442695, %v1971_v4  ;;  %v1972_v3 = vsub.f32 0.0, %v1956_v59  ;;  %v1957_v7 = vmul.f32 0.088388346, %v1929_v21  ;;  %5804 = vmatpush3.bf16.msra.mxu1 %v7971_v23 }
 0x6ed   : > { %v1931_v10 = vpop.xlane.xlu0 %1930  ;;  %v1767_v55 = vpack.c.bf16 %v1758_v60, %v1757_v5  ;;  %5805 = vmatprep.subr.bf16.mxu1 %v7976_v27  ;;  %v1759_v43 = vmul.f32 %v6543_v16, %v7908_v0 }
 0x6ee   : > { %v6545_v52 = vpop.eup %6544  ;;  %6548 = vpow2.f32 %v1988_v12  ;;  %v1990_v11 = vmul.f32 1.442695, %v1972_v3  ;;  %v1973_v53 = vsub.f32 0.0, %v1957_v7  ;;  %v1958_v8 = vmul.f32 0.088388346, %v1931_v10 }
 0x6ef   : > { %v1933_v30 = vpop.xlane.xlu1 %1932  ;;  %5759 = vmatprep.mubr.msk.bf16.mxu1 %vm1584_vm0, %v1767_v55  ;;  %v1760_v28 = vmul.f32 %v6545_v52, %v7912_v20 }
 0x6f0   : > { %6550 = vpow2.f32 %v1990_v11  ;;  %v1992_v51 = vmul.f32 1.442695, %v1973_v53  ;;  %v1974_v18 = vsub.f32 0.0, %v1958_v8  ;;  %v1959_v23 = vmul.f32 0.088388346, %v1933_v30  ;;  %5806 = vmatpush3.bf16.msra.mxu1 %v7976_v27 }
 0x6f1   : > { %v1935_v61 = vpop.xlane.xlu0 %1934  ;;  %v1768_v25 = vpack.c.bf16 %v1760_v28, %v1759_v43  ;;  %5807 = vmatprep.subr.bf16.mxu1 %v7981_v9 }
 0x6f2   : > { %6552 = vpow2.f32 %v1992_v51  ;;  %v1994_v35 = vmul.f32 1.442695, %v1974_v18  ;;  %v1975_v14 = vsub.f32 0.0, %v1959_v23  ;;  %v1960_v47 = vmul.f32 0.088388346, %v1935_v61 }
 0x6f3   : > { %v1937_v58 = vpop.xlane.xlu1 %1936  ;;  %5760 = vmatmul.mubr.msk.bf16.gmra.mrb[28].mxu1 %vm1584_vm0, %v1768_v25 }
 0x6f4   : > { %6554 = vpow2.f32 %v1994_v35  ;;  %v1996_v0 = vmul.f32 1.442695, %v1975_v14  ;;  %v1976_v20 = vsub.f32 0.0, %v1960_v47  ;;  %v1961_v31 = vmul.f32 0.088388346, %v1937_v58  ;;  %5808 = vmatpush3.bf16.msra.mxu1 %v7981_v9 }
 0x6f5   : > { %v1939_v41 = vpop.xlane.xlu0 %1938  ;;  %5809 = vmatprep.subr.bf16.mxu1 %v7986_v13 }
 0x6f6   : > { %v6547_v27 = vpop.eup %6546  ;;  %6556 = vpow2.f32 %v1996_v0  ;;  %v1998_v40 = vmul.f32 1.442695, %v1976_v20  ;;  %v1977_v63 = vsub.f32 0.0, %v1961_v31  ;;  %v1962_v24 = vmul.f32 0.088388346, %v1939_v41 }
 0x6f7   : > { %v2018_v32 = vmul.f32 15.0, %v6547_v27  ;;  %v1941_v37 = vpop.xlane.xlu1 %1940 }
 0x6f8   : > { %v6549_v4 = vpop.eup %6548  ;;  %6558 = vpow2.f32 %v1998_v40  ;;  %v2000_v59 = vmul.f32 1.442695, %v1977_v63  ;;  %v1978_v21 = vsub.f32 0.0, %v1962_v24  ;;  %v1963_v5 = vmul.f32 0.088388346, %v1941_v37  ;;  %5810 = vmatpush3.bf16.msra.mxu1 %v7986_v13 }
 0x6f9   : > { %v2034_v60 = vadd.f32 1.0, %v2018_v32  ;;  %v2019_v16 = vmul.f32 15.0, %v6549_v4  ;;  %v1943_v9 = vpop.xlane.xlu0 %1942  ;;  %5859 = vmatprep.subr.bf16.mxu1 %v7991_v57 }
 0x6fa   : > { %v6551_v12 = vpop.eup %6550  ;;  %6560 = vpow2.f32 %v2000_v59  ;;  %v2002_v3 = vmul.f32 1.442695, %v1978_v21  ;;  %v1979_v7 = vsub.f32 0.0, %v1963_v5  ;;  %v1964_v10 = vmul.f32 0.088388346, %v1943_v9 }
 0x6fb   : > { %6562 = vrcp.f32 %v2034_v60  ;;  %v2035_v55 = vadd.f32 1.0, %v2019_v16  ;;  %v2020_v52 = vmul.f32 15.0, %v6551_v12  ;;  %v1945_v11 = vpop.xlane.xlu1 %1944 }
 0x6fc   : > { %v6553_v53 = vpop.eup %6552  ;;  %6564 = vpow2.f32 %v2002_v3  ;;  %v2004_v8 = vmul.f32 1.442695, %v1979_v7  ;;  %v1980_v30 = vsub.f32 0.0, %v1964_v10  ;;  %v1965_v43 = vmul.f32 0.088388346, %v1945_v11 }
 0x6fd   : > { %6566 = vrcp.f32 %v2035_v55  ;;  %v2036_v13 = vadd.f32 1.0, %v2020_v52  ;;  %v2021_v28 = vmul.f32 15.0, %v6553_v53  ;;  %v1947_v51 = vpop.xlane.xlu0 %1946 }
 0x6fe   : > { %v6555_v18 = vpop.eup %6554  ;;  %6568 = vpow2.f32 %v2004_v8  ;;  %v2006_v23 = vmul.f32 1.442695, %v1980_v30  ;;  %v1981_v61 = vsub.f32 0.0, %v1965_v43  ;;  %v1966_v25 = vmul.f32 0.088388346, %v1947_v51 }
 0x6ff   : > { %6570 = vrcp.f32 %v2036_v13  ;;  %v2037_v35 = vadd.f32 1.0, %v2021_v28  ;;  %v2022_v14 = vmul.f32 15.0, %v6555_v18  ;;  %v1949_v47 = vpop.xlane.xlu1 %1948 }
 0x700   : > { %v6557_v58 = vpop.eup %6556  ;;  %6572 = vpow2.f32 %v2006_v23  ;;  %v2008_v0 = vmul.f32 1.442695, %v1981_v61  ;;  %v1982_v20 = vsub.f32 0.0, %v1966_v25  ;;  %v1967_v31 = vmul.f32 0.088388346, %v1949_v47 }
 0x701   : > { %6574 = vrcp.f32 %v2037_v35  ;;  %v2038_v41 = vadd.f32 1.0, %v2022_v14  ;;  %v2023_v27 = vmul.f32 15.0, %v6557_v58  ;;  %v1951_v40 = vpop.xlane.xlu0 %1950 }
 0x702   : > { %v6559_v63 = vpop.eup %6558  ;;  %6576 = vpow2.f32 %v2008_v0  ;;  %v2010_v24 = vmul.f32 1.442695, %v1982_v20  ;;  %v1983_v32 = vsub.f32 0.0, %v1967_v31  ;;  %v1968_v37 = vmul.f32 0.088388346, %v1951_v40 }
 0x703   : > { %6578 = vrcp.f32 %v2038_v41  ;;  %v2039_v4 = vadd.f32 1.0, %v2023_v27  ;;  %v2024_v59 = vmul.f32 15.0, %v6559_v63  ;;  %v1953_v21 = vpop.xlane.xlu1 %1952 }
 0x704   : > { %v6561_v5 = vpop.eup %6560  ;;  %6580 = vpow2.f32 %v2010_v24  ;;  %v2012_v60 = vmul.f32 1.442695, %v1983_v32  ;;  %v1984_v16 = vsub.f32 0.0, %v1968_v37  ;;  %v1969_v9 = vmul.f32 0.088388346, %v1953_v21  ;;  %v8044_v24 = vld [vmem:[%s7332_s15 + $0x108] sm:$0xff]  }
 0x705   : > { %v6563_v12 = vpop.eup %6562  ;;  %6582 = vrcp.f32 %v2039_v4  ;;  %v2040_v3 = vadd.f32 1.0, %v2024_v59  ;;  %v2025_v7 = vmul.f32 15.0, %v6561_v5 }
 0x706   : > { %v6565_v10 = vpop.eup %6564  ;;  %6584 = vpow2.f32 %v2012_v60  ;;  %v2014_v55 = vmul.f32 1.442695, %v1984_v16  ;;  %v1985_v52 = vsub.f32 0.0, %v1969_v9  ;;  %v2066_v13 = vmul.f32 %v6563_v12, %v7606_v33 }
 0x707   : > { %v6567_v11 = vpop.eup %6566  ;;  %6586 = vrcp.f32 %v2040_v3  ;;  %v2041_v53 = vadd.f32 1.0, %v2025_v7  ;;  %v2026_v8 = vmul.f32 15.0, %v6565_v10  ;;  %v8052_v7 = vld [vmem:[%s7332_s15 + $0x110] sm:$0xff]  }
 0x708   : > { %v6569_v30 = vpop.eup %6568  ;;  %6588 = vpow2.f32 %v2014_v55  ;;  %v2016_v43 = vmul.f32 1.442695, %v1985_v52  ;;  %v2067_v28 = vmul.f32 %v6567_v11, %v7609_v29 }
 0x709   : > { %v6571_v51 = vpop.eup %6570  ;;  %6590 = vrcp.f32 %v2041_v53  ;;  %v2042_v18 = vadd.f32 1.0, %v2026_v8  ;;  %v2027_v23 = vmul.f32 15.0, %v6569_v30 }
 0x70a   : > { %v6573_v61 = vpop.eup %6572  ;;  %6592 = vpow2.f32 %v2016_v43  ;;  %v8036_v25 = vpack.c.bf16 %v2067_v28, %v2066_v13  ;;  %v2068_v0 = vmul.f32 %v6571_v51, %v7621_v49  ;;  %v8059_v51 = vld [vmem:[%s7332_s15 + $0x118] sm:$0xff]  }
 0x70b   : > { %v6575_v35 = vpop.eup %6574  ;;  %6594 = vrcp.f32 %v2042_v18  ;;  %v2043_v14 = vadd.f32 1.0, %v2027_v23  ;;  %v2028_v47 = vmul.f32 15.0, %v6573_v61 }
 0x70c   : > { %v6577_v58 = vpop.eup %6576  ;;  %5843 = vmatprep.mubr.bf16.mxu0 %v8036_v25  ;;  %v2069_v20 = vmul.f32 %v6575_v35, %v7624_v50 }
 0x70d   : > { %v6579_v31 = vpop.eup %6578  ;;  %6596 = vrcp.f32 %v2043_v14  ;;  %v2044_v41 = vadd.f32 1.0, %v2028_v47  ;;  %v2029_v27 = vmul.f32 15.0, %v6577_v58  ;;  %v8066_v58 = vld [vmem:[%s7332_s15 + $0x120] sm:$0xff]  }
 0x70e   : > { %v6581_v40 = vpop.eup %6580  ;;  %v8041_v63 = vpack.c.bf16 %v2069_v20, %v2068_v0  ;;  %v2070_v21 = vmul.f32 %v6579_v31, %v7636_v46 }
 0x70f   : > { %v6583_v32 = vpop.eup %6582  ;;  %6598 = vrcp.f32 %v2044_v41  ;;  %v2045_v37 = vadd.f32 1.0, %v2029_v27  ;;  %v2030_v4 = vmul.f32 15.0, %v6581_v40  ;;  %v8073_v40 = vld [vmem:[%s7332_s15 + $0x128] sm:$0xff]  }
 0x710   : > { %v6585_v59 = vpop.eup %6584  ;;  %5844 = vmatmul.mubr.bf16.vlgmr.msra.gmra.mrb[48].mxu0 %v8041_v63  ;;  %v2071_v5 = vmul.f32 %v6583_v32, %v7639_v2 }
 0x711   : > { %v6587_v60 = vpop.eup %6586  ;;  %6600 = vrcp.f32 %v2045_v37  ;;  %v2046_v16 = vadd.f32 1.0, %v2030_v4  ;;  %v2031_v9 = vmul.f32 15.0, %v6585_v59  ;;  %5892 = vmatpush3.bf16.msra.mxu0 %v7991_v57 }
 0x712   : > { %v6589_v12 = vpop.eup %6588  ;;  %v2432_v3 = vpack.c.bf16 %v2071_v5, %v2070_v21  ;;  %5893 = vmatprep.subr.bf16.mxu0 %v8044_v24  ;;  %v2072_v53 = vmul.f32 %v6587_v60, %v7651_v19  ;;  %v8080_v5 = vld [vmem:[%s7332_s15 + $0x130] sm:$0xff]  }
 0x713   : > { %v6591_v10 = vpop.eup %6590  ;;  %6602 = vrcp.f32 %v2046_v16  ;;  %v2047_v55 = vadd.f32 1.0, %v2031_v9  ;;  %v2032_v52 = vmul.f32 15.0, %v6589_v12 }
 0x714   : > { %v6593_v11 = vpop.eup %6592  ;;  %5847 = vmatprep.mubr.bf16.mxu0 %v2432_v3  ;;  %v2073_v8 = vmul.f32 %v6591_v10, %v7654_v54  ;;  %v8087_v10 = vld [vmem:[%s7332_s15 + $0x138] sm:$0xff]  }
 0x715   : > { %v6595_v30 = vpop.eup %6594  ;;  %6604 = vrcp.f32 %v2047_v55  ;;  %v2048_v43 = vadd.f32 1.0, %v2032_v52  ;;  %v2033_v13 = vmul.f32 15.0, %v6593_v11  ;;  %5894 = vmatpush3.bf16.msra.mxu0 %v8044_v24  ;;  %v2802_v55 = vld [vmem:[%s9415_s30] sm:$0xff] }
 0x716   : > { %v2433_v28 = vpack.c.bf16 %v2073_v8, %v2072_v53  ;;  %5895 = vmatprep.subr.bf16.mxu0 %v8052_v7  ;;  %v2074_v61 = vmul.f32 %v6595_v30, %v7666_v17  ;;  %v2806_v53 = vld [vmem:[%s9416_s9 + $0x20] sm:$0xff]  ;;  %v2807_v8 = vld [vmem:[%s9416_s9 + $0x28] sm:$0xff] }
 0x717   : > { %v6597_v18 = vpop.eup %6596  ;;  %6606 = vrcp.f32 %v2048_v43  ;;  %v2049_v23 = vadd.f32 1.0, %v2033_v13  ;;  %v8120_v30 = vpack.c.bf16 %v2807_v8, %v2806_v53  ;;  %v2808_v43 = vld [vmem:[%s9416_s9 + $0x30] sm:$0xff]  ;;  %v2809_v13 = vld [vmem:[%s9416_s9 + $0x38] sm:$0xff] }
 0x718   : > { %5848 = vmatmul.mubr.bf16.gmra.mrb[52].mxu0 %v2433_v28  ;;  %v2075_v35 = vmul.f32 %v6597_v18, %v7669_v26  ;;  %v8133_v18 = vpack.c.bf16 %v2809_v13, %v2808_v43 }
 0x719   : > { %v6599_v14 = vpop.eup %6598  ;;  %6608 = vrcp.f32 %v2049_v23  ;;  %5896 = vmatpush3.bf16.msra.mxu0 %v8052_v7  ;;  %v2811_v23 = vld [vmem:[%s9416_s9 + $0x48] sm:$0xff] }
 0x71a   : > { %v2434_v47 = vpack.c.bf16 %v2075_v35, %v2074_v61  ;;  %5897 = vmatprep.subr.bf16.mxu0 %v8059_v51  ;;  %v2076_v20 = vmul.f32 %v6599_v14, %v7681_v34  ;;  %v2812_v35 = vld [vmem:[%s9416_s9 + $0x50] sm:$0xff]  ;;  %v2813_v14 = vld [vmem:[%s9416_s9 + $0x58] sm:$0xff] }
 0x71b   : > { %v6601_v0 = vpop.eup %6600 }
 0x71c   : > { %5851 = vmatprep.mubr.bf16.mxu0 %v2434_v47  ;;  %v2077_v31 = vmul.f32 %v6601_v0, %v7684_v36  ;;  %v2814_v0 = vld [vmem:[%s9416_s9 + $0x60] sm:$0xff] }
 0x71d   : > { %v6603_v41 = vpop.eup %6602  ;;  %5898 = vmatpush3.bf16.msra.mxu0 %v8059_v51 }
 0x71e   : > { %v2435_v27 = vpack.c.bf16 %v2077_v31, %v2076_v20  ;;  %5899 = vmatprep.subr.bf16.mxu0 %v8066_v58  ;;  %v2078_v37 = vmul.f32 %v6603_v41, %v7696_v42  ;;  %v2815_v20 = vld [vmem:[%s9416_s9 + $0x68] sm:$0xff]  ;;  %v2816_v41 = vld [vmem:[%s9416_s9 + $0x70] sm:$0xff] }
 0x71f   : > { %v6605_v32 = vpop.eup %6604  ;;  %v8160_v31 = vpack.c.bf16 %v2815_v20, %v2814_v0 }
 0x720   : > { %5852 = vmatmul.mubr.bf16.gmra.mrb[56].mxu0 %v2435_v27  ;;  %v2079_v4 = vmul.f32 %v6605_v32, %v7699_v44 }
 0x721   : > { %v6607_v59 = vpop.eup %6606  ;;  %5900 = vmatpush3.bf16.msra.mxu0 %v8066_v58 }
 0x722   : > { %v2436_v21 = vpack.c.bf16 %v2079_v4, %v2078_v37  ;;  %5901 = vmatprep.subr.bf16.mxu0 %v8073_v40  ;;  %v2080_v16 = vmul.f32 %v6607_v59, %v7709_v22 }
 0x723   : > { %v6609_v60 = vpop.eup %6608 }
 0x724   : > { %5855 = vmatprep.mubr.bf16.mxu0 %v2436_v21  ;;  %v2081_v9 = vmul.f32 %v6609_v60, %v7712_v48 }
 0x725   : > { %5902 = vmatpush3.bf16.msra.mxu0 %v8073_v40 }
 0x726   : > { %v2437_v12 = vpack.c.bf16 %v2081_v9, %v2080_v16  ;;  %5903 = vmatprep.subr.bf16.mxu0 %v8080_v5 }
 0x728   : > { %5856 = vmatmul.mubr.bf16.gmra.mrb[60].mxu0 %v2437_v12 }
 0x729   : > { %5904 = vmatpush3.bf16.msra.mxu0 %v8080_v5  ;;  %5907 = vmatprep.mubr.bf16.mxu0 %v8036_v25  ;;  %v2803_v25 = vld [vmem:[%s9416_s9 + $0x8] sm:$0xff] }
 0x72a   : > { %5905 = vmatprep.subr.bf16.mxu0 %v8087_v10  ;;  %v8100_v52 = vpack.c.bf16 %v2803_v25, %v2802_v55 }
 0x72d   : > { %5906 = vmatpush3.bf16.msra.mxu0 %v8087_v10 }
 0x72e   : > { %6184 = vmatprep.subr.bf16.mxu0 %v8100_v52 }
 0x730   : > { %5908 = vmatmul.mubr.bf16.vlgmr.msra.gmra.mrb[64].mxu0 %v8041_v63  ;;  %v2804_v63 = vld [vmem:[%s9416_s9 + $0x10] sm:$0xff] }
 0x731   : > { %5911 = vmatprep.mubr.bf16.mxu0 %v2432_v3  ;;  %6186 = vmatpush3.bf16.msra.mxu0 %v8100_v52  ;;  %v2805_v3 = vld [vmem:[%s9416_s9 + $0x18] sm:$0xff] }
 0x732   : > { %v8110_v11 = vpack.c.bf16 %v2805_v3, %v2804_v63 }
 0x734   : > { %6188 = vmatprep.subr.bf16.mxu0 %v8110_v11 }
 0x735   : > { %6190 = vmatpush3.bf16.msra.mxu0 %v8110_v11 }
 0x736   : > { %6192 = vmatprep.subr.bf16.mxu0 %v8120_v30 }
 0x738   : > { %5912 = vmatmul.mubr.bf16.gmra.mrb[68].mxu0 %v2433_v28  ;;  %v2810_v28 = vld [vmem:[%s9416_s9 + $0x40] sm:$0xff] }
 0x739   : > { %5915 = vmatprep.mubr.bf16.mxu0 %v2434_v47  ;;  %6194 = vmatpush3.bf16.msra.mxu0 %v8120_v30  ;;  %v8138_v61 = vpack.c.bf16 %v2811_v23, %v2810_v28  ;;  %v8150_v47 = vpack.c.bf16 %v2813_v14, %v2812_v35 }
 0x73a   : > { %6196 = vmatprep.subr.bf16.mxu0 %v8133_v18 }
 0x73d   : > { %6198 = vmatpush3.bf16.msra.mxu0 %v8133_v18 }
 0x73e   : > { %6200 = vmatprep.subr.bf16.mxu0 %v8138_v61 }
 0x740   : > { %5916 = vmatmul.mubr.bf16.gmra.mrb[72].mxu0 %v2435_v27  ;;  %v2817_v27 = vld [vmem:[%s9416_s9 + $0x78] sm:$0xff] }
 0x741   : > { %5919 = vmatprep.mubr.bf16.mxu0 %v2436_v21  ;;  %6202 = vmatpush3.bf16.msra.mxu0 %v8138_v61  ;;  %v8170_v32 = vpack.c.bf16 %v2817_v27, %v2816_v41 }
 0x742   : > { %6204 = vmatprep.subr.bf16.mxu0 %v8150_v47 }
 0x745   : > { %6206 = vmatpush3.bf16.msra.mxu0 %v8150_v47 }
 0x746   : > { %6208 = vmatprep.subr.bf16.mxu0 %v8160_v31 }
 0x748   : > { %5920 = vmatmul.mubr.bf16.gmra.mrb[76].mxu0 %v2437_v12 }
 0x749   : > { %6210 = vmatpush3.bf16.msra.mxu0 %v8160_v31 }
 0x74a   : > { %6212 = vmatprep.subr.bf16.mxu0 %v8170_v32 }
 0x74d   : > { %6214 = vmatpush3.bf16.msra.mxu0 %v8170_v32 }
 0x7ae   : > { %v5749_v37 = vpop.f32.mrb[16].mxu1 }
 0x7af   : > { %v1843_v4 = vpop.f32.mrb[17].mxu1 }
 0x7b0   : > { %v5750_v59 = vpop.f32.mrb[18].mxu1 }
 0x7b1   : > { %v2253_v21 = vpack.c.bf16 %v5750_v59, %v5749_v37  ;;  %v1846_v60 = vpop.f32.mrb[19].mxu1 }
 0x7b2   : > { %v2252_v16 = vpack.c.bf16 %v1846_v60, %v1843_v4 }
 0x7b4   : > { %5811 = vmatprep.mubr.bf16.mxu1 %v2252_v16 }
 0x7b5   : > { %5812 = vmatmul.mubr.bf16.vlgmr.msra.gmra.mrb[32].mxu1 %v2253_v21 }
 0x7b6   : > { %v5753_v9 = vpop.f32.mrb[20].mxu1  ;;  %5860 = vmatpush3.bf16.msra.mxu1 %v7991_v57 }
 0x7b7   : > { %v1859_v12 = vpop.f32.mrb[21].mxu1  ;;  %5861 = vmatprep.subr.bf16.mxu1 %v8044_v24 }
 0x7b8   : > { %v5754_v55 = vpop.f32.mrb[22].mxu1 }
 0x7b9   : > { %v2255_v25 = vpack.c.bf16 %v5754_v55, %v5753_v9  ;;  %v1862_v63 = vpop.f32.mrb[23].mxu1 }
 0x7ba   : > { %v2254_v3 = vpack.c.bf16 %v1862_v63, %v1859_v12  ;;  %5862 = vmatpush3.bf16.msra.mxu1 %v8044_v24 }
 0x7bb   : > { %5863 = vmatprep.subr.bf16.mxu1 %v8052_v7 }
 0x7bc   : > { %5815 = vmatprep.mubr.bf16.mxu1 %v2254_v3 }
 0x7bd   : > { %5816 = vmatmul.mubr.bf16.gmra.mrb[36].mxu1 %v2255_v25 }
 0x7be   : > { %v5757_v53 = vpop.f32.mrb[24].mxu1  ;;  %5864 = vmatpush3.bf16.msra.mxu1 %v8052_v7 }
 0x7bf   : > { %v1875_v8 = vpop.f32.mrb[25].mxu1  ;;  %5865 = vmatprep.subr.bf16.mxu1 %v8059_v51 }
 0x7c0   : > { %v5758_v57 = vpop.f32.mrb[26].mxu1 }
 0x7c1   : > { %v2257_v43 = vpack.c.bf16 %v5758_v57, %v5757_v53  ;;  %v1878_v13 = vpop.f32.mrb[27].mxu1 }
 0x7c2   : > { %v2256_v28 = vpack.c.bf16 %v1878_v13, %v1875_v8  ;;  %5866 = vmatpush3.bf16.msra.mxu1 %v8059_v51  ;;  %v8197_v51 = vld [vmem:[%s7353_s16 + $0x3] ss:$0 sm:$0xff] }
 0x7c3   : > { %5867 = vmatprep.subr.bf16.mxu1 %v8066_v58 }
 0x7c4   : > { %5819 = vmatprep.mubr.bf16.mxu1 %v2256_v28 }
 0x7c5   : > { %5820 = vmatmul.mubr.bf16.gmra.mrb[40].mxu1 %v2257_v43 }
 0x7c6   : > { %v5761_v24 = vpop.f32.mrb[28].mxu1  ;;  %5868 = vmatpush3.bf16.msra.mxu1 %v8066_v58 }
 0x7c7   : > { %v1891_v23 = vpop.f32.mrb[29].mxu1  ;;  %5869 = vmatprep.subr.bf16.mxu1 %v8073_v40 }
 0x7c8   : > { %v5762_v7 = vpop.f32.mrb[30].mxu1 }
 0x7c9   : > { %v2259_v35 = vpack.c.bf16 %v5762_v7, %v5761_v24  ;;  %v1894_v14 = vpop.f32.mrb[31].mxu1 }
 0x7ca   : > { %v2258_v0 = vpack.c.bf16 %v1894_v14, %v1891_v23  ;;  %5870 = vmatpush3.bf16.msra.mxu1 %v8073_v40 }
 0x7cb   : > { %5871 = vmatprep.subr.bf16.mxu1 %v8080_v5 }
 0x7cc   : > { %5823 = vmatprep.mubr.bf16.mxu1 %v2258_v0 }
 0x7cd   : > { %5824 = vmatmul.mubr.bf16.gmra.mrb[44].mxu1 %v2259_v35 }
 0x7ce   : > { %5872 = vmatpush3.bf16.msra.mxu1 %v8080_v5  ;;  %5875 = vmatprep.mubr.bf16.mxu1 %v2252_v16  ;;  %v6770_v5 = vld [vmem:[%s7353_s16 + $0x2] ss:$0 sm:$0xff] }
 0x7cf   : > { %5873 = vmatprep.subr.bf16.mxu1 %v8087_v10  ;;  %v8209_v4 = vadd.f32 %v6770_v5, %v7808_v6  ;;  %v8222_v6 = vadd.f32 %v6770_v5, %v7804_v1  ;;  %v8233_v1 = vadd.f32 %v6770_v5, %v7816_v38  ;;  %v8246_v38 = vadd.f32 %v6770_v5, %v7814_v45 }
 0x7d2   : > { %5874 = vmatpush3.bf16.msra.mxu1 %v8087_v10  ;;  %v8203_v10 = vadd.f32 %v6770_v5, %v7802_v56  ;;  %v8215_v56 = vadd.f32 %v6770_v5, %v7798_v62  ;;  %v8226_v62 = vadd.f32 %v6770_v5, %v7812_v39  ;;  %v8239_v39 = vadd.f32 %v6770_v5, %v7810_v15  ;;  %v9418_v5 = vld [vmem:[#allocation37_spill] sm:$0xff] }
 0x7d3   : > { %6152 = vmatprep.subr.bf16.mxu1 %v8100_v52 }
 0x7d5   : > { %5876 = vmatmul.mubr.bf16.vlgmr.msra.gmra.mrb[48].mxu1 %v2253_v21 }
 0x7d6   : > { %5879 = vmatprep.mubr.bf16.mxu1 %v2254_v3  ;;  %6154 = vmatpush3.bf16.msra.mxu1 %v8100_v52 }
 0x7d7   : > { %6156 = vmatprep.subr.bf16.mxu1 %v8110_v11 }
 0x7da   : > { %6158 = vmatpush3.bf16.msra.mxu1 %v8110_v11 }
 0x7db   : > { %6160 = vmatprep.subr.bf16.mxu1 %v8120_v30 }
 0x7dd   : > { %5880 = vmatmul.mubr.bf16.gmra.mrb[52].mxu1 %v2255_v25 }
 0x7de   : > { %5883 = vmatprep.mubr.bf16.mxu1 %v2256_v28  ;;  %6162 = vmatpush3.bf16.msra.mxu1 %v8120_v30 }
 0x7df   : > { %6164 = vmatprep.subr.bf16.mxu1 %v8133_v18 }
 0x7e2   : > { %6166 = vmatpush3.bf16.msra.mxu1 %v8133_v18 }
 0x7e3   : > { %v5845_v58 = vpop.f32.mrb[48].mxu0  ;;  %6168 = vmatprep.subr.bf16.mxu1 %v8138_v61 }
 0x7e4   : > { %v2472_v40 = vpop.f32.mrb[49].mxu0  ;;  %v2481_v27 = vadd.f32 %v5845_v58, %v8197_v51  ;;  %v9417_v58 = vld [vmem:[#allocation36_spill] sm:$0xff] }
 0x7e5   : > { %v2473_v20 = vadd.f32 %v8197_v51, %v2472_v40  ;;  %v5846_v41 = vpop.f32.mrb[50].mxu0  ;;  %5884 = vmatmul.mubr.bf16.gmra.mrb[56].mxu1 %v2257_v43 }
 0x7e6   : > { %v2475_v37 = vpop.f32.mrb[51].mxu0  ;;  %5887 = vmatprep.mubr.bf16.mxu1 %v2258_v0  ;;  %6170 = vmatpush3.bf16.msra.mxu1 %v8138_v61  ;;  %v2484_v60 = vadd.f32 %v5846_v41, %v8197_v51  ;;  %v2998_v9 = vmul.f32 %v2481_v27, %v8215_v56 }
 0x7e7   : > { %v2996_v59 = vmul.f32 %v2473_v20, %v8203_v10  ;;  %v2476_v21 = vadd.f32 %v8197_v51, %v2475_v37  ;;  %6172 = vmatprep.subr.bf16.mxu1 %v8150_v47  ;;  %v9419_v37 = vld [vmem:[#allocation38_spill] sm:$0xff] }
 0x7e8   : > { %v2999_v25 = vmul.f32 %v2484_v60, %v8222_v6 }
 0x7e9   : > { %v2997_v16 = vmul.f32 %v2476_v21, %v8209_v4  ;;  %6011 = vmatprep.mubr.f32.mxu0 %v2996_v59  ;;  %v9420_v21 = vld [vmem:[#allocation39_spill] sm:$0xff] }
 0x7ea   : > { %6174 = vmatpush3.bf16.msra.mxu1 %v8150_v47 }
 0x7eb   : > { %v5849_v12 = vpop.f32.mrb[52].mxu0  ;;  %6012 = vmatmul.mubr.f32.vlgmr.msra.gmra.mrb[80].mxu0 %v2997_v16  ;;  %6176 = vmatprep.subr.bf16.mxu1 %v8160_v31 }
 0x7ec   : > { %v2488_v55 = vpop.f32.mrb[53].mxu0  ;;  %6014 = vmatprep.mubr.f32.mxu0 %v2998_v9  ;;  %v2497_v53 = vadd.f32 %v5849_v12, %v8197_v51 }
 0x7ed   : > { %v2489_v63 = vadd.f32 %v8197_v51, %v2488_v55  ;;  %v5850_v3 = vpop.f32.mrb[54].mxu0  ;;  %5888 = vmatmul.mubr.bf16.gmra.mrb[60].mxu1 %v2259_v35 }
 0x7ee   : > { %v2491_v8 = vpop.f32.mrb[55].mxu0  ;;  %6178 = vmatpush3.bf16.msra.mxu1 %v8160_v31  ;;  %v2500_v13 = vadd.f32 %v5850_v3, %v8197_v51  ;;  %v3002_v24 = vmul.f32 %v2497_v53, %v8239_v39 }
 0x7ef   : > { %v3000_v57 = vmul.f32 %v2489_v63, %v8226_v62  ;;  %v2492_v43 = vadd.f32 %v8197_v51, %v2491_v8  ;;  %6015 = vmatmul.mubr.f32.gmra.mrb[82].mxu0 %v2999_v25  ;;  %6180 = vmatprep.subr.bf16.mxu1 %v8170_v32  ;;  %v9421_v63 = vld [vmem:[#allocation40_spill] sm:$0xff] }
 0x7f0   : > { %v3003_v35 = vmul.f32 %v2500_v13, %v8246_v38 }
 0x7f1   : > { %v3001_v28 = vmul.f32 %v2492_v43, %v8233_v1  ;;  %6017 = vmatprep.mubr.f32.mxu0 %v3000_v57  ;;  %v9422_v57 = vld [vmem:[#allocation41_spill] sm:$0xff] }
 0x7f2   : > { %6182 = vmatpush3.bf16.msra.mxu1 %v8170_v32 }
 0x7f3   : > { %v5853_v23 = vpop.f32.mrb[56].mxu0  ;;  %6018 = vmatmul.mubr.f32.gmra.mrb[84].mxu0 %v3001_v28  ;;  %6231 = vmatprep.subr.bf16.mxu1 %v8100_v52  ;;  %v9423_v28 = vld [vmem:[#allocation42_spill] sm:$0xff] }
 0x7f4   : > { %v2513_v7 = vadd.f32 %v5853_v23, %v8197_v51  ;;  %v2504_v15 = vpop.f32.mrb[57].mxu0  ;;  %6020 = vmatprep.mubr.f32.mxu0 %v3002_v24  ;;  %v9424_v23 = vld [vmem:[#allocation43_spill] sm:$0xff] }
 0x7f5   : > { %v2505_v14 = vadd.f32 %v8197_v51, %v2504_v15  ;;  %v5854_v0 = vpop.f32.mrb[58].mxu0 }
 0x7f6   : > { %v8253_v40 = vmul.f32 %v2513_v7, %v9417_v58  ;;  %v2516_v20 = vadd.f32 %v5854_v0, %v8197_v51  ;;  %v2507_v45 = vpop.f32.mrb[59].mxu0 }
 0x7f7   : > { %v8257_v41 = vmul.f32 %v2505_v14, %v9418_v5  ;;  %v2508_v27 = vadd.f32 %v8197_v51, %v2507_v45  ;;  %6021 = vmatmul.mubr.f32.gmra.mrb[86].mxu0 %v3003_v35 }
 0x7f8   : > { %v8261_v59 = vmul.f32 %v2516_v20, %v9419_v37 }
 0x7f9   : > { %v8264_v60 = vmul.f32 %v2508_v27, %v9420_v21 }
 0x7fb   : > { %v5857_v16 = vpop.f32.mrb[60].mxu0 }
 0x7fc   : > { %v2529_v9 = vadd.f32 %v5857_v16, %v8197_v51  ;;  %v2520_v12 = vpop.f32.mrb[61].mxu0 }
 0x7fd   : > { %v2521_v55 = vadd.f32 %v8197_v51, %v2520_v12  ;;  %v5858_v25 = vpop.f32.mrb[62].mxu0 }
 0x7fe   : > { %v8269_v3 = vmul.f32 %v2529_v9, %v9421_v63  ;;  %v2532_v53 = vadd.f32 %v5858_v25, %v8197_v51  ;;  %v2523_v8 = vpop.f32.mrb[63].mxu0 }
 0x7ff   : > { %v8273_v43 = vmul.f32 %v2521_v55, %v9422_v57  ;;  %v2524_v13 = vadd.f32 %v8197_v51, %v2523_v8 }
 0x800   : > { %v8277_v24 = vmul.f32 %v2532_v53, %v9423_v28 }
 0x801   : > { %v8280_v7 = vmul.f32 %v2524_v13, %v9424_v23 }
 0x803   : > { %v8282_v15 = vpop.f32.mrb[64].mxu0 }
 0x804   : > { %v8284_v35 = vpop.f32.mrb[65].mxu0 }
 0x805   : > { %v8286_v14 = vpop.f32.mrb[66].mxu0 }
 0x806   : > { %v8288_v0 = vpop.f32.mrb[67].mxu0 }
 0x80b   : > { %v8290_v20 = vpop.f32.mrb[68].mxu0 }
 0x80c   : > { %v8292_v45 = vpop.f32.mrb[69].mxu0 }
 0x80d   : > { %v8294_v27 = vpop.f32.mrb[70].mxu0 }
 0x80e   : > { %v8296_v16 = vpop.f32.mrb[71].mxu0 }
 0x813   : > { %v8298_v9 = vpop.f32.mrb[72].mxu0 }
 0x814   : > { %9425 = vst [vmem:[#allocation36_spill] sm:$0xff] %v8298_v9  ;;  %v8300_v12 = vpop.f32.mrb[73].mxu0 }
 0x815   : > { %v8302_v55 = vpop.f32.mrb[74].mxu0 }
 0x816   : > { %9426 = vst [vmem:[#allocation37_spill] sm:$0xff] %v8302_v55  ;;  %v8304_v25 = vpop.f32.mrb[75].mxu0 }
 0x81b   : > { %v8306_v53 = vpop.f32.mrb[76].mxu0 }
 0x81c   : > { %9427 = vst [vmem:[#allocation38_spill] sm:$0xff] %v8306_v53  ;;  %v8308_v8 = vpop.f32.mrb[77].mxu0 }
 0x81d   : > { %9428 = vst [vmem:[#allocation39_spill] sm:$0xff] %v8308_v8  ;;  %v8310_v13 = vpop.f32.mrb[78].mxu0 }
 0x81e   : > { %9429 = vst [vmem:[#allocation40_spill] sm:$0xff] %v8310_v13  ;;  %v8312_v48 = vpop.f32.mrb[79].mxu0 }
 0x81f   : > { %9430 = vst [vmem:[#allocation41_spill] sm:$0xff] %v8312_v48 }
 0x888   : > { %v5813_v22 = vpop.f32.mrb[32].mxu1 }
 0x889   : > { %v2367_v44 = vpop.f32.mrb[33].mxu1  ;;  %v2376_v34 = vadd.f32 %v5813_v22, %v8197_v51 }
 0x88a   : > { %v2368_v42 = vadd.f32 %v8197_v51, %v2367_v44  ;;  %v5814_v36 = vpop.f32.mrb[34].mxu1 }
 0x88b   : > { %v2370_v26 = vpop.f32.mrb[35].mxu1  ;;  %v2379_v19 = vadd.f32 %v5814_v36, %v8197_v51  ;;  %v2821_v46 = vmul.f32 %v2376_v34, %v8215_v56 }
 0x88c   : > { %v2819_v17 = vmul.f32 %v2368_v42, %v8203_v10  ;;  %v2371_v54 = vadd.f32 %v8197_v51, %v2370_v26 }
 0x88d   : > { %v2822_v22 = vmul.f32 %v2379_v19, %v8222_v6 }
 0x88e   : > { %v2820_v2 = vmul.f32 %v2371_v54, %v8209_v4  ;;  %5955 = vmatprep.mubr.f32.mxu1 %v2819_v17 }
 0x890   : > { %v5817_v50 = vpop.f32.mrb[36].mxu1  ;;  %5956 = vmatmul.mubr.f32.vlgmr.msra.gmra.mrb[64].mxu1 %v2820_v2 }
 0x891   : > { %6239 = vmatpush3.bf16.msra.mxu1 %v8100_v52  ;;  %v2383_v44 = vpop.f32.mrb[37].mxu1  ;;  %5958 = vmatprep.mubr.f32.mxu1 %v2821_v46  ;;  %v2392_v26 = vadd.f32 %v5817_v50, %v8197_v51 }
 0x892   : > { %v2384_v49 = vadd.f32 %v8197_v51, %v2383_v44  ;;  %v5818_v42 = vpop.f32.mrb[38].mxu1  ;;  %6232 = vmatprep.subr.bf16.mxu1 %v8110_v11 }
 0x893   : > { %v2386_v36 = vpop.f32.mrb[39].mxu1  ;;  %v2395_v2 = vadd.f32 %v5818_v42, %v8197_v51  ;;  %v2825_v19 = vmul.f32 %v2392_v26, %v8239_v39 }
 0x894   : > { %v2823_v54 = vmul.f32 %v2384_v49, %v8226_v62  ;;  %v2387_v17 = vadd.f32 %v8197_v51, %v2386_v36  ;;  %5959 = vmatmul.mubr.f32.gmra.mrb[66].mxu1 %v2822_v22 }
 0x895   : > { %6240 = vmatpush3.bf16.msra.mxu1 %v8110_v11  ;;  %v2826_v52 = vmul.f32 %v2395_v2, %v8246_v38 }
 0x896   : > { %v2824_v46 = vmul.f32 %v2387_v17, %v8233_v1  ;;  %5961 = vmatprep.mubr.f32.mxu1 %v2823_v54  ;;  %6233 = vmatprep.subr.bf16.mxu1 %v8120_v30 }
 0x898   : > { %v5821_v34 = vpop.f32.mrb[40].mxu1  ;;  %5962 = vmatmul.mubr.f32.gmra.mrb[68].mxu1 %v2824_v46 }
 0x899   : > { %v2408_v50 = vadd.f32 %v5821_v34, %v8197_v51  ;;  %6241 = vmatpush3.bf16.msra.mxu1 %v8120_v30  ;;  %v2399_v49 = vpop.f32.mrb[41].mxu1  ;;  %5964 = vmatprep.mubr.f32.mxu1 %v2825_v19 }
 0x89a   : > { %v2400_v11 = vadd.f32 %v8197_v51, %v2399_v49  ;;  %v5822_v10 = vpop.f32.mrb[42].mxu1  ;;  %6234 = vmatprep.subr.bf16.mxu1 %v8133_v18 }
 0x89b   : > { %v2829_v4 = vmul.f32 %v2408_v50, %v9417_v58  ;;  %v2411_v56 = vadd.f32 %v5822_v10, %v8197_v51  ;;  %v2402_v6 = vpop.f32.mrb[43].mxu1 }
 0x89c   : > { %v2827_v62 = vmul.f32 %v2400_v11, %v9418_v5  ;;  %v2403_v1 = vadd.f32 %v8197_v51, %v2402_v6  ;;  %5965 = vmatmul.mubr.f32.gmra.mrb[70].mxu1 %v2826_v52  ;;  %v8405_v11 = vld [vmem:[%s7332_s15 + $0x140] sm:$0xff]  }
 0x89d   : > { %v2830_v30 = vmul.f32 %v2411_v56, %v9419_v37  ;;  %6242 = vmatpush3.bf16.msra.mxu1 %v8133_v18 }
 0x89e   : > { %v2828_v39 = vmul.f32 %v2403_v1, %v9420_v21  ;;  %5967 = vmatprep.mubr.f32.mxu1 %v2827_v62  ;;  %6235 = vmatprep.subr.bf16.mxu1 %v8138_v61 }
 0x8a0   : > { %v5825_v38 = vpop.f32.mrb[44].mxu1  ;;  %5968 = vmatmul.mubr.f32.gmra.mrb[72].mxu1 %v2828_v39 }
 0x8a1   : > { %v2424_v58 = vadd.f32 %v5825_v38, %v8197_v51  ;;  %6243 = vmatpush3.bf16.msra.mxu1 %v8138_v61  ;;  %v2415_v44 = vpop.f32.mrb[45].mxu1  ;;  %5970 = vmatprep.mubr.f32.mxu1 %v2829_v4 }
 0x8a2   : > { %v2416_v5 = vadd.f32 %v8197_v51, %v2415_v44  ;;  %v5826_v22 = vpop.f32.mrb[46].mxu1  ;;  %6236 = vmatprep.subr.bf16.mxu1 %v8150_v47 }
 0x8a3   : > { %v2833_v18 = vmul.f32 %v2424_v58, %v9421_v63  ;;  %v2427_v37 = vadd.f32 %v5826_v22, %v8197_v51  ;;  %v2418_v21 = vpop.f32.mrb[47].mxu1 }
 0x8a4   : > { %v2831_v42 = vmul.f32 %v2416_v5, %v9422_v57  ;;  %v2419_v26 = vadd.f32 %v8197_v51, %v2418_v21  ;;  %5971 = vmatmul.mubr.f32.gmra.mrb[74].mxu1 %v2830_v30 }
 0x8a5   : > { %v2834_v36 = vmul.f32 %v2427_v37, %v9423_v28  ;;  %6244 = vmatpush3.bf16.msra.mxu1 %v8150_v47 }
 0x8a6   : > { %v2832_v61 = vmul.f32 %v2419_v26, %v9424_v23  ;;  %5973 = vmatprep.mubr.f32.mxu1 %v2831_v42  ;;  %6237 = vmatprep.subr.bf16.mxu1 %v8160_v31 }
 0x8a8   : > { %v8358_v54 = vpop.f32.mrb[48].mxu1  ;;  %5974 = vmatmul.mubr.f32.gmra.mrb[76].mxu1 %v2832_v61 }
 0x8a9   : > { %6245 = vmatpush3.bf16.msra.mxu1 %v8160_v31  ;;  %v8361_v63 = vpop.f32.mrb[49].mxu1  ;;  %5976 = vmatprep.mubr.f32.mxu1 %v2833_v18 }
 0x8aa   : > { %v8363_v57 = vpop.f32.mrb[50].mxu1  ;;  %6238 = vmatprep.subr.bf16.mxu1 %v8170_v32 }
 0x8ab   : > { %v8366_v51 = vpop.f32.mrb[51].mxu1 }
 0x8ac   : > { %5977 = vmatmul.mubr.f32.gmra.mrb[78].mxu1 %v2834_v36 }
 0x8ad   : > { %6246 = vmatpush3.bf16.msra.mxu1 %v8170_v32  ;;  %6023 = vmatprep.mubr.f32.mxu1 %v8257_v41 }
 0x8b0   : > { %v8370_v47 = vpop.f32.mrb[52].mxu1  ;;  %6024 = vmatmul.mubr.f32.vlgmr.msra.gmra.mrb[80].mxu1 %v8264_v60 }
 0x8b1   : > { %v8373_v28 = vpop.f32.mrb[53].mxu1  ;;  %6026 = vmatprep.mubr.f32.mxu1 %v8253_v40 }
 0x8b2   : > { %v8376_v31 = vpop.f32.mrb[54].mxu1 }
 0x8b3   : > { %v8378_v23 = vpop.f32.mrb[55].mxu1 }
 0x8b4   : > { %6027 = vmatmul.mubr.f32.gmra.mrb[82].mxu1 %v8261_v59 }
 0x8b5   : > { %6029 = vmatprep.mubr.f32.mxu1 %v8273_v43 }
 0x8b8   : > { %v8382_v17 = vpop.f32.mrb[56].mxu1  ;;  %6030 = vmatmul.mubr.f32.gmra.mrb[84].mxu1 %v8280_v7 }
 0x8b9   : > { %9431 = vst [vmem:[#allocation42_spill] sm:$0xff] %v8382_v17  ;;  %v8385_v32 = vpop.f32.mrb[57].mxu1  ;;  %6032 = vmatprep.mubr.f32.mxu1 %v8269_v3 }
 0x8ba   : > { %v8388_v41 = vpop.f32.mrb[58].mxu1 }
 0x8bb   : > { %9432 = vst [vmem:[#allocation43_spill] sm:$0xff] %v8388_v41  ;;  %v8390_v60 = vpop.f32.mrb[59].mxu1 }
 0x8bc   : > { %6033 = vmatmul.mubr.f32.gmra.mrb[86].mxu1 %v8277_v24  ;;  %v2818_v24 = vld [vmem:[%s9437_s3] sm:$0xff] }
 0x8bd   : > { %6035 = vmatprep.subr.mxu1 %v2818_v24  ;;  %6061 = vmatprep.subr.mxu0 %v2818_v24 }
 0x8be   : > { %v6013_v40 = vpop.f32.mrb[80].mxu0  ;;  %6036 = vmatpush3.msra.mxu1 %v2818_v24  ;;  %6062 = vmatpush3.msra.mxu0 %v2818_v24 }
 0x8bf   : > { %v3078_v2 = vpop.f32.mrb[81].mxu0  ;;  %6087 = vmatprep.subr.bf16.mxu1 %v8405_v11  ;;  %v3158_v4 = vmul.f32 0.25, %v6013_v40 }
 0x8c0   : > { %v8393_v59 = vpop.f32.mrb[60].mxu1  ;;  %v3157_v62 = vmul.f32 0.25, %v3078_v2 }
 0x8c1   : > { %9433 = vst [vmem:[#allocation44_spill] sm:$0xff] %v8393_v59  ;;  %v8395_v43 = vpop.f32.mrb[61].mxu1 }
 0x8c2   : > { %9434 = vst [vmem:[#allocation45_spill] sm:$0xff] %v8395_v43  ;;  %v8397_v46 = vpop.f32.mrb[62].mxu1  ;;  %v6016_v7 = vpop.f32.mrb[82].mxu0 }
 0x8c3   : > { %9435 = vst [vmem:[#allocation46_spill] sm:$0xff] %v8397_v46  ;;  %v8399_v19 = vpop.f32.mrb[63].mxu1  ;;  %v3088_v34 = vpop.f32.mrb[83].mxu0  ;;  %v3160_v39 = vmul.f32 0.25, %v6016_v7 }
 0x8c4   : > { %9436 = vst [vmem:[#allocation47_spill] sm:$0xff] %v8399_v19  ;;  %v3159_v38 = vmul.f32 0.25, %v3088_v34 }
 0x8c6   : > { %v6019_v3 = vpop.f32.mrb[84].mxu0 }
 0x8c7   : > { %v3098_v50 = vpop.f32.mrb[85].mxu0  ;;  %v3162_v5 = vmul.f32 0.25, %v6019_v3 }
 0x8c8   : > { %v3161_v42 = vmul.f32 0.25, %v3098_v50 }
 0x8ca   : > { %v6022_v49 = vpop.f32.mrb[86].mxu0 }
 0x8cb   : > { %v3108_v52 = vpop.f32.mrb[87].mxu0  ;;  %v3164_v24 = vmul.f32 0.25, %v6022_v49 }
 0x8cc   : > { %v3163_v2 = vmul.f32 0.25, %v3108_v52 }
 0x963   : > { %v5957_v10 = vpop.f32.mrb[64].mxu1 }
 0x964   : > { %v2981_v56 = vmul.f32 0.25, %v5957_v10  ;;  %v2901_v6 = vpop.f32.mrb[65].mxu1 }
 0x965   : > { %v2980_v1 = vmul.f32 0.25, %v2901_v6 }
 0x966   : > { %v3174_v30 = vmax.f32 %v2981_v56, %v3158_v4 }
 0x967   : > { %v3173_v58 = vmax.f32 %v2980_v1, %v3157_v62  ;;  %v5960_v44 = vpop.f32.mrb[66].mxu1 }
 0x968   : > { %v3190_v22 = vsub.f32 %v2981_v56, %v3174_v30  ;;  %v3238_v18 = vsub.f32 %v3158_v4, %v3174_v30  ;;  %v2983_v37 = vmul.f32 0.25, %v5960_v44  ;;  %v2911_v21 = vpop.f32.mrb[67].mxu1 }
 0x969   : > { %v3189_v26 = vsub.f32 %v2980_v1, %v3173_v58  ;;  %v3237_v36 = vsub.f32 %v3157_v62, %v3173_v58  ;;  %v2982_v61 = vmul.f32 0.25, %v2911_v21 }
 0x96a   : > { %v3207_v40 = vmul.f32 1.442695, %v3190_v22  ;;  %v3255_v10 = vmul.f32 1.442695, %v3238_v18  ;;  %v3176_v29 = vmax.f32 %v2983_v37, %v3160_v39 }
 0x96b   : > { %v3205_v6 = vmul.f32 1.442695, %v3189_v26  ;;  %v3253_v33 = vmul.f32 1.442695, %v3237_v36  ;;  %v3175_v7 = vmax.f32 %v2982_v61, %v3159_v38  ;;  %v5963_v34 = vpop.f32.mrb[68].mxu1 }
 0x96c   : > { %6610 = vpow2.f32 %v3207_v40  ;;  %v3192_v59 = vsub.f32 %v2983_v37, %v3176_v29  ;;  %v3240_v3 = vsub.f32 %v3160_v39, %v3176_v29  ;;  %v2985_v56 = vmul.f32 0.25, %v5963_v34  ;;  %v2921_v4 = vpop.f32.mrb[69].mxu1 }
 0x96d   : > { %6612 = vpow2.f32 %v3255_v10  ;;  %v3191_v30 = vsub.f32 %v2982_v61, %v3175_v7  ;;  %v3239_v50 = vsub.f32 %v3159_v38, %v3175_v7  ;;  %v2984_v1 = vmul.f32 0.25, %v2921_v4 }
 0x96e   : > { %6614 = vpow2.f32 %v3205_v6  ;;  %v3211_v62 = vmul.f32 1.442695, %v3192_v59  ;;  %v3259_v49 = vmul.f32 1.442695, %v3240_v3  ;;  %v3178_v58 = vmax.f32 %v2985_v56, %v3162_v5 }
 0x96f   : > { %6616 = vpow2.f32 %v3253_v33  ;;  %v3209_v44 = vmul.f32 1.442695, %v3191_v30  ;;  %v3257_v52 = vmul.f32 1.442695, %v3239_v50  ;;  %v3177_v22 = vmax.f32 %v2984_v1, %v3161_v42  ;;  %v5966_v18 = vpop.f32.mrb[70].mxu1 }
 0x970   : > { %6618 = vpow2.f32 %v3211_v62  ;;  %v3194_v21 = vsub.f32 %v2985_v56, %v3178_v58  ;;  %v3242_v26 = vsub.f32 %v3162_v5, %v3178_v58  ;;  %v2987_v37 = vmul.f32 0.25, %v5966_v18  ;;  %v2931_v29 = vpop.f32.mrb[71].mxu1 }
 0x971   : > { %6620 = vpow2.f32 %v3259_v49  ;;  %v3193_v39 = vsub.f32 %v2984_v1, %v3177_v22  ;;  %v3241_v36 = vsub.f32 %v3161_v42, %v3177_v22  ;;  %v2986_v61 = vmul.f32 0.25, %v2931_v29 }
 0x972   : > { %6622 = vpow2.f32 %v3209_v44  ;;  %v3215_v38 = vmul.f32 1.442695, %v3194_v21  ;;  %v3263_v40 = vmul.f32 1.442695, %v3242_v26  ;;  %v3180_v59 = vmax.f32 %v2987_v37, %v3164_v24 }
 0x973   : > { %6624 = vpow2.f32 %v3257_v52  ;;  %v3213_v10 = vmul.f32 1.442695, %v3193_v39  ;;  %v3261_v33 = vmul.f32 1.442695, %v3241_v36  ;;  %v3179_v6 = vmax.f32 %v2986_v61, %v3163_v2  ;;  %v5969_v7 = vpop.f32.mrb[72].mxu1 }
 0x974   : > { %6626 = vpow2.f32 %v3215_v38  ;;  %v3196_v34 = vsub.f32 %v2987_v37, %v3180_v59  ;;  %v3244_v3 = vsub.f32 %v3164_v24, %v3180_v59  ;;  %v2941_v56 = vpop.f32.mrb[73].mxu1 }
 0x975   : > { %6628 = vpow2.f32 %v3263_v40  ;;  %v3195_v5 = vsub.f32 %v2986_v61, %v3179_v6  ;;  %v3243_v4 = vsub.f32 %v3163_v2, %v3179_v6 }
 0x976   : > { %v6611_v30 = vpop.eup %6610  ;;  %6630 = vpow2.f32 %v3213_v10  ;;  %v3219_v42 = vmul.f32 1.442695, %v3196_v34  ;;  %v3267_v50 = vmul.f32 1.442695, %v3244_v3 }
 0x977   : > { %v6613_v1 = vpop.eup %6612  ;;  %6632 = vpow2.f32 %v3261_v33  ;;  %v3217_v62 = vmul.f32 1.442695, %v3195_v5  ;;  %v5972_v49 = vpop.f32.mrb[74].mxu1  ;;  %v3265_v18 = vmul.f32 1.442695, %v3243_v4 }
 0x978   : > { %v6615_v58 = vpop.eup %6614  ;;  %v3286_v44 = vadd.f32 %v6613_v1, %v6611_v30  ;;  %6634 = vpow2.f32 %v3219_v42  ;;  %v2951_v52 = vpop.f32.mrb[75].mxu1  ;;  %v2989_v42 = vmul.f32 0.25, %v5969_v7 }
 0x979   : > { %v6617_v22 = vpop.eup %6616  ;;  %6636 = vpow2.f32 %v3267_v50  ;;  %v2988_v50 = vmul.f32 0.25, %v2941_v56 }
 0x97a   : > { %v8408_v24 = vpop.eup %6618  ;;  %6638 = vrcp.f32 %v3286_v44  ;;  %v3285_v21 = vadd.f32 %v6617_v22, %v6615_v58  ;;  %v8438_v44 = vmul.f32 0.25, %v2951_v52 }
 0x97b   : > { %v8410_v2 = vpop.eup %6620  ;;  %6640 = vpow2.f32 %v3217_v62  ;;  %v5975_v26 = vpop.f32.mrb[76].mxu1  ;;  %v8436_v62 = vmul.f32 0.25, %v5972_v49 }
 0x97c   : > { %v8412_v37 = vpop.eup %6622  ;;  %6642 = vrcp.f32 %v3285_v21  ;;  %v3288_v29 = vadd.f32 %v8410_v2, %v8408_v24  ;;  %v2961_v39 = vpop.f32.mrb[77].mxu1 }
 0x97d   : > { %v8416_v36 = vpop.eup %6624  ;;  %6644 = vpow2.f32 %v3265_v18  ;;  %v8446_v7 = vmul.f32 0.25, %v2961_v39 }
 0x97e   : > { %v8418_v61 = vpop.eup %6626  ;;  %6646 = vrcp.f32 %v3288_v29  ;;  %v3287_v38 = vadd.f32 %v8416_v36, %v8412_v37 }
 0x97f   : > { %v8422_v40 = vpop.eup %6628  ;;  %v5978_v59 = vpop.f32.mrb[78].mxu1 }
 0x980   : > { %v8424_v10 = vpop.eup %6630  ;;  %6648 = vrcp.f32 %v3287_v38  ;;  %v3290_v33 = vadd.f32 %v8422_v40, %v8418_v61  ;;  %v2971_v6 = vpop.f32.mrb[79].mxu1  ;;  %v8442_v38 = vmul.f32 0.25, %v5975_v26  ;;  %v8448_v52 = vmul.f32 0.25, %v5978_v59  ;;  %v6435_v59 = vld [vmem:[%s7332_s15 + $0x148] sm:$0xff]  }
 0x981   : > { %v8428_v34 = vpop.eup %6632 }
 0x982   : > { %v8430_v3 = vpop.eup %6634  ;;  %v3289_v5 = vadd.f32 %v8428_v34, %v8424_v10 }
 0x983   : > { %v8434_v4 = vpop.eup %6636  ;;  %v6025_v18 = vpop.f32.mrb[80].mxu1 }
 0x984   : > { %v6639_v21 = vpop.eup %6638  ;;  %6650 = vrcp.f32 %v3289_v5  ;;  %v3292_v29 = vadd.f32 %v8434_v4, %v8430_v3  ;;  %v3166_v53 = vmul.f32 0.25, %v6025_v18  ;;  %v3118_v46 = vpop.f32.mrb[81].mxu1  ;;  %v8450_v5 = vmul.f32 0.25, %v2971_v6 }
 0x985   : > { %v8444_v13 = vpop.eup %6640  ;;  %v3318_v43 = vmul.f32 %v6639_v21, %v6611_v30  ;;  %v3528_v8 = vmul.f32 %v6639_v21, %v6613_v1  ;;  %v3165_v56 = vmul.f32 0.25, %v3118_v46  ;;  %6652 = vrcp.f32 %v3290_v33 }
 0x986   : > { %v6643_v49 = vpop.eup %6642  ;;  %v3182_v19 = vmax.f32 %v2989_v42, %v3166_v53  ;;  %6654 = vrcp.f32 %v3292_v29 }
 0x987   : > { %v8452_v48 = vpop.eup %6644  ;;  %v3181_v26 = vmax.f32 %v2988_v50, %v3165_v56  ;;  %v6028_v18 = vpop.f32.mrb[82].mxu1  ;;  %v3317_v17 = vmul.f32 %v6643_v49, %v6615_v58  ;;  %v3527_v9 = vmul.f32 %v6643_v49, %v6617_v22 }
 0x988   : > { %v6647_v30 = vpop.eup %6646  ;;  %v3291_v1 = vadd.f32 %v8452_v48, %v8444_v13  ;;  %v3198_v46 = vsub.f32 %v2989_v42, %v3182_v19  ;;  %v3246_v39 = vsub.f32 %v3166_v53, %v3182_v19  ;;  %v3168_v33 = vmul.f32 0.25, %v6028_v18  ;;  %v3128_v21 = vpop.f32.mrb[83].mxu1 }
 0x989   : > { %v3197_v41 = vsub.f32 %v2988_v50, %v3181_v26  ;;  %v3245_v6 = vsub.f32 %v3165_v56, %v3181_v26  ;;  %6037 = vmatprep.mubr.msk.f32.mxu1 %vm3333_vm1, %v3317_v17  ;;  %6063 = vmatprep.mubr.msk.f32.mxu0 %vm3333_vm1, %v3527_v9  ;;  %v3167_v29 = vmul.f32 0.25, %v3128_v21  ;;  %v3320_v55 = vmul.f32 %v6647_v30, %v8408_v24 }
 0x98a   : > { %v6649_v58 = vpop.eup %6648  ;;  %6656 = vrcp.f32 %v3291_v1  ;;  %v3223_v22 = vmul.f32 1.442695, %v3198_v46  ;;  %v3271_v49 = vmul.f32 1.442695, %v3246_v39  ;;  %v3184_v42 = vmax.f32 %v8436_v62, %v3168_v33  ;;  %6038 = vmatmul.mubr.msk.f32.vlgmr.msra.gmra.mrb[88].mxu1 %vm3333_vm1, %v3318_v43  ;;  %6064 = vmatmul.mubr.msk.f32.vlgmr.msra.gmra.mrb[88].mxu0 %vm3333_vm1, %v3528_v8  ;;  %v6436_v1 = vld [vmem:[%s7332_s15 + $0x150] sm:$0xff]  }
 0x98b   : > { %v3221_v53 = vmul.f32 1.442695, %v3197_v41  ;;  %v3269_v19 = vmul.f32 1.442695, %v3245_v6  ;;  %v3183_v17 = vmax.f32 %v8438_v44, %v3167_v29  ;;  %v6031_v50 = vpop.f32.mrb[84].mxu1  ;;  %v3319_v9 = vmul.f32 %v6649_v58, %v8412_v37  ;;  %6088 = vmatpush3.bf16.msra.mxu1 %v8405_v11 }
 0x98c   : > { %6658 = vpow2.f32 %v3223_v22  ;;  %v3200_v24 = vsub.f32 %v8436_v62, %v3184_v42  ;;  %v3248_v56 = vsub.f32 %v3168_v33, %v3184_v42  ;;  %v3170_v26 = vmul.f32 0.25, %v6031_v50  ;;  %v3138_v18 = vpop.f32.mrb[85].mxu1  ;;  %6089 = vmatprep.subr.bf16.mxu1 %v6435_v59 }
 0x98d   : > { %6660 = vpow2.f32 %v3271_v49  ;;  %v3199_v8 = vsub.f32 %v8438_v44, %v3183_v17  ;;  %v3247_v41 = vsub.f32 %v3167_v29, %v3183_v17  ;;  %6040 = vmatprep.mubr.msk.f32.mxu1 %vm3333_vm1, %v3319_v9  ;;  %v3529_v43 = vmul.f32 %v6649_v58, %v8416_v36  ;;  %v6437_v49 = vld [vmem:[%s7332_s15 + $0x158] sm:$0xff]  }
 0x98e   : > { %v6651_v46 = vpop.eup %6650  ;;  %6662 = vpow2.f32 %v3221_v53  ;;  %v3227_v37 = vmul.f32 1.442695, %v3200_v24  ;;  %v3275_v11 = vmul.f32 1.442695, %v3248_v56  ;;  %v3186_v39 = vmax.f32 %v8442_v38, %v3170_v26  ;;  %6041 = vmatmul.mubr.msk.f32.gmra.mrb[90].mxu1 %vm3333_vm1, %v3320_v55 }
 0x98f   : > { %6664 = vpow2.f32 %v3269_v19  ;;  %v3225_v62 = vmul.f32 1.442695, %v3199_v8  ;;  %v3273_v33 = vmul.f32 1.442695, %v3247_v41  ;;  %6066 = vmatprep.mubr.msk.f32.mxu0 %vm3333_vm1, %v3529_v43  ;;  %v3169_v44 = vmul.f32 0.25, %v3138_v18  ;;  %v6034_v21 = vpop.f32.mrb[86].mxu1  ;;  %6090 = vmatpush3.bf16.msra.mxu1 %v6435_v59  ;;  %v6653_v6 = vpop.eup %6652 }
 0x990   : > { %6666 = vpow2.f32 %v3227_v37  ;;  %v3202_v36 = vsub.f32 %v8442_v38, %v3186_v39  ;;  %v3250_v29 = vsub.f32 %v3170_v26, %v3186_v39  ;;  %v3530_v58 = vmul.f32 %v6647_v30, %v8410_v2  ;;  %v3148_v22 = vpop.f32.mrb[87].mxu1  ;;  %6091 = vmatprep.subr.bf16.mxu1 %v6436_v1  ;;  %v6655_v42 = vpop.eup %6654 }
 0x991   : > { %6668 = vpow2.f32 %v3275_v11  ;;  %v3185_v55 = vmax.f32 %v8446_v7, %v3169_v44  ;;  %v3172_v53 = vmul.f32 0.25, %v6034_v21  ;;  %v3321_v19 = vmul.f32 %v6651_v46, %v8424_v10 }
 0x992   : > { %6670 = vpow2.f32 %v3225_v62  ;;  %v3231_v17 = vmul.f32 1.442695, %v3202_v36  ;;  %v3279_v59 = vmul.f32 1.442695, %v3250_v29  ;;  %6067 = vmatmul.mubr.msk.f32.gmra.mrb[90].mxu0 %vm3333_vm1, %v3530_v58  ;;  %v3531_v38 = vmul.f32 %v6651_v46, %v8428_v34  ;;  %v6438_v34 = vld [vmem:[%s7332_s15 + $0x160] sm:$0xff]  }
 0x993   : > { %6672 = vpow2.f32 %v3273_v33  ;;  %v3201_v2 = vsub.f32 %v8446_v7, %v3185_v55  ;;  %v3249_v30 = vsub.f32 %v3169_v44, %v3185_v55  ;;  %v3188_v50 = vmax.f32 %v8448_v52, %v3172_v53  ;;  %6043 = vmatprep.mubr.msk.f32.mxu1 %vm3333_vm1, %v3321_v19  ;;  %6092 = vmatpush3.bf16.msra.mxu1 %v6436_v1 }
 0x994   : > { %v6657_v9 = vpop.eup %6656  ;;  %6674 = vpow2.f32 %v3231_v17  ;;  %6069 = vmatprep.mubr.msk.f32.mxu0 %vm3333_vm1, %v3531_v38  ;;  %v3171_v10 = vmul.f32 0.25, %v3148_v22  ;;  %v3322_v24 = vmul.f32 %v6653_v6, %v8418_v61  ;;  %v3532_v56 = vmul.f32 %v6653_v6, %v8422_v40  ;;  %6093 = vmatprep.subr.bf16.mxu1 %v6437_v49 }
 0x995   : > { %6676 = vpow2.f32 %v3279_v59  ;;  %v3229_v26 = vmul.f32 1.442695, %v3201_v2  ;;  %v3277_v7 = vmul.f32 1.442695, %v3249_v30  ;;  %v3204_v18 = vsub.f32 %v8448_v52, %v3188_v50 }
 0x996   : > { %v6659_v8 = vpop.eup %6658  ;;  %v3252_v41 = vsub.f32 %v3172_v53, %v3188_v50  ;;  %v3187_v1 = vmax.f32 %v8450_v5, %v3171_v10  ;;  %6044 = vmatmul.mubr.msk.f32.gmra.mrb[92].mxu1 %vm3333_vm1, %v3322_v24  ;;  %6070 = vmatmul.mubr.msk.f32.gmra.mrb[92].mxu0 %vm3333_vm1, %v3532_v56  ;;  %v3323_v43 = vmul.f32 %v6657_v9, %v8444_v13 }
 0x997   : > { %v6661_v61 = vpop.eup %6660  ;;  %6678 = vpow2.f32 %v3229_v26  ;;  %v3235_v40 = vmul.f32 1.442695, %v3204_v18  ;;  %v3533_v46 = vmul.f32 %v6657_v9, %v8452_v48  ;;  %v3324_v37 = vmul.f32 %v6655_v42, %v8430_v3  ;;  %6094 = vmatpush3.bf16.msra.mxu1 %v6437_v49 }
 0x998   : > { %v6663_v11 = vpop.eup %6662  ;;  %v3294_v52 = vadd.f32 %v6661_v61, %v6659_v8  ;;  %6680 = vpow2.f32 %v3277_v7  ;;  %v3283_v39 = vmul.f32 1.442695, %v3252_v41  ;;  %v3203_v62 = vsub.f32 %v8450_v5, %v3187_v1  ;;  %6046 = vmatprep.mubr.msk.f32.mxu1 %vm3333_vm1, %v3323_v43  ;;  %6095 = vmatprep.subr.bf16.mxu1 %v6438_v34 }
 0x999   : > { %v6665_v33 = vpop.eup %6664  ;;  %6682 = vpow2.f32 %v3235_v40  ;;  %v3251_v13 = vsub.f32 %v3171_v10, %v3187_v1  ;;  %6072 = vmatprep.mubr.msk.f32.mxu0 %vm3333_vm1, %v3533_v46  ;;  %v3534_v44 = vmul.f32 %v6655_v42, %v8434_v4 }
 0x99a   : > { %v6667_v48 = vpop.eup %6666  ;;  %6684 = vrcp.f32 %v3294_v52  ;;  %v3293_v3 = vadd.f32 %v6665_v33, %v6663_v11  ;;  %v3233_v21 = vmul.f32 1.442695, %v3203_v62  ;;  %6047 = vmatmul.mubr.msk.f32.gmra.mrb[94].mxu1 %vm3333_vm1, %v3324_v37 }
 0x99b   : > { %v6669_v6 = vpop.eup %6668  ;;  %6686 = vpow2.f32 %v3283_v39  ;;  %v3281_v36 = vmul.f32 1.442695, %v3251_v13  ;;  %6073 = vmatmul.mubr.msk.f32.gmra.mrb[94].mxu0 %vm3333_vm1, %v3534_v44  ;;  %6096 = vmatpush3.bf16.msra.mxu1 %v6438_v34 }
 0x99c   : > { %v6671_v5 = vpop.eup %6670  ;;  %6688 = vrcp.f32 %v3293_v3  ;;  %v3296_v29 = vadd.f32 %v6669_v6, %v6667_v48  ;;  %v6439_v3 = vld [vmem:[%s7332_s15 + $0x168] sm:$0xff]  }
 0x99d   : > { %v6673_v58 = vpop.eup %6672  ;;  %6690 = vpow2.f32 %v3233_v21  ;;  %6097 = vmatprep.subr.bf16.mxu1 %v6439_v3  ;;  %v6440_v21 = vld [vmem:[%s7332_s15 + $0x170] sm:$0xff]  }
 0x99e   : > { %v6675_v22 = vpop.eup %6674  ;;  %6692 = vrcp.f32 %v3296_v29  ;;  %v3295_v4 = vadd.f32 %v6673_v58, %v6671_v5 }
 0x99f   : > { %v6677_v49 = vpop.eup %6676  ;;  %6694 = vpow2.f32 %v3281_v36  ;;  %6098 = vmatpush3.bf16.msra.mxu1 %v6439_v3  ;;  %v8521_v36 = vld [vmem:[%s7353_s16 + $0x4] ss:$0 sm:$0xff] }
 0x9a0   : > { %6696 = vrcp.f32 %v3295_v4  ;;  %v3298_v42 = vadd.f32 %v6677_v49, %v6675_v22  ;;  %6099 = vmatprep.subr.bf16.mxu1 %v6440_v21  ;;  %v2646_v29 = vadd.f32 %v8521_v36, %v8366_v51  ;;  %v2651_v51 = vadd.f32 %v8358_v54, %v8521_v36 }
 0x9a1   : > { %v6679_v55 = vpop.eup %6678  ;;  %v2759_v54 = vadd.f32 %v8521_v36, %v8296_v16 }
 0x9a2   : > { %v6681_v53 = vpop.eup %6680  ;;  %6698 = vrcp.f32 %v3298_v42 }
 0x9a3   : > { %v6683_v19 = vpop.eup %6682  ;;  %v3297_v17 = vadd.f32 %v6681_v53, %v6679_v55  ;;  %6100 = vmatpush3.bf16.msra.mxu1 %v6440_v21 }
 0x9a4   : > { %v6685_v59 = vpop.eup %6684 }
 0x9a5   : > { %v6687_v38 = vpop.eup %6686  ;;  %6700 = vrcp.f32 %v3297_v17  ;;  %v3326_v2 = vmul.f32 %v6685_v59, %v6659_v8  ;;  %v3536_v30 = vmul.f32 %v6685_v59, %v6661_v61 }
 0x9a6   : > { %v6689_v50 = vpop.eup %6688  ;;  %v3300_v9 = vadd.f32 %v6687_v38, %v6683_v19 }
 0x9a7   : > { %v6691_v10 = vpop.eup %6690  ;;  %v3325_v24 = vmul.f32 %v6689_v50, %v6663_v11  ;;  %v3535_v56 = vmul.f32 %v6689_v50, %v6665_v33 }
 0x9a8   : > { %v6693_v34 = vpop.eup %6692  ;;  %6702 = vrcp.f32 %v3300_v9 }
 0x9a9   : > { %v6695_v26 = vpop.eup %6694  ;;  %6049 = vmatprep.mubr.msk.f32.mxu1 %vm3333_vm1, %v3325_v24  ;;  %6075 = vmatprep.mubr.msk.f32.mxu0 %vm3333_vm1, %v3535_v56  ;;  %v3328_v7 = vmul.f32 %v6693_v34, %v6667_v48  ;;  %v3538_v18 = vmul.f32 %v6693_v34, %v6669_v6  ;;  %v6441_v6 = vld [vmem:[%s7332_s15 + $0x178] sm:$0xff]   ;;  %v2748_v24 = vadd.f32 %v8282_v15, %v8521_v36 }
 0x9aa   : > { %v6697_v41 = vpop.eup %6696  ;;  %v3299_v1 = vadd.f32 %v6695_v26, %v6691_v10  ;;  %6050 = vmatmul.mubr.msk.f32.gmra.mrb[96].mxu1 %vm3333_vm1, %v3326_v2  ;;  %6076 = vmatmul.mubr.msk.f32.gmra.mrb[96].mxu0 %vm3333_vm1, %v3536_v30 }
 0x9ab   : > { %v3327_v8 = vmul.f32 %v6697_v41, %v6671_v5  ;;  %v3537_v43 = vmul.f32 %v6697_v41, %v6673_v58  ;;  %6101 = vmatprep.subr.bf16.mxu1 %v6441_v6  ;;  %v2743_v5 = vadd.f32 %v8521_v36, %v8288_v0  ;;  %v2740_v58 = vadd.f32 %v8521_v36, %v8284_v35 }
 0x9ac   : > { %v6699_v61 = vpop.eup %6698  ;;  %6704 = vrcp.f32 %v3299_v1  ;;  %6102 = vmatpush3.bf16.msra.mxu1 %v6441_v6  ;;  %v2654_v0 = vadd.f32 %v8363_v57, %v8521_v36  ;;  %v2756_v41 = vadd.f32 %v8521_v36, %v8292_v45  ;;  %v2767_v45 = vadd.f32 %v8294_v27, %v8521_v36 }
 0x9ad   : > { %6052 = vmatprep.mubr.msk.f32.mxu1 %vm3333_vm1, %v3327_v8  ;;  %6078 = vmatprep.mubr.msk.f32.mxu0 %vm3333_vm1, %v3537_v43  ;;  %v3330_v40 = vmul.f32 %v6699_v61, %v6675_v22  ;;  %v3540_v46 = vmul.f32 %v6699_v61, %v6677_v49  ;;  %v2643_v22 = vadd.f32 %v8521_v36, %v8361_v63 }
 0x9ae   : > { %6053 = vmatmul.mubr.msk.f32.gmra.mrb[98].mxu1 %vm3333_vm1, %v3328_v7  ;;  %6079 = vmatmul.mubr.msk.f32.gmra.mrb[98].mxu0 %vm3333_vm1, %v3538_v18  ;;  %v2662_v7 = vadd.f32 %v8521_v36, %v8378_v23  ;;  %v2670_v23 = vadd.f32 %v8376_v31, %v8521_v36 }
 0x9af   : > { %v6701_v37 = vpop.eup %6700 }
 0x9b0   : > { %v3329_v11 = vmul.f32 %v6701_v37, %v6679_v55  ;;  %v3539_v52 = vmul.f32 %v6701_v37, %v6681_v53 }
 0x9b2   : > { %v6703_v39 = vpop.eup %6702  ;;  %6055 = vmatprep.mubr.msk.f32.mxu1 %vm3333_vm1, %v3329_v11  ;;  %6081 = vmatprep.mubr.msk.f32.mxu0 %vm3333_vm1, %v3539_v52 }
 0x9b3   : > { %6056 = vmatmul.mubr.msk.f32.gmra.mrb[100].mxu1 %vm3333_vm1, %v3330_v40  ;;  %6082 = vmatmul.mubr.msk.f32.gmra.mrb[100].mxu0 %vm3333_vm1, %v3540_v46  ;;  %v3332_v62 = vmul.f32 %v6703_v39, %v6683_v19  ;;  %v3542_v33 = vmul.f32 %v6703_v39, %v6687_v38 }
 0x9b6   : > { %v6705_v13 = vpop.eup %6704 }
 0x9b7   : > { %v3331_v44 = vmul.f32 %v6705_v13, %v6691_v10  ;;  %v3541_v48 = vmul.f32 %v6705_v13, %v6695_v26  ;;  %v2751_v10 = vadd.f32 %v8286_v14, %v8521_v36  ;;  %v2659_v14 = vadd.f32 %v8521_v36, %v8373_v28 }
 0x9b8   : > { %v2667_v28 = vadd.f32 %v8370_v47, %v8521_v36  ;;  %v2775_v47 = vadd.f32 %v8521_v36, %v8304_v25 }
 0x9b9   : > { %6058 = vmatprep.mubr.msk.f32.mxu1 %vm3333_vm1, %v3331_v44  ;;  %6084 = vmatprep.mubr.msk.f32.mxu0 %vm3333_vm1, %v3541_v48 }
 0x9ba   : > { %6059 = vmatmul.mubr.msk.f32.gmra.mrb[102].mxu1 %vm3333_vm1, %v3332_v62  ;;  %6085 = vmatmul.mubr.msk.f32.gmra.mrb[102].mxu0 %vm3333_vm1, %v3542_v33  ;;  %v2764_v33 = vadd.f32 %v8290_v20, %v8521_v36  ;;  %v2772_v20 = vadd.f32 %v8521_v36, %v8300_v12  ;;  %v9440_v12 = vld [vmem:[#allocation36_spill] sm:$0xff] }
 0xa5d   : > { %v6039_v4 = vpop.f32.mrb[88].mxu1  ;;  %v6065_v49 = vpop.f32.mrb[88].mxu0 }
 0xa5e   : > { %v3737_v42 = vmul.f32 %v6039_v4, %v2646_v29  ;;  %v3753_v55 = vmul.f32 %v6065_v49, %v2743_v5  ;;  %v3448_v53 = vpop.f32.mrb[89].mxu1  ;;  %v3657_v19 = vpop.f32.mrb[89].mxu0  ;;  %v2675_v4 = vadd.f32 %v8521_v36, %v8385_v32  ;;  %v9441_v32 = vld [vmem:[#allocation42_spill] sm:$0xff] }
 0xa5f   : > { %v3736_v17 = vmul.f32 %v3448_v53, %v2643_v22  ;;  %v3752_v59 = vmul.f32 %v3657_v19, %v2740_v58  ;;  %v2678_v22 = vadd.f32 %v8521_v36, %v8390_v60 }
 0xa60   : > { %v3769_v38 = vadd.f32 %v3753_v55, %v3737_v42 }
 0xa61   : > { %v3768_v2 = vadd.f32 %v3752_v59, %v3736_v17  ;;  %v6042_v35 = vpop.f32.mrb[90].mxu1 }
 0xa62   : > { %v3739_v30 = vmul.f32 %v6042_v35, %v2654_v0  ;;  %v3458_v50 = vpop.f32.mrb[91].mxu1  ;;  %v2780_v35 = vadd.f32 %v9440_v12, %v8521_v36 }
 0xa63   : > { %v3738_v63 = vmul.f32 %v3458_v50, %v2651_v51  ;;  %v3784_v9 = vpack.c.bf16 %v3769_v38, %v3768_v2  ;;  %v9438_v38 = vld [vmem:[#allocation37_spill] sm:$0xff]  ;;  %v9439_v51 = vld [vmem:[#allocation43_spill] sm:$0xff] }
 0xa64   : > { %v2783_v25 = vadd.f32 %v9438_v38, %v8521_v36  ;;  %v2686_v60 = vadd.f32 %v9439_v51, %v8521_v36 }
 0xa65   : > { %v6068_v56 = vpop.f32.mrb[90].mxu0  ;;  %6103 = vmatprep.mubr.bf16.mxu1 %v3784_v9 }
 0xa66   : > { %v3755_v34 = vmul.f32 %v6068_v56, %v2751_v10  ;;  %v3667_v57 = vpop.f32.mrb[91].mxu0 }
 0xa67   : > { %v3754_v26 = vmul.f32 %v3667_v57, %v2748_v24 }
 0xa68   : > { %v3771_v18 = vadd.f32 %v3755_v34, %v3739_v30  ;;  %v2683_v30 = vadd.f32 %v9441_v32, %v8521_v36  ;;  %v9451_v32 = vld [vmem:[#allocation21_spill] sm:$0xff] }
 0xa69   : > { %v3770_v1 = vadd.f32 %v3754_v26, %v3738_v63  ;;  %v6045_v15 = vpop.f32.mrb[92].mxu1  ;;  %v6071_v8 = vpop.f32.mrb[92].mxu0 }
 0xa6a   : > { %v3741_v43 = vmul.f32 %v6045_v15, %v2662_v7  ;;  %v3757_v61 = vmul.f32 %v6071_v8, %v2759_v54  ;;  %v3468_v40 = vpop.f32.mrb[93].mxu1  ;;  %v3677_v46 = vpop.f32.mrb[93].mxu0  ;;  %v9444_v8 = vld [vmem:[#allocation39_spill] sm:$0xff] }
 0xa6b   : > { %v3785_v37 = vpack.c.bf16 %v3771_v18, %v3770_v1  ;;  %v3740_v11 = vmul.f32 %v3468_v40, %v2659_v14  ;;  %v3756_v16 = vmul.f32 %v3677_v46, %v2756_v41  ;;  %v9442_v18 = vld [vmem:[#allocation41_spill] sm:$0xff]  ;;  %v9443_v14 = vld [vmem:[#allocation47_spill] sm:$0xff] }
 0xa6c   : > { %v3773_v52 = vadd.f32 %v3757_v61, %v3741_v43  ;;  %v2791_v41 = vadd.f32 %v8521_v36, %v9442_v18  ;;  %v2694_v1 = vadd.f32 %v8521_v36, %v9443_v14  ;;  %v2788_v43 = vadd.f32 %v8521_v36, %v9444_v8  ;;  %v9445_v61 = vld [vmem:[#allocation45_spill] sm:$0xff]  ;;  %v9454_v18 = vld [vmem:[#allocation24_spill] sm:$0xff]  ;;  %v9456_v8 = vld [vmem:[#allocation26_spill] sm:$0xff] }
 0xa6d   : > { %v3772_v39 = vadd.f32 %v3756_v16, %v3740_v11  ;;  %v6048_v62 = vpop.f32.mrb[94].mxu1  ;;  %6104 = vmatmul.mubr.bf16.vlgmr.msra.gmra.mrb[104].mxu1 %v3785_v37  ;;  %v2691_v40 = vadd.f32 %v8521_v36, %v9445_v61  ;;  %v9457_v61 = vld [vmem:[#allocation27_spill] sm:$0xff] }
 0xa6e   : > { %v3743_v13 = vmul.f32 %v6048_v62, %v2670_v23  ;;  %v6074_v44 = vpop.f32.mrb[94].mxu0  ;;  %v3478_v48 = vpop.f32.mrb[95].mxu1 }
 0xa6f   : > { %v3759_v3 = vmul.f32 %v6074_v44, %v2767_v45  ;;  %v3742_v21 = vmul.f32 %v3478_v48, %v2667_v28  ;;  %v3687_v6 = vpop.f32.mrb[95].mxu0  ;;  %v3786_v31 = vpack.c.bf16 %v3773_v52, %v3772_v39  ;;  %v9447_v48 = vld [vmem:[#allocation46_spill] sm:$0xff] }
 0xa70   : > { %v3758_v5 = vmul.f32 %v3687_v6, %v2764_v33  ;;  %v9448_v6 = vld [vmem:[#allocation38_spill] sm:$0xff] }
 0xa71   : > { %v3775_v29 = vadd.f32 %v3759_v3, %v3743_v13  ;;  %6107 = vmatprep.mubr.bf16.mxu1 %v3786_v31  ;;  %v9446_v13 = vld [vmem:[#allocation40_spill] sm:$0xff]  ;;  %v2702_v3 = vadd.f32 %v9447_v48, %v8521_v36  ;;  %v2796_v31 = vadd.f32 %v9448_v6, %v8521_v36 }
 0xa72   : > { %v3774_v27 = vadd.f32 %v3758_v5, %v3742_v21  ;;  %v2799_v44 = vadd.f32 %v9446_v13, %v8521_v36  ;;  %v9449_v5 = vld [vmem:[#allocation44_spill] sm:$0xff] }
 0xa74   : > { %v3787_v58 = vpack.c.bf16 %v3775_v29, %v3774_v27  ;;  %v2699_v29 = vadd.f32 %v9449_v5, %v8521_v36 }
 0xa76   : > { %6108 = vmatmul.mubr.bf16.gmra.mrb[108].mxu1 %v3787_v58 }
 0xa7d   : > { %v6051_v49 = vpop.f32.mrb[96].mxu1  ;;  %v6077_v42 = vpop.f32.mrb[96].mxu0 }
 0xa7e   : > { %v3745_v55 = vmul.f32 %v6051_v49, %v2678_v22  ;;  %v3761_v53 = vmul.f32 %v6077_v42, %v2775_v47  ;;  %v3488_v19 = vpop.f32.mrb[97].mxu1  ;;  %v3697_v17 = vpop.f32.mrb[97].mxu0 }
 0xa7f   : > { %v3744_v59 = vmul.f32 %v3488_v19, %v2675_v4  ;;  %v3760_v0 = vmul.f32 %v3697_v17, %v2772_v20  ;;  %v5276_v17 = vld [vmem:[%s7353_s16 + $0x5] ss:$0 sm:$0xff] }
 0xa80   : > { %v3777_v2 = vadd.f32 %v3761_v53, %v3745_v55 }
 0xa81   : > { %v3776_v50 = vadd.f32 %v3760_v0, %v3744_v59  ;;  %v6054_v63 = vpop.f32.mrb[98].mxu1  ;;  %v6080_v9 = vpop.f32.mrb[98].mxu0 }
 0xa82   : > { %v3747_v10 = vmul.f32 %v6054_v63, %v2686_v60  ;;  %v3763_v24 = vmul.f32 %v6080_v9, %v2783_v25  ;;  %v3498_v56 = vpop.f32.mrb[99].mxu1  ;;  %v3707_v34 = vpop.f32.mrb[99].mxu0 }
 0xa83   : > { %v3746_v57 = vmul.f32 %v3498_v56, %v2683_v30  ;;  %v3762_v26 = vmul.f32 %v3707_v34, %v2780_v35  ;;  %v3788_v54 = vpack.c.bf16 %v3777_v2, %v3776_v50  ;;  %v9450_v2 = vld [vmem:[#allocation20_spill] sm:$0xff]  ;;  %v9452_v50 = vld [vmem:[#allocation22_spill] sm:$0xff] }
 0xa84   : > { %v3779_v7 = vadd.f32 %v3763_v24, %v3747_v10  ;;  %v9453_v24 = vld [vmem:[#allocation23_spill] sm:$0xff] }
 0xa85   : > { %v3778_v15 = vadd.f32 %v3762_v26, %v3746_v57  ;;  %6111 = vmatprep.mubr.bf16.mxu1 %v3788_v54 }
 0xa86   : > { %v6057_v46 = vpop.f32.mrb[100].mxu1  ;;  %v6083_v37 = vpop.f32.mrb[100].mxu0 }
 0xa87   : > { %v3749_v11 = vmul.f32 %v6057_v46, %v2694_v1  ;;  %v3765_v16 = vmul.f32 %v6083_v37, %v2791_v41  ;;  %v3508_v23 = vpop.f32.mrb[101].mxu1  ;;  %v3717_v52 = vpop.f32.mrb[101].mxu0  ;;  %v3789_v45 = vpack.c.bf16 %v3779_v7, %v3778_v15  ;;  %v9455_v1 = vld [vmem:[#allocation25_spill] sm:$0xff] }
 0xa88   : > { %v3748_v28 = vmul.f32 %v3508_v23, %v2691_v40  ;;  %v3764_v39 = vmul.f32 %v3717_v52, %v2788_v43 }
 0xa89   : > { %v3781_v62 = vadd.f32 %v3765_v16, %v3749_v11  ;;  %6112 = vmatmul.mubr.bf16.gmra.mrb[112].mxu1 %v3789_v45 }
 0xa8a   : > { %v3780_v33 = vadd.f32 %v3764_v39, %v3748_v28  ;;  %v9458_v28 = vld [vmem:[#allocation28_spill] sm:$0xff] }
 0xa8c   : > { %v3790_v21 = vpack.c.bf16 %v3781_v62, %v3780_v33  ;;  %v9459_v33 = vld [vmem:[#allocation29_spill] sm:$0xff] }
 0xa8d   : > { %v6060_v27 = vpop.f32.mrb[102].mxu1  ;;  %v6086_v58 = vpop.f32.mrb[102].mxu0 }
 0xa8e   : > { %v3751_v47 = vmul.f32 %v6060_v27, %v2702_v3  ;;  %v3767_v22 = vmul.f32 %v6086_v58, %v2799_v44  ;;  %v3518_v20 = vpop.f32.mrb[103].mxu1  ;;  %v3727_v4 = vpop.f32.mrb[103].mxu0  ;;  %6115 = vmatprep.mubr.bf16.mxu1 %v3790_v21  ;;  %v9460_v44 = vld [vmem:[#allocation30_spill] sm:$0xff]  ;;  %v9461_v3 = vld [vmem:[#allocation31_spill] sm:$0xff] }
 0xa8f   : > { %v3750_v49 = vmul.f32 %v3518_v20, %v2699_v29  ;;  %v3766_v42 = vmul.f32 %v3727_v4, %v2796_v31 }
 0xa90   : > { %v3783_v55 = vadd.f32 %v3767_v22, %v3751_v47  ;;  %v9462_v22 = vld [vmem:[#allocation32_spill] sm:$0xff] }
 0xa91   : > { %v3782_v53 = vadd.f32 %v3766_v42, %v3750_v49  ;;  %v9463_v49 = vld [vmem:[#allocation33_spill] sm:$0xff] }
 0xa93   : > { %v3791_v19 = vpack.c.bf16 %v3783_v55, %v3782_v53  ;;  %v9464_v55 = vld [vmem:[#allocation34_spill] sm:$0xff] }
 0xa95   : > { %6116 = vmatmul.mubr.bf16.gmra.mrb[116].mxu1 %v3791_v19  ;;  %v9465_v19 = vld [vmem:[#allocation35_spill] sm:$0xff] }
 0xb40   : > { %v6105_v59 = vpop.f32.mrb[104].mxu1 }
 0xb41   : > { %v3899_v0 = vpop.f32.mrb[105].mxu1  ;;  %v3908_v36 = vadd.f32 %v6105_v59, %v5276_v17 }
 0xb42   : > { %v3900_v38 = vadd.f32 %v5276_v17, %v3899_v0  ;;  %v6106_v25 = vpop.f32.mrb[106].mxu1  ;;  %v6442_v0 = vld [vmem:[%s7332_s15 + $0x180] sm:$0xff]  }
 0xb43   : > { %v3902_v51 = vpop.f32.mrb[107].mxu1  ;;  %v3911_v35 = vadd.f32 %v6106_v25, %v5276_v17  ;;  %v8597_v63 = vadd.f32 %v3908_v36, %v9452_v50  ;;  %6119 = vmatprep.subr.bf16.mxu0 %v6442_v0 }
 0xb44   : > { %v3903_v60 = vadd.f32 %v5276_v17, %v3902_v51  ;;  %v8589_v12 = vadd.f32 %v3900_v38, %v9450_v2  ;;  %6120 = vmatpush3.bf16.msra.mxu0 %v6442_v0 }
 0xb45   : > { %v8601_v56 = vadd.f32 %v3911_v35, %v9453_v24 }
 0xb46   : > { %3978 = vadd.xlane.f32.xlu0 %v8589_v12  ;;  %v8593_v30 = vadd.f32 %v3903_v60, %v9451_v32 }
 0xb48   : > { %3980 = vadd.xlane.f32.xlu1 %v8593_v30 }
 0xb49   : > { %v6109_v9 = vpop.f32.mrb[108].mxu1 }
 0xb4a   : > { %v3915_v10 = vpop.f32.mrb[109].mxu1  ;;  %3982 = vadd.xlane.f32.xlu0 %v8597_v63  ;;  %v3924_v54 = vadd.f32 %v6109_v9, %v5276_v17 }
 0xb4b   : > { %v3916_v34 = vadd.f32 %v5276_v17, %v3915_v10  ;;  %v6110_v57 = vpop.f32.mrb[110].mxu1 }
 0xb4c   : > { %v3918_v26 = vpop.f32.mrb[111].mxu1  ;;  %3984 = vadd.xlane.f32.xlu1 %v8601_v56  ;;  %v3927_v14 = vadd.f32 %v6110_v57, %v5276_v17  ;;  %v8613_v43 = vadd.f32 %v3924_v54, %v9456_v8 }
 0xb4d   : > { %v3919_v7 = vadd.f32 %v5276_v17, %v3918_v26  ;;  %v8605_v41 = vadd.f32 %v3916_v34, %v9454_v18 }
 0xb4e   : > { %v8617_v40 = vadd.f32 %v3927_v14, %v9457_v61 }
 0xb4f   : > { %3986 = vadd.xlane.f32.xlu0 %v8605_v41  ;;  %v8609_v15 = vadd.f32 %v3919_v7, %v9455_v1 }
 0xb51   : > { %3988 = vadd.xlane.f32.xlu1 %v8609_v15 }
 0xb53   : > { %3990 = vadd.xlane.f32.xlu0 %v8613_v43 }
 0xb55   : > { %3992 = vadd.xlane.f32.xlu1 %v8617_v40 }
 0xb5c   : > { %v6113_v46 = vpop.f32.mrb[112].mxu1 }
 0xb5d   : > { %v3931_v37 = vpop.f32.mrb[113].mxu1  ;;  %v3940_v52 = vadd.f32 %v6113_v46, %v5276_v17 }
 0xb5e   : > { %v3932_v11 = vadd.f32 %v5276_v17, %v3931_v37  ;;  %v6114_v16 = vpop.f32.mrb[114].mxu1 }
 0xb5f   : > { %v3934_v23 = vpop.f32.mrb[115].mxu1  ;;  %v3943_v62 = vadd.f32 %v6114_v16, %v5276_v17  ;;  %v8629_v48 = vadd.f32 %v3940_v52, %v9460_v44  ;;  %v6444_v16 = vld [vmem:[%s7332_s15 + $0x190] sm:$0xff]  }
 0xb60   : > { %v3935_v45 = vadd.f32 %v5276_v17, %v3934_v23  ;;  %v8621_v39 = vadd.f32 %v3932_v11, %v9458_v28 }
 0xb61   : > { %v8633_v21 = vadd.f32 %v3943_v62, %v9461_v3  ;;  %v6445_v62 = vld [vmem:[%s7332_s15 + $0x198] sm:$0xff]  }
 0xb62   : > { %3994 = vadd.xlane.f32.xlu0 %v8621_v39  ;;  %v8625_v13 = vadd.f32 %v3935_v45, %v9459_v33 }
 0xb64   : > { %3996 = vadd.xlane.f32.xlu1 %v8625_v13 }
 0xb66   : > { %3998 = vadd.xlane.f32.xlu0 %v8629_v48 }
 0xb68   : > { %v6117_v6 = vpop.f32.mrb[116].mxu1  ;;  %4000 = vadd.xlane.f32.xlu1 %v8633_v21 }
 0xb69   : > { %v3947_v31 = vpop.f32.mrb[117].mxu1  ;;  %v3956_v58 = vadd.f32 %v6117_v6, %v5276_v17 }
 0xb6a   : > { %v3948_v5 = vadd.f32 %v5276_v17, %v3947_v31  ;;  %v6118_v29 = vpop.f32.mrb[118].mxu1 }
 0xb6b   : > { %v3950_v27 = vpop.f32.mrb[119].mxu1  ;;  %v3959_v4 = vadd.f32 %v6118_v29, %v5276_v17  ;;  %v8645_v53 = vadd.f32 %v3956_v58, %v9464_v55 }
 0xb6c   : > { %v3951_v47 = vadd.f32 %v5276_v17, %v3950_v27  ;;  %v8637_v20 = vadd.f32 %v3948_v5, %v9462_v22  ;;  %v6446_v27 = vld [vmem:[%s7332_s15 + $0x1a0] sm:$0xff]  }
 0xb6d   : > { %v8649_v59 = vadd.f32 %v3959_v4, %v9465_v19  ;;  %v6448_v19 = vld [vmem:[%s7332_s15 + $0x1b0] sm:$0xff]  }
 0xb6e   : > { %4002 = vadd.xlane.f32.xlu0 %v8637_v20  ;;  %v8641_v42 = vadd.f32 %v3951_v47, %v9463_v49  ;;  %v6447_v47 = vld [vmem:[%s7332_s15 + $0x1a8] sm:$0xff]  }
 0xb70   : > { %4004 = vadd.xlane.f32.xlu1 %v8641_v42 }
 0xb72   : > { %4006 = vadd.xlane.f32.xlu0 %v8645_v53 }
 0xb74   : > { %4008 = vadd.xlane.f32.xlu1 %v8649_v59 }
 0xbd3   : > { %v3979_v17 = vpop.xlane.xlu0 %3978 }
 0xbd4   : > { %v4010_v38 = vmul.f32 0.0078125, %v3979_v17  ;;  %v6449_v17 = vld [vmem:[%s7332_s15 + $0x1b8] sm:$0xff]  }
 0xbd5   : > { %v3981_v25 = vpop.xlane.xlu1 %3980 }
 0xbd6   : > { %v8654_v51 = vsub.f32 %v8589_v12, %v4010_v38  ;;  %v4011_v36 = vmul.f32 0.0078125, %v3981_v25 }
 0xbd7   : > { %v3983_v60 = vpop.xlane.xlu0 %3982 }
 0xbd8   : > { %v8657_v2 = vsub.f32 %v8593_v30, %v4011_v36  ;;  %v4012_v35 = vmul.f32 0.0078125, %v3983_v60  ;;  %v4042_v32 = vmul.f32 %v8654_v51, %v8654_v51 }
 0xbd9   : > { %v3985_v50 = vpop.xlane.xlu1 %3984 }
 0xbda   : > { %v8662_v9 = vsub.f32 %v8597_v63, %v4012_v35  ;;  %v4013_v10 = vmul.f32 0.0078125, %v3985_v50  ;;  %4058 = vadd.xlane.f32.xlu0 %v4042_v32  ;;  %v4043_v24 = vmul.f32 %v8657_v2, %v8657_v2 }
 0xbdc   : > { %v8667_v12 = vsub.f32 %v8601_v56, %v4013_v10  ;;  %v3987_v34 = vpop.xlane.xlu0 %3986  ;;  %4060 = vadd.xlane.f32.xlu1 %v4043_v24  ;;  %v4044_v30 = vmul.f32 %v8662_v9, %v8662_v9 }
 0xbdd   : > { %v4014_v57 = vmul.f32 0.0078125, %v3987_v34 }
 0xbde   : > { %v3989_v26 = vpop.xlane.xlu1 %3988  ;;  %4062 = vadd.xlane.f32.xlu0 %v4044_v30  ;;  %v4045_v63 = vmul.f32 %v8667_v12, %v8667_v12 }
 0xbdf   : > { %v8674_v54 = vsub.f32 %v8605_v41, %v4014_v57  ;;  %v4015_v7 = vmul.f32 0.0078125, %v3989_v26 }
 0xbe0   : > { %v3991_v18 = vpop.xlane.xlu0 %3990  ;;  %4064 = vadd.xlane.f32.xlu1 %v4045_v63 }
 0xbe1   : > { %v8677_v56 = vsub.f32 %v8609_v15, %v4015_v7  ;;  %v4016_v14 = vmul.f32 0.0078125, %v3991_v18  ;;  %v4046_v1 = vmul.f32 %v8674_v54, %v8674_v54 }
 0xbe2   : > { %v3993_v8 = vpop.xlane.xlu1 %3992 }
 0xbe3   : > { %v8682_v61 = vsub.f32 %v8613_v43, %v4016_v14  ;;  %v4017_v46 = vmul.f32 0.0078125, %v3993_v8  ;;  %4066 = vadd.xlane.f32.xlu0 %v4046_v1  ;;  %v4047_v41 = vmul.f32 %v8677_v56, %v8677_v56  ;;  %v6443_v43 = vld [vmem:[%s7332_s15 + $0x188] sm:$0xff]   ;;  %s9466_s15 = sld [smem:[#allocation58_spill]] (!%p5319_p8) }
 0xbe4   : > { %6121 = vmatprep.subr.bf16.mxu0 %v6443_v43 }
 0xbe5   : > { %v8687_v37 = vsub.f32 %v8617_v40, %v4017_v46  ;;  %4068 = vadd.xlane.f32.xlu1 %v4047_v41  ;;  %v4048_v15 = vmul.f32 %v8682_v61, %v8682_v61  ;;  %6122 = vmatpush3.bf16.msra.mxu0 %v6443_v43 }
 0xbe6   : > { %6123 = vmatprep.subr.bf16.mxu0 %v6444_v16 }
 0xbe7   : > { %4070 = vadd.xlane.f32.xlu0 %v4048_v15  ;;  %v4049_v11 = vmul.f32 %v8687_v37, %v8687_v37 }
 0xbe9   : > { %4072 = vadd.xlane.f32.xlu1 %v4049_v11  ;;  %6124 = vmatpush3.bf16.msra.mxu0 %v6444_v16 }
 0xbea   : > { %6125 = vmatprep.subr.bf16.mxu0 %v6445_v62 }
 0xbed   : > { %6126 = vmatpush3.bf16.msra.mxu0 %v6445_v62 }
 0xbee   : > { %6127 = vmatprep.subr.bf16.mxu0 %v6446_v27 }
 0xbef   : > { %v3995_v23 = vpop.xlane.xlu0 %3994 }
 0xbf0   : > { %v4018_v52 = vmul.f32 0.0078125, %v3995_v23 }
 0xbf1   : > { %v3997_v45 = vpop.xlane.xlu1 %3996  ;;  %6128 = vmatpush3.bf16.msra.mxu0 %v6446_v27 }
 0xbf2   : > { %v8696_v40 = vsub.f32 %v8621_v39, %v4018_v52  ;;  %v4019_v28 = vmul.f32 0.0078125, %v3997_v45  ;;  %6129 = vmatprep.subr.bf16.mxu0 %v6447_v47  ;;  %v8741_v45 = vld [vmem:[%s7358_s10 + $0x2] ss:$0 sm:$0xff] }
 0xbf3   : > { %v3999_v33 = vpop.xlane.xlu0 %3998 }
 0xbf4   : > { %v8700_v44 = vsub.f32 %v8625_v13, %v4019_v28  ;;  %v4020_v3 = vmul.f32 0.0078125, %v3999_v33  ;;  %v4050_v6 = vmul.f32 %v8696_v40, %v8696_v40 }
 0xbf5   : > { %v4001_v31 = vpop.xlane.xlu1 %4000  ;;  %6130 = vmatpush3.bf16.msra.mxu0 %v6447_v47 }
 0xbf6   : > { %v8705_v5 = vsub.f32 %v8629_v48, %v4020_v3  ;;  %v4021_v29 = vmul.f32 0.0078125, %v4001_v31  ;;  %4074 = vadd.xlane.f32.xlu0 %v4050_v6  ;;  %v4051_v39 = vmul.f32 %v8700_v44, %v8700_v44  ;;  %6131 = vmatprep.subr.bf16.mxu0 %v6448_v19 }
 0xbf8   : > { %v8711_v13 = vsub.f32 %v8633_v21, %v4021_v29  ;;  %4076 = vadd.xlane.f32.xlu1 %v4051_v39  ;;  %v4052_v58 = vmul.f32 %v8705_v5, %v8705_v5 }
 0xbf9   : > { %6132 = vmatpush3.bf16.msra.mxu0 %v6448_v19 }
 0xbfa   : > { %4078 = vadd.xlane.f32.xlu0 %v4052_v58  ;;  %v4053_v48 = vmul.f32 %v8711_v13, %v8711_v13  ;;  %6133 = vmatprep.subr.bf16.mxu0 %v6449_v17  ;;  %v8747_v58 = vld [vmem:[%s7358_s10 + $0x3] ss:$0 sm:$0xff] }
 0xbfb   : > { %v4003_v22 = vpop.xlane.xlu0 %4002 }
 0xbfc   : > { %v4022_v4 = vmul.f32 0.0078125, %v4003_v22  ;;  %4080 = vadd.xlane.f32.xlu1 %v4053_v48 }
 0xbfd   : > { %v4005_v49 = vpop.xlane.xlu1 %4004  ;;  %6134 = vmatpush3.bf16.msra.mxu0 %v6449_v17 }
 0xbfe   : > { %v8719_v21 = vsub.f32 %v8637_v20, %v4022_v4  ;;  %v4023_v55 = vmul.f32 0.0078125, %v4005_v49 }
 0xbff   : > { %v4007_v0 = vpop.xlane.xlu0 %4006 }
 0xc00   : > { %v8724_v38 = vsub.f32 %v8641_v42, %v4023_v55  ;;  %v4024_v25 = vmul.f32 0.0078125, %v4007_v0  ;;  %v4054_v36 = vmul.f32 %v8719_v21, %v8719_v21 }
 0xc01   : > { %v4009_v60 = vpop.xlane.xlu1 %4008 }
 0xc02   : > { %v8729_v35 = vsub.f32 %v8645_v53, %v4024_v25  ;;  %v4025_v32 = vmul.f32 0.0078125, %v4009_v60  ;;  %4082 = vadd.xlane.f32.xlu0 %v4054_v36  ;;  %v4055_v20 = vmul.f32 %v8724_v38, %v8724_v38 }
 0xc04   : > { %v8734_v50 = vsub.f32 %v8649_v59, %v4025_v32  ;;  %4084 = vadd.xlane.f32.xlu1 %v4055_v20  ;;  %v4056_v42 = vmul.f32 %v8729_v35, %v8729_v35 }
 0xc06   : > { %4086 = vadd.xlane.f32.xlu0 %v4056_v42  ;;  %v4057_v10 = vmul.f32 %v8734_v50, %v8734_v50 }
 0xc08   : > { %4088 = vadd.xlane.f32.xlu1 %v4057_v10 }
 0xc67   : > { %v4059_v53 = vpop.xlane.xlu0 %4058 }
 0xc68   : > { %v4090_v24 = vmul.f32 0.0078125, %v4059_v53 }
 0xc69   : > { %v4061_v34 = vpop.xlane.xlu1 %4060 }
 0xc6a   : > { %v4106_v30 = vadd.f32 1e-05, %v4090_v24  ;;  %v4091_v57 = vmul.f32 0.0078125, %v4061_v34 }
 0xc6b   : > { %v4063_v26 = vpop.xlane.xlu0 %4062 }
 0xc6c   : > { %6706 = vrsqrt.f32 %v4106_v30  ;;  %v4107_v63 = vadd.f32 1e-05, %v4091_v57  ;;  %v4092_v59 = vmul.f32 0.0078125, %v4063_v26 }
 0xc6d   : > { %v4065_v7 = vpop.xlane.xlu1 %4064 }
 0xc6e   : > { %6708 = vrsqrt.f32 %v4107_v63  ;;  %v4108_v18 = vadd.f32 1e-05, %v4092_v59  ;;  %v4093_v14 = vmul.f32 0.0078125, %v4065_v7 }
 0xc70   : > { %6710 = vrsqrt.f32 %v4108_v18  ;;  %v4109_v1 = vadd.f32 1e-05, %v4093_v14  ;;  %v4067_v8 = vpop.xlane.xlu0 %4066 }
 0xc71   : > { %v4094_v46 = vmul.f32 0.0078125, %v4067_v8 }
 0xc72   : > { %6712 = vrsqrt.f32 %v4109_v1  ;;  %v4069_v41 = vpop.xlane.xlu1 %4068 }
 0xc73   : > { %v4110_v15 = vadd.f32 1e-05, %v4094_v46  ;;  %v4095_v11 = vmul.f32 0.0078125, %v4069_v41 }
 0xc74   : > { %v4071_v43 = vpop.xlane.xlu0 %4070 }
 0xc75   : > { %6714 = vrsqrt.f32 %v4110_v15  ;;  %v4111_v16 = vadd.f32 1e-05, %v4095_v11  ;;  %v4096_v23 = vmul.f32 0.0078125, %v4071_v43 }
 0xc76   : > { %v6707_v52 = vpop.eup %6706  ;;  %v4073_v28 = vpop.xlane.xlu1 %4072 }
 0xc77   : > { %6716 = vrsqrt.f32 %v4111_v16  ;;  %v4112_v62 = vadd.f32 1e-05, %v4096_v23  ;;  %v4097_v33 = vmul.f32 0.0078125, %v4073_v28  ;;  %v4138_v3 = vmul.f32 %v6707_v52, %v8654_v51 }
 0xc78   : > { %v6709_v6 = vpop.eup %6708 }
 0xc79   : > { %6718 = vrsqrt.f32 %v4112_v62  ;;  %v4113_v31 = vadd.f32 1e-05, %v4097_v33  ;;  %v4139_v29 = vmul.f32 %v6709_v6, %v8657_v2  ;;  %v4162_v39 = vmul.f32 %v8741_v45, %v4138_v3 }
 0xc7a   : > { %v6711_v27 = vpop.eup %6710 }
 0xc7b   : > { %v4140_v48 = vmul.f32 %v6711_v27, %v8662_v9  ;;  %6720 = vrsqrt.f32 %v4113_v31  ;;  %v4163_v47 = vmul.f32 %v8741_v45, %v4139_v29  ;;  %v8754_v49 = vadd.f32 %v8747_v58, %v4162_v39 }
 0xc7c   : > { %v6713_v22 = vpop.eup %6712 }
 0xc7d   : > { %v4164_v4 = vmul.f32 %v8741_v45, %v4140_v48  ;;  %v4141_v51 = vmul.f32 %v6713_v22, %v8667_v12  ;;  %v8757_v2 = vadd.f32 %v8747_v58, %v4163_v47 }
 0xc7f   : > { %v6715_v55 = vpop.eup %6714  ;;  %v4165_v19 = vmul.f32 %v8741_v45, %v4141_v51  ;;  %v4202_v9 = vpack.c.bf16 %v8757_v2, %v8754_v49  ;;  %v8764_v25 = vadd.f32 %v8747_v58, %v4164_v4 }
 0xc80   : > { %v4142_v0 = vmul.f32 %v6715_v55, %v8674_v54 }
 0xc81   : > { %v6717_v17 = vpop.eup %6716  ;;  %6135 = vmatprep.mubr.bf16.mxu0 %v4202_v9  ;;  %v8767_v12 = vadd.f32 %v8747_v58, %v4165_v19 }
 0xc82   : > { %v4143_v36 = vmul.f32 %v6717_v17, %v8677_v56  ;;  %v4166_v60 = vmul.f32 %v8741_v45, %v4142_v0 }
 0xc83   : > { %v6719_v32 = vpop.eup %6718  ;;  %v4203_v20 = vpack.c.bf16 %v8767_v12, %v8764_v25  ;;  %v4075_v42 = vpop.xlane.xlu0 %4074 }
 0xc84   : > { %v4098_v10 = vmul.f32 0.0078125, %v4075_v42  ;;  %v4167_v54 = vmul.f32 %v8741_v45, %v4143_v36  ;;  %v4144_v53 = vmul.f32 %v6719_v32, %v8682_v61  ;;  %v8776_v30 = vadd.f32 %v8747_v58, %v4166_v60 }
 0xc85   : > { %v6721_v24 = vpop.eup %6720  ;;  %6136 = vmatmul.mubr.bf16.vlgmr.msra.gmra.mrb[104].mxu0 %v4203_v20  ;;  %v4077_v34 = vpop.xlane.xlu1 %4076 }
 0xc86   : > { %v4114_v57 = vadd.f32 1e-05, %v4098_v10  ;;  %v4099_v56 = vmul.f32 0.0078125, %v4077_v34  ;;  %v8779_v26 = vadd.f32 %v8747_v58, %v4167_v54  ;;  %v4145_v63 = vmul.f32 %v6721_v24, %v8687_v37 }
 0xc87   : > { %v4079_v59 = vpop.xlane.xlu0 %4078  ;;  %v4168_v7 = vmul.f32 %v8741_v45, %v4144_v53 }
 0xc88   : > { %6722 = vrsqrt.f32 %v4114_v57  ;;  %v4115_v18 = vadd.f32 1e-05, %v4099_v56  ;;  %v4204_v61 = vpack.c.bf16 %v8779_v26, %v8776_v30  ;;  %v4100_v14 = vmul.f32 0.0078125, %v4079_v59 }
 0xc89   : > { %v4081_v1 = vpop.xlane.xlu1 %4080  ;;  %v4169_v8 = vmul.f32 %v8741_v45, %v4145_v63  ;;  %v8787_v15 = vadd.f32 %v8747_v58, %v4168_v7 }
 0xc8a   : > { %6724 = vrsqrt.f32 %v4115_v18  ;;  %6139 = vmatprep.mubr.bf16.mxu0 %v4204_v61  ;;  %v4116_v46 = vadd.f32 1e-05, %v4100_v14  ;;  %v4101_v41 = vmul.f32 0.0078125, %v4081_v1 }
 0xc8b   : > { %v8790_v37 = vadd.f32 %v8747_v58, %v4169_v8  ;;  %v5306_v8 = vld [vmem:[%s7353_s16 + $0x6] ss:$0 sm:$0xff] }
 0xc8c   : > { %6726 = vrsqrt.f32 %v4116_v46  ;;  %v4117_v11 = vadd.f32 1e-05, %v4101_v41 }
 0xc8d   : > { %v4205_v43 = vpack.c.bf16 %v8790_v37, %v8787_v15 }
 0xc8e   : > { %6728 = vrsqrt.f32 %v4117_v11 }
 0xc8f   : > { %6140 = vmatmul.mubr.bf16.gmra.mrb[108].mxu0 %v4205_v43  ;;  %v4083_v16 = vpop.xlane.xlu0 %4082 }
 0xc90   : > { %v4102_v23 = vmul.f32 0.0078125, %v4083_v16 }
 0xc91   : > { %v4085_v52 = vpop.xlane.xlu1 %4084 }
 0xc92   : > { %v6723_v28 = vpop.eup %6722  ;;  %v4118_v62 = vadd.f32 1e-05, %v4102_v23  ;;  %v4103_v33 = vmul.f32 0.0078125, %v4085_v52 }
 0xc93   : > { %v4087_v3 = vpop.xlane.xlu0 %4086  ;;  %v4146_v6 = vmul.f32 %v6723_v28, %v8696_v40 }
 0xc94   : > { %v6725_v31 = vpop.eup %6724  ;;  %6730 = vrsqrt.f32 %v4118_v62  ;;  %v4119_v29 = vadd.f32 1e-05, %v4103_v33  ;;  %v4104_v39 = vmul.f32 0.0078125, %v4087_v3 }
 0xc95   : > { %v4089_v27 = vpop.xlane.xlu1 %4088  ;;  %v4147_v48 = vmul.f32 %v6725_v31, %v8700_v44  ;;  %v4170_v47 = vmul.f32 %v8741_v45, %v4146_v6 }
 0xc96   : > { %v6727_v22 = vpop.eup %6726  ;;  %6732 = vrsqrt.f32 %v4119_v29  ;;  %v4120_v4 = vadd.f32 1e-05, %v4104_v39  ;;  %v4105_v51 = vmul.f32 0.0078125, %v4089_v27 }
 0xc97   : > { %v4171_v55 = vmul.f32 %v8741_v45, %v4147_v48  ;;  %v4148_v19 = vmul.f32 %v6727_v22, %v8705_v5  ;;  %v8800_v0 = vadd.f32 %v8747_v58, %v4170_v47 }
 0xc98   : > { %v6729_v9 = vpop.eup %6728  ;;  %6734 = vrsqrt.f32 %v4120_v4  ;;  %v4121_v40 = vadd.f32 1e-05, %v4105_v51 }
 0xc99   : > { %v8803_v17 = vadd.f32 %v8747_v58, %v4171_v55  ;;  %v4149_v44 = vmul.f32 %v6729_v9, %v8711_v13  ;;  %v4172_v36 = vmul.f32 %v8741_v45, %v4148_v19 }
 0xc9a   : > { %6736 = vrsqrt.f32 %v4121_v40 }
 0xc9b   : > { %v4206_v60 = vpack.c.bf16 %v8803_v17, %v8800_v0  ;;  %v4173_v32 = vmul.f32 %v8741_v45, %v4149_v44  ;;  %v4196_v5 = vadd.f32 %v8747_v58, %v4172_v36 }
 0xc9d   : > { %6143 = vmatprep.mubr.bf16.mxu0 %v4206_v60  ;;  %v8812_v20 = vadd.f32 %v8747_v58, %v4173_v32 }
 0xc9e   : > { %v6731_v42 = vpop.eup %6730 }
 0xc9f   : > { %v4207_v10 = vpack.c.bf16 %v8812_v20, %v4196_v5  ;;  %v4150_v54 = vmul.f32 %v6731_v42, %v8719_v21 }
 0xca0   : > { %v6733_v13 = vpop.eup %6732 }
 0xca1   : > { %6144 = vmatmul.mubr.bf16.gmra.mrb[112].mxu0 %v4207_v10  ;;  %v4151_v53 = vmul.f32 %v6733_v13, %v8724_v38  ;;  %v4174_v24 = vmul.f32 %v8741_v45, %v4150_v54 }
 0xca2   : > { %v6735_v34 = vpop.eup %6734 }
 0xca3   : > { %v4175_v57 = vmul.f32 %v8741_v45, %v4151_v53  ;;  %v4152_v56 = vmul.f32 %v6735_v34, %v8729_v35  ;;  %v8821_v59 = vadd.f32 %v8747_v58, %v4174_v24 }
 0xca4   : > { %v6737_v63 = vpop.eup %6736 }
 0xca5   : > { %v8824_v7 = vadd.f32 %v8747_v58, %v4175_v57  ;;  %v4153_v21 = vmul.f32 %v6737_v63, %v8734_v50  ;;  %v4176_v18 = vmul.f32 %v8741_v45, %v4152_v56 }
 0xca7   : > { %v4208_v38 = vpack.c.bf16 %v8824_v7, %v8821_v59  ;;  %v4177_v61 = vmul.f32 %v8741_v45, %v4153_v21  ;;  %v8832_v14 = vadd.f32 %v8747_v58, %v4176_v18 }
 0xca9   : > { %6147 = vmatprep.mubr.bf16.mxu0 %v4208_v38  ;;  %v8835_v35 = vadd.f32 %v8747_v58, %v4177_v61 }
 0xcab   : > { %v4209_v1 = vpack.c.bf16 %v8835_v35, %v8832_v14 }
 0xcad   : > { %6148 = vmatmul.mubr.bf16.gmra.mrb[116].mxu0 %v4209_v1 }
 0xd58   : > { %v6137_v50 = vpop.f32.mrb[104].mxu0 }
 0xd59   : > { %v4326_v46 = vadd.f32 %v6137_v50, %v5306_v8  ;;  %v4317_v41 = vpop.f32.mrb[105].mxu0 }
 0xd5a   : > { %v6138_v11 = vpop.f32.mrb[106].mxu0  ;;  %v4318_v45 = vadd.f32 %v5306_v8, %v4317_v41 }
 0xd5b   : > { %v8841_v43 = vadd.f32 %v4326_v46, %v8764_v25  ;;  %v4329_v16 = vadd.f32 %v6138_v11, %v5306_v8  ;;  %v4320_v23 = vpop.f32.mrb[107].mxu0 }
 0xd5c   : > { %v4321_v28 = vadd.f32 %v5306_v8, %v4320_v23  ;;  %v8846_v58 = vadd.f32 %v4318_v45, %v8754_v49 }
 0xd5d   : > { %v4383_v52 = vadd.f32 %v4329_v16, %v8767_v12  ;;  %4400 = vadd.xlane.f32.xlu0 %v8841_v43 }
 0xd5e   : > { %v8849_v62 = vadd.f32 %v4321_v28, %v8757_v2 }
 0xd5f   : > { %4402 = vadd.xlane.f32.xlu1 %v4383_v52 }
 0xd61   : > { %4396 = vadd.xlane.f32.xlu0 %v8846_v58 }
 0xd62   : > { %v6141_v33 = vpop.f32.mrb[108].mxu0 }
 0xd63   : > { %v4342_v25 = vadd.f32 %v6141_v33, %v5306_v8  ;;  %v4333_v3 = vpop.f32.mrb[109].mxu0  ;;  %4398 = vadd.xlane.f32.xlu1 %v8849_v62 }
 0xd64   : > { %v6142_v6 = vpop.f32.mrb[110].mxu0  ;;  %v4334_v31 = vadd.f32 %v5306_v8, %v4333_v3 }
 0xd65   : > { %v8854_v12 = vadd.f32 %v4342_v25, %v8787_v15  ;;  %v4345_v29 = vadd.f32 %v6142_v6, %v5306_v8  ;;  %v4336_v39 = vpop.f32.mrb[111].mxu0 }
 0xd66   : > { %v4337_v27 = vadd.f32 %v5306_v8, %v4336_v39  ;;  %v8861_v2 = vadd.f32 %v4334_v31, %v8776_v30 }
 0xd67   : > { %v8857_v49 = vadd.f32 %v4345_v29, %v8790_v37  ;;  %4408 = vadd.xlane.f32.xlu0 %v8854_v12 }
 0xd68   : > { %v8865_v48 = vadd.f32 %v4337_v27, %v8779_v26 }
 0xd69   : > { %4410 = vadd.xlane.f32.xlu1 %v8857_v49 }
 0xd6b   : > { %4404 = vadd.xlane.f32.xlu0 %v8861_v2 }
 0xd6d   : > { %4406 = vadd.xlane.f32.xlu1 %v8865_v48 }
 0xd74   : > { %v6145_v15 = vpop.f32.mrb[112].mxu0 }
 0xd75   : > { %v4358_v47 = vadd.f32 %v6145_v15, %v5306_v8  ;;  %v4349_v22 = vpop.f32.mrb[113].mxu0 }
 0xd76   : > { %v6146_v37 = vpop.f32.mrb[114].mxu0  ;;  %v4350_v51 = vadd.f32 %v5306_v8, %v4349_v22 }
 0xd77   : > { %v8869_v4 = vadd.f32 %v4358_v47, %v4196_v5  ;;  %v4361_v55 = vadd.f32 %v6146_v37, %v5306_v8  ;;  %v4352_v19 = vpop.f32.mrb[115].mxu0 }
 0xd78   : > { %v4353_v9 = vadd.f32 %v5306_v8, %v4352_v19  ;;  %v8876_v26 = vadd.f32 %v4350_v51, %v8800_v0 }
 0xd79   : > { %v8872_v30 = vadd.f32 %v4361_v55, %v8812_v20  ;;  %4416 = vadd.xlane.f32.xlu0 %v8869_v4 }
 0xd7a   : > { %v8880_v40 = vadd.f32 %v4353_v9, %v8803_v17 }
 0xd7b   : > { %4418 = vadd.xlane.f32.xlu1 %v8872_v30 }
 0xd7d   : > { %4412 = vadd.xlane.f32.xlu0 %v8876_v26 }
 0xd7f   : > { %4414 = vadd.xlane.f32.xlu1 %v8880_v40 }
 0xd80   : > { %v6149_v44 = vpop.f32.mrb[116].mxu0 }
 0xd81   : > { %v4365_v36 = vpop.f32.mrb[117].mxu0  ;;  %v4374_v20 = vadd.f32 %v6149_v44, %v5306_v8 }
 0xd82   : > { %v4366_v60 = vadd.f32 %v5306_v8, %v4365_v36  ;;  %v6150_v32 = vpop.f32.mrb[118].mxu0 }
 0xd83   : > { %v4368_v5 = vpop.f32.mrb[119].mxu0  ;;  %v4377_v10 = vadd.f32 %v6150_v32, %v5306_v8  ;;  %v8892_v17 = vadd.f32 %v4374_v20, %v8832_v14 }
 0xd84   : > { %v8885_v42 = vadd.f32 %v4366_v60, %v8821_v59  ;;  %v4369_v0 = vadd.f32 %v5306_v8, %v4368_v5 }
 0xd85   : > { %v8896_v13 = vadd.f32 %v4377_v10, %v8835_v35 }
 0xd86   : > { %v8888_v54 = vadd.f32 %v4369_v0, %v8824_v7  ;;  %4420 = vadd.xlane.f32.xlu0 %v8885_v42 }
 0xd88   : > { %4422 = vadd.xlane.f32.xlu1 %v8888_v54 }
 0xd8a   : > { %4424 = vadd.xlane.f32.xlu0 %v8892_v17 }
 0xd8c   : > { %4426 = vadd.xlane.f32.xlu1 %v8896_v13 }
 0xdea   : > { %v4401_v53 = vpop.xlane.xlu0 %4400 }
 0xdeb   : > { %v4430_v24 = vmul.f32 0.0078125, %v4401_v53 }
 0xdec   : > { %v4403_v34 = vpop.xlane.xlu1 %4402 }
 0xded   : > { %v8901_v57 = vsub.f32 %v8841_v43, %v4430_v24  ;;  %v4431_v56 = vmul.f32 0.0078125, %v4403_v34 }
 0xdee   : > { %v4397_v63 = vpop.xlane.xlu0 %4396 }
 0xdef   : > { %v8903_v59 = vsub.f32 %v4383_v52, %v4431_v56  ;;  %v4428_v7 = vmul.f32 0.0078125, %v4397_v63  ;;  %v4462_v21 = vmul.f32 %v8901_v57, %v8901_v57 }
 0xdf0   : > { %v4399_v18 = vpop.xlane.xlu1 %4398 }
 0xdf1   : > { %v8908_v38 = vsub.f32 %v8846_v58, %v4428_v7  ;;  %v4429_v61 = vmul.f32 0.0078125, %v4399_v18  ;;  %4480 = vadd.xlane.f32.xlu0 %v4462_v21  ;;  %v4463_v14 = vmul.f32 %v8903_v59, %v8903_v59 }
 0xdf3   : > { %v8913_v35 = vsub.f32 %v8849_v62, %v4429_v61  ;;  %4482 = vadd.xlane.f32.xlu1 %v4463_v14  ;;  %v4460_v1 = vmul.f32 %v8908_v38, %v8908_v38 }
 0xdf4   : > { %v4409_v8 = vpop.xlane.xlu0 %4408 }
 0xdf5   : > { %v4434_v50 = vmul.f32 0.0078125, %v4409_v8  ;;  %4476 = vadd.xlane.f32.xlu0 %v4460_v1  ;;  %v4461_v46 = vmul.f32 %v8913_v35, %v8913_v35 }
 0xdf6   : > { %v4411_v41 = vpop.xlane.xlu1 %4410 }
 0xdf7   : > { %v8920_v11 = vsub.f32 %v8854_v12, %v4434_v50  ;;  %v4435_v43 = vmul.f32 0.0078125, %v4411_v41  ;;  %4478 = vadd.xlane.f32.xlu1 %v4461_v46 }
 0xdf8   : > { %v4405_v45 = vpop.xlane.xlu0 %4404 }
 0xdf9   : > { %v8923_v16 = vsub.f32 %v8857_v49, %v4435_v43  ;;  %v4432_v23 = vmul.f32 0.0078125, %v4405_v45  ;;  %v4466_v52 = vmul.f32 %v8920_v11, %v8920_v11 }
 0xdfa   : > { %v4407_v28 = vpop.xlane.xlu1 %4406 }
 0xdfb   : > { %v8928_v58 = vsub.f32 %v8861_v2, %v4432_v23  ;;  %v4433_v62 = vmul.f32 0.0078125, %v4407_v28  ;;  %4488 = vadd.xlane.f32.xlu0 %v4466_v52  ;;  %v4467_v33 = vmul.f32 %v8923_v16, %v8923_v16  ;;  %v8980_v28 = vld [vmem:[%s7358_s10 + $0x4] ss:$0 sm:$0xff] }
 0xdfd   : > { %v8933_v25 = vsub.f32 %v8865_v48, %v4433_v62  ;;  %4490 = vadd.xlane.f32.xlu1 %v4467_v33  ;;  %v4464_v3 = vmul.f32 %v8928_v58, %v8928_v58 }
 0xdff   : > { %4484 = vadd.xlane.f32.xlu0 %v4464_v3  ;;  %v4465_v6 = vmul.f32 %v8933_v25, %v8933_v25 }
 0xe01   : > { %4486 = vadd.xlane.f32.xlu1 %v4465_v6 }
 0xe06   : > { %v4417_v12 = vpop.xlane.xlu0 %4416 }
 0xe07   : > { %v4438_v31 = vmul.f32 0.0078125, %v4417_v12 }
 0xe08   : > { %v4419_v29 = vpop.xlane.xlu1 %4418 }
 0xe09   : > { %v8940_v39 = vsub.f32 %v8869_v4, %v4438_v31  ;;  %v4439_v49 = vmul.f32 0.0078125, %v4419_v29  ;;  %v8984_v31 = vld [vmem:[%s7358_s10 + $0x5] ss:$0 sm:$0xff] }
 0xe0a   : > { %v4413_v27 = vpop.xlane.xlu0 %4412 }
 0xe0b   : > { %v8943_v2 = vsub.f32 %v8872_v30, %v4439_v49  ;;  %v4436_v48 = vmul.f32 0.0078125, %v4413_v27  ;;  %v4470_v15 = vmul.f32 %v8940_v39, %v8940_v39 }
 0xe0c   : > { %v4415_v47 = vpop.xlane.xlu1 %4414 }
 0xe0d   : > { %v8948_v22 = vsub.f32 %v8876_v26, %v4436_v48  ;;  %v4437_v37 = vmul.f32 0.0078125, %v4415_v47  ;;  %4496 = vadd.xlane.f32.xlu0 %v4470_v15  ;;  %v4471_v51 = vmul.f32 %v8943_v2, %v8943_v2 }
 0xe0f   : > { %v8953_v4 = vsub.f32 %v8880_v40, %v4437_v37  ;;  %4498 = vadd.xlane.f32.xlu1 %v4471_v51  ;;  %v4468_v55 = vmul.f32 %v8948_v22, %v8948_v22 }
 0xe11   : > { %4492 = vadd.xlane.f32.xlu0 %v4468_v55  ;;  %v4469_v19 = vmul.f32 %v8953_v4, %v8953_v4 }
 0xe13   : > { %v4421_v30 = vpop.xlane.xlu0 %4420  ;;  %4494 = vadd.xlane.f32.xlu1 %v4469_v19 }
 0xe14   : > { %v4440_v9 = vmul.f32 0.0078125, %v4421_v30 }
 0xe15   : > { %v4423_v26 = vpop.xlane.xlu1 %4422 }
 0xe16   : > { %v8960_v44 = vsub.f32 %v8885_v42, %v4440_v9  ;;  %v4441_v36 = vmul.f32 0.0078125, %v4423_v26 }
 0xe17   : > { %v4425_v60 = vpop.xlane.xlu0 %4424 }
 0xe18   : > { %v8963_v40 = vsub.f32 %v8888_v54, %v4441_v36  ;;  %v4442_v32 = vmul.f32 0.0078125, %v4425_v60  ;;  %v4472_v5 = vmul.f32 %v8960_v44, %v8960_v44 }
 0xe19   : > { %v4427_v20 = vpop.xlane.xlu1 %4426 }
 0xe1a   : > { %v8968_v0 = vsub.f32 %v8892_v17, %v4442_v32  ;;  %v4443_v10 = vmul.f32 0.0078125, %v4427_v20  ;;  %4500 = vadd.xlane.f32.xlu0 %v4472_v5  ;;  %v4473_v53 = vmul.f32 %v8963_v40, %v8963_v40 }
 0xe1c   : > { %v8973_v42 = vsub.f32 %v8896_v13, %v4443_v10  ;;  %4502 = vadd.xlane.f32.xlu1 %v4473_v53  ;;  %v4474_v54 = vmul.f32 %v8968_v0, %v8968_v0 }
 0xe1e   : > { %4504 = vadd.xlane.f32.xlu0 %v4474_v54  ;;  %v4475_v24 = vmul.f32 %v8973_v42, %v8973_v42 }
 0xe20   : > { %4506 = vadd.xlane.f32.xlu1 %v4475_v24 }
 0xe7e   : > { %v4481_v34 = vpop.xlane.xlu0 %4480 }
 0xe7f   : > { %v4510_v17 = vmul.f32 0.0078125, %v4481_v34 }
 0xe80   : > { %v4483_v56 = vpop.xlane.xlu1 %4482 }
 0xe81   : > { %v4526_v63 = vadd.f32 1e-05, %v4510_v17  ;;  %v4511_v7 = vmul.f32 0.0078125, %v4483_v56 }
 0xe82   : > { %v4477_v21 = vpop.xlane.xlu0 %4476 }
 0xe83   : > { %6738 = vrsqrt.f32 %v4526_v63  ;;  %v4527_v18 = vadd.f32 1e-05, %v4511_v7  ;;  %v4508_v13 = vmul.f32 0.0078125, %v4477_v21 }
 0xe84   : > { %v4479_v61 = vpop.xlane.xlu1 %4478 }
 0xe85   : > { %6740 = vrsqrt.f32 %v4527_v18  ;;  %v4524_v14 = vadd.f32 1e-05, %v4508_v13  ;;  %v4509_v1 = vmul.f32 0.0078125, %v4479_v61 }
 0xe87   : > { %6742 = vrsqrt.f32 %v4524_v14  ;;  %v4525_v8 = vadd.f32 1e-05, %v4509_v1 }
 0xe88   : > { %v4489_v50 = vpop.xlane.xlu0 %4488 }
 0xe89   : > { %6744 = vrsqrt.f32 %v4525_v8  ;;  %v4514_v46 = vmul.f32 0.0078125, %v4489_v50 }
 0xe8a   : > { %v4491_v41 = vpop.xlane.xlu1 %4490 }
 0xe8b   : > { %v4530_v43 = vadd.f32 1e-05, %v4514_v46  ;;  %v4515_v45 = vmul.f32 0.0078125, %v4491_v41 }
 0xe8c   : > { %v4485_v23 = vpop.xlane.xlu0 %4484 }
 0xe8d   : > { %v6739_v52 = vpop.eup %6738  ;;  %6746 = vrsqrt.f32 %v4530_v43  ;;  %v4531_v62 = vadd.f32 1e-05, %v4515_v45  ;;  %v4512_v33 = vmul.f32 0.0078125, %v4485_v23 }
 0xe8e   : > { %v4558_v3 = vmul.f32 %v6739_v52, %v8901_v57  ;;  %v4487_v6 = vpop.xlane.xlu1 %4486 }
 0xe8f   : > { %v6741_v12 = vpop.eup %6740  ;;  %6748 = vrsqrt.f32 %v4531_v62  ;;  %v4528_v29 = vadd.f32 1e-05, %v4512_v33  ;;  %v4513_v49 = vmul.f32 0.0078125, %v4487_v6 }
 0xe90   : > { %v4582_v27 = vmul.f32 %v8980_v28, %v4558_v3  ;;  %v4559_v48 = vmul.f32 %v6741_v12, %v8903_v59 }
 0xe91   : > { %v6743_v15 = vpop.eup %6742  ;;  %6750 = vrsqrt.f32 %v4528_v29  ;;  %v4529_v47 = vadd.f32 1e-05, %v4513_v49 }
 0xe92   : > { %v4606_v37 = vadd.f32 %v8984_v31, %v4582_v27  ;;  %v4583_v57 = vmul.f32 %v8980_v28, %v4559_v48  ;;  %v4556_v51 = vmul.f32 %v6743_v15, %v8908_v38 }
 0xe93   : > { %v6745_v55 = vpop.eup %6744  ;;  %6752 = vrsqrt.f32 %v4529_v47 }
 0xe94   : > { %4622 = vst [vmem:[%s7371_s29 + $0x10] sm:$0xff] %v4606_v37  ;;  %v4607_v19 = vadd.f32 %v8984_v31, %v4583_v57  ;;  %v4580_v30 = vmul.f32 %v8980_v28, %v4556_v51  ;;  %v4557_v59 = vmul.f32 %v6745_v55, %v8913_v35 }
 0xe96   : > { %4623 = vst [vmem:[%s7371_s29 + $0x18] sm:$0xff] %v4607_v19  ;;  %v4604_v9 = vadd.f32 %v8984_v31, %v4580_v30  ;;  %v4581_v26 = vmul.f32 %v8980_v28, %v4557_v59 }
 0xe97   : > { %v6747_v36 = vpop.eup %6746 }
 0xe98   : > { %4620 = vst [vmem:[%s7371_s29] sm:$0xff] %v4604_v9  ;;  %v4605_v60 = vadd.f32 %v8984_v31, %v4581_v26  ;;  %v4562_v38 = vmul.f32 %v6747_v36, %v8920_v11 }
 0xe99   : > { %v6749_v32 = vpop.eup %6748 }
 0xe9a   : > { %4621 = vst [vmem:[%s7371_s29 + $0x8] sm:$0xff] %v4605_v60  ;;  %v4586_v5 = vmul.f32 %v8980_v28, %v4562_v38  ;;  %v4563_v20 = vmul.f32 %v6749_v32, %v8923_v16  ;;  %v4497_v10 = vpop.xlane.xlu0 %4496 }
 0xe9b   : > { %v6751_v35 = vpop.eup %6750  ;;  %v4518_v53 = vmul.f32 0.0078125, %v4497_v10 }
 0xe9c   : > { %v4610_v54 = vadd.f32 %v8984_v31, %v4586_v5  ;;  %v4587_v24 = vmul.f32 %v8980_v28, %v4563_v20  ;;  %v4560_v34 = vmul.f32 %v6751_v35, %v8928_v58  ;;  %v4499_v17 = vpop.xlane.xlu1 %4498 }
 0xe9d   : > { %v6753_v56 = vpop.eup %6752  ;;  %v4534_v63 = vadd.f32 1e-05, %v4518_v53  ;;  %v4519_v11 = vmul.f32 0.0078125, %v4499_v17 }
 0xe9e   : > { %4626 = vst [vmem:[%s7371_s29 + $0x30] sm:$0xff] %v4610_v54  ;;  %v4611_v7 = vadd.f32 %v8984_v31, %v4587_v24  ;;  %v4584_v16 = vmul.f32 %v8980_v28, %v4560_v34  ;;  %v4561_v21 = vmul.f32 %v6753_v56, %v8933_v25  ;;  %v4493_v18 = vpop.xlane.xlu0 %4492 }
 0xe9f   : > { %6754 = vrsqrt.f32 %v4534_v63  ;;  %v4535_v13 = vadd.f32 1e-05, %v4519_v11  ;;  %v4516_v61 = vmul.f32 0.0078125, %v4493_v18 }
 0xea0   : > { %4627 = vst [vmem:[%s7371_s29 + $0x38] sm:$0xff] %v4611_v7  ;;  %v4608_v58 = vadd.f32 %v8984_v31, %v4584_v16  ;;  %v4585_v14 = vmul.f32 %v8980_v28, %v4561_v21  ;;  %v4495_v1 = vpop.xlane.xlu1 %4494 }
 0xea1   : > { %6756 = vrsqrt.f32 %v4535_v13  ;;  %v4532_v8 = vadd.f32 1e-05, %v4516_v61  ;;  %v4517_v50 = vmul.f32 0.0078125, %v4495_v1 }
 0xea2   : > { %4624 = vst [vmem:[%s7371_s29 + $0x20] sm:$0xff] %v4608_v58  ;;  %v4609_v46 = vadd.f32 %v8984_v31, %v4585_v14 }
 0xea3   : > { %6758 = vrsqrt.f32 %v4532_v8  ;;  %v4533_v41 = vadd.f32 1e-05, %v4517_v50 }
 0xea4   : > { %4625 = vst [vmem:[%s7371_s29 + $0x28] sm:$0xff] %v4609_v46 }
 0xea5   : > { %6760 = vrsqrt.f32 %v4533_v41  ;;  %v4646_v11 = vld [vmem:[%s7371_s29 + $0x30] sm:$0xff] (!%p5319_p8) }
 0xea7   : > { %v4501_v25 = vpop.xlane.xlu0 %4500  ;;  %v4647_v7 = vld [vmem:[%s7371_s29 + $0x38] sm:$0xff] (!%p5319_p8) }
 0xea8   : > { %v4520_v43 = vmul.f32 0.0078125, %v4501_v25 }
 0xea9   : > { %v6755_v45 = vpop.eup %6754  ;;  %v4503_v23 = vpop.xlane.xlu1 %4502  ;;  %v4644_v56 = vld [vmem:[%s7371_s29 + $0x20] sm:$0xff] (!%p5319_p8) }
 0xeaa   : > { %v4566_v52 = vmul.f32 %v6755_v45, %v8940_v39  ;;  %v4536_v62 = vadd.f32 1e-05, %v4520_v43  ;;  %v4521_v33 = vmul.f32 0.0078125, %v4503_v23 }
 0xeab   : > { %v6757_v3 = vpop.eup %6756  ;;  %v4505_v6 = vpop.xlane.xlu0 %4504  ;;  %v4645_v63 = vld [vmem:[%s7371_s29 + $0x28] sm:$0xff] (!%p5319_p8) }
 0xeac   : > { %v4590_v12 = vmul.f32 %v8980_v28, %v4566_v52  ;;  %v4567_v29 = vmul.f32 %v6757_v3, %v8943_v2  ;;  %6762 = vrsqrt.f32 %v4536_v62  ;;  %v4537_v49 = vadd.f32 1e-05, %v4521_v33 }
 0xead   : > { %v6759_v27 = vpop.eup %6758  ;;  %v4522_v48 = vmul.f32 0.0078125, %v4505_v6  ;;  %v4507_v15 = vpop.xlane.xlu1 %4506 }
 0xeae   : > { %v4614_v47 = vadd.f32 %v8984_v31, %v4590_v12  ;;  %v4591_v37 = vmul.f32 %v8980_v28, %v4567_v29  ;;  %v4564_v39 = vmul.f32 %v6759_v27, %v8948_v22  ;;  %6764 = vrsqrt.f32 %v4537_v49 }
 0xeaf   : > { %v6761_v57 = vpop.eup %6760  ;;  %v4538_v51 = vadd.f32 1e-05, %v4522_v48  ;;  %v4523_v55 = vmul.f32 0.0078125, %v4507_v15 }
 0xeb0   : > { %4630 = vst [vmem:[%s7371_s29 + $0x50] sm:$0xff] %v4614_v47  ;;  %v4615_v2 = vadd.f32 %v8984_v31, %v4591_v37  ;;  %v4588_v19 = vmul.f32 %v8980_v28, %v4564_v39  ;;  %v4565_v30 = vmul.f32 %v6761_v57, %v8953_v4 }
 0xeb1   : > { %6766 = vrsqrt.f32 %v4538_v51  ;;  %v4539_v59 = vadd.f32 1e-05, %v4523_v55 }
 0xeb2   : > { %4631 = vst [vmem:[%s7371_s29 + $0x58] sm:$0xff] %v4615_v2  ;;  %v4612_v9 = vadd.f32 %v8984_v31, %v4588_v19  ;;  %v4589_v22 = vmul.f32 %v8980_v28, %v4565_v30 }
 0xeb3   : > { %6768 = vrsqrt.f32 %v4539_v59 }
 0xeb4   : > { %4628 = vst [vmem:[%s7371_s29 + $0x40] sm:$0xff] %v4612_v9  ;;  %v4613_v26 = vadd.f32 %v8984_v31, %v4589_v22 }
 0xeb6   : > { %v6763_v36 = vpop.eup %6762  ;;  %4629 = vst [vmem:[%s7371_s29 + $0x48] sm:$0xff] %v4613_v26 }
 0xeb7   : > { %v4568_v60 = vmul.f32 %v6763_v36, %v8960_v44  ;;  %v4650_v18 = vld [vmem:[%s7371_s29 + $0x50] sm:$0xff] (!%p5319_p8) }
 0xeb8   : > { %v6765_v38 = vpop.eup %6764 }
 0xeb9   : > { %v4592_v4 = vmul.f32 %v8980_v28, %v4568_v60  ;;  %v4569_v32 = vmul.f32 %v6765_v38, %v8963_v40  ;;  %v9062_v13 = vld [vmem:[%s7371_s29 + $0x58] sm:$0xff] (!%p5319_p8) }
 0xebb   : > { %v6767_v5 = vpop.eup %6766  ;;  %v4616_v20 = vadd.f32 %v8984_v31, %v4592_v4  ;;  %v4593_v10 = vmul.f32 %v8980_v28, %v4569_v32  ;;  %v4648_v16 = vld [vmem:[%s7371_s29 + $0x40] sm:$0xff] (!%p5319_p8) }
 0xebc   : > { %v4570_v35 = vmul.f32 %v6767_v5, %v8968_v0  ;;  %v4640_v0 = vld [vmem:[%s7371_s29] sm:$0xff] (!%p5319_p8) }
 0xebd   : > { %v6769_v53 = vpop.eup %6768  ;;  %4632 = vst [vmem:[%s7371_s29 + $0x60] sm:$0xff] %v4616_v20  ;;  %v4617_v54 = vadd.f32 %v8984_v31, %v4593_v10  ;;  %4656 = vadd.xlane.f32.xlu0 (!%p5319_p8), %v4640_v0  ;;  %v4649_v21 = vld [vmem:[%s7371_s29 + $0x48] sm:$0xff] (!%p5319_p8) }
 0xebe   : > { %v4594_v44 = vmul.f32 %v8980_v28, %v4570_v35  ;;  %v4571_v24 = vmul.f32 %v6769_v53, %v8973_v42  ;;  %4639 = sbr.rel (%p5319_p8) target bundleno = 4117 (0x1015), region = 88  ;;  %v4642_v42 = vld [vmem:[%s7371_s29 + $0x10] sm:$0xff] (!%p5319_p8) }
 0xebf   : > { %4633 = vst [vmem:[%s7371_s29 + $0x68] sm:$0xff] %v4617_v54  ;;  %4660 = vadd.xlane.f32.xlu1 (!%p5319_p8), %v4642_v42 }
 0xec0   : > { %v4618_v34 = vadd.f32 %v8984_v31, %v4594_v44  ;;  %v4595_v40 = vmul.f32 %v8980_v28, %v4571_v24  ;;  %v4641_v28 = vld [vmem:[%s7371_s29 + $0x8] sm:$0xff] (!%p5319_p8) }
 0xec1   : > { %4658 = vadd.xlane.f32.xlu0 (!%p5319_p8), %v4641_v28 }
 0xec2   : > { %4634 = vst [vmem:[%s7371_s29 + $0x70] sm:$0xff] %v4618_v34  ;;  %v4619_v17 = vadd.f32 %v8984_v31, %v4595_v40  ;;  %v4643_v31 = vld [vmem:[%s7371_s29 + $0x18] sm:$0xff] (!%p5319_p8) }
 0xec3   : > { %4662 = vadd.xlane.f32.xlu1 (!%p5319_p8), %v4643_v31 }
 0xec4   : > { %4635 = vst [vmem:[%s7371_s29 + $0x78] sm:$0xff] %v4619_v17  ;;  %v9066_v61 = vld [vmem:[%s7371_s29 + $0x60] sm:$0xff] (!%p5319_p8) }
 0xec5   : > { %4664 = vadd.xlane.f32.xlu0 %v4644_v56 }
 0xec6   : > { %v9069_v58 = vld [vmem:[%s7371_s29 + $0x68] sm:$0xff] }
 0xec7   : > { %4666 = vadd.xlane.f32.xlu1 %v4645_v63 }
 0xec9   : > { %4668 = vadd.xlane.f32.xlu0 %v4646_v11  ;;  %v9074_v14 = vld [vmem:[%s7371_s29 + $0x70] sm:$0xff] }
 0xecb   : > { %4670 = vadd.xlane.f32.xlu1 %v4647_v7  ;;  %v9077_v1 = vld [vmem:[%s7371_s29 + $0x78] sm:$0xff] }
 0xecd   : > { %4672 = vadd.xlane.f32.xlu0 %v4648_v16 }
 0xecf   : > { %4674 = vadd.xlane.f32.xlu1 %v4649_v21 }
 0xed1   : > { %4676 = vadd.xlane.f32.xlu0 %v4650_v18 }
 0xed3   : > { %4678 = vadd.xlane.f32.xlu1 %v9062_v13 }
 0xed5   : > { %4680 = vadd.xlane.f32.xlu0 %v9066_v61 }
 0xed7   : > { %4682 = vadd.xlane.f32.xlu1 %v9069_v58 }
 0xed9   : > { %4684 = vadd.xlane.f32.xlu0 %v9074_v14 }
 0xedb   : > { %4686 = vadd.xlane.f32.xlu1 %v9077_v1 }
 0xf4a   : > { %v4657_v8 = vpop.xlane.xlu0 %4656 }
 0xf4b   : > { %v4688_v46 = vmul.f32 0.0078125, %v4657_v8 }
 0xf4c   : > { %v4661_v50 = vpop.xlane.xlu1 %4660 }
 0xf4d   : > { %v4690_v41 = vmul.f32 0.0078125, %v4661_v50  ;;  %v9081_v25 = vsub.f32 %v4640_v0, %v4688_v46 }
 0xf4e   : > { %v4659_v45 = vpop.xlane.xlu0 %4658 }
 0xf4f   : > { %v9083_v43 = vsub.f32 %v4642_v42, %v4690_v41  ;;  %v4689_v52 = vmul.f32 0.0078125, %v4659_v45  ;;  %v4720_v62 = vmul.f32 %v9081_v25, %v9081_v25 }
 0xf50   : > { %v4663_v23 = vpop.xlane.xlu1 %4662 }
 0xf51   : > { %v4691_v33 = vmul.f32 0.0078125, %v4663_v23  ;;  %v9087_v3 = vsub.f32 %v4641_v28, %v4689_v52  ;;  %4736 = vadd.xlane.f32.xlu0 %v4720_v62  ;;  %v4722_v12 = vmul.f32 %v9083_v43, %v9083_v43 }
 0xf52   : > { %v4665_v29 = vpop.xlane.xlu0 %4664 }
 0xf53   : > { %v9089_v6 = vsub.f32 %v4643_v31, %v4691_v33  ;;  %v4692_v27 = vmul.f32 0.0078125, %v4665_v29  ;;  %v4721_v48 = vmul.f32 %v9087_v3, %v9087_v3 }
 0xf54   : > { %v4667_v49 = vpop.xlane.xlu1 %4666 }
 0xf55   : > { %v4693_v15 = vmul.f32 0.0078125, %v4667_v49  ;;  %v9095_v47 = vsub.f32 %v4644_v56, %v4692_v27  ;;  %4740 = vadd.xlane.f32.xlu0 %v4722_v12  ;;  %4738 = vadd.xlane.f32.xlu1 %v4721_v48  ;;  %v4723_v39 = vmul.f32 %v9089_v6, %v9089_v6 }
 0xf56   : > { %v4669_v57 = vpop.xlane.xlu0 %4668 }
 0xf57   : > { %v9097_v37 = vsub.f32 %v4645_v63, %v4693_v15  ;;  %v4694_v55 = vmul.f32 0.0078125, %v4669_v57  ;;  %v4724_v2 = vmul.f32 %v9095_v47, %v9095_v47 }
 0xf58   : > { %v4671_v51 = vpop.xlane.xlu1 %4670 }
 0xf59   : > { %v4695_v19 = vmul.f32 0.0078125, %v4671_v51  ;;  %v9103_v30 = vsub.f32 %v4646_v11, %v4694_v55  ;;  %4742 = vadd.xlane.f32.xlu1 %v4723_v39  ;;  %4744 = vadd.xlane.f32.xlu0 %v4724_v2  ;;  %v4725_v9 = vmul.f32 %v9097_v37, %v9097_v37 }
 0xf5a   : > { %v4673_v22 = vpop.xlane.xlu0 %4672 }
 0xf5b   : > { %v9105_v59 = vsub.f32 %v4647_v7, %v4695_v19  ;;  %v4696_v36 = vmul.f32 0.0078125, %v4673_v22  ;;  %v4726_v60 = vmul.f32 %v9103_v30, %v9103_v30  ;;  %v9153_v19 = vld [vmem:[%s9466_s15] ss:$0 sm:$0xff] }
 0xf5c   : > { %v4675_v26 = vpop.xlane.xlu1 %4674 }
 0xf5d   : > { %v4697_v38 = vmul.f32 0.0078125, %v4675_v26  ;;  %v9111_v4 = vsub.f32 %v4648_v16, %v4696_v36  ;;  %4746 = vadd.xlane.f32.xlu1 %v4725_v9  ;;  %4748 = vadd.xlane.f32.xlu0 %v4726_v60  ;;  %v4727_v5 = vmul.f32 %v9105_v59, %v9105_v59 }
 0xf5e   : > { %v4677_v20 = vpop.xlane.xlu0 %4676 }
 0xf5f   : > { %v9113_v32 = vsub.f32 %v4649_v21, %v4697_v38  ;;  %v4698_v35 = vmul.f32 0.0078125, %v4677_v20  ;;  %v4728_v53 = vmul.f32 %v9111_v4, %v9111_v4  ;;  %v9159_v38 = vld [vmem:[%s9467_s2] ss:$0 sm:$0xff] }
 0xf60   : > { %v4679_v10 = vpop.xlane.xlu1 %4678 }
 0xf61   : > { %v4699_v54 = vmul.f32 0.0078125, %v4679_v10  ;;  %v9119_v44 = vsub.f32 %v4650_v18, %v4698_v35  ;;  %4750 = vadd.xlane.f32.xlu1 %v4727_v5  ;;  %4752 = vadd.xlane.f32.xlu0 %v4728_v53  ;;  %v4729_v34 = vmul.f32 %v9113_v32, %v9113_v32 }
 0xf62   : > { %v4681_v40 = vpop.xlane.xlu0 %4680 }
 0xf63   : > { %v9122_v24 = vsub.f32 %v9062_v13, %v4699_v54  ;;  %v4700_v0 = vmul.f32 0.0078125, %v4681_v40  ;;  %v4730_v42 = vmul.f32 %v9119_v44, %v9119_v44 }
 0xf64   : > { %v4683_v17 = vpop.xlane.xlu1 %4682 }
 0xf65   : > { %v4701_v28 = vmul.f32 0.0078125, %v4683_v17  ;;  %v9129_v31 = vsub.f32 %v9066_v61, %v4700_v0  ;;  %4754 = vadd.xlane.f32.xlu1 %v4729_v34  ;;  %4756 = vadd.xlane.f32.xlu0 %v4730_v42  ;;  %v4731_v63 = vmul.f32 %v9122_v24, %v9122_v24 }
 0xf66   : > { %v4685_v11 = vpop.xlane.xlu0 %4684 }
 0xf67   : > { %v9132_v56 = vsub.f32 %v9069_v58, %v4701_v28  ;;  %v4702_v16 = vmul.f32 0.0078125, %v4685_v11  ;;  %v4732_v21 = vmul.f32 %v9129_v31, %v9129_v31 }
 0xf68   : > { %v4687_v7 = vpop.xlane.xlu1 %4686 }
 0xf69   : > { %v4703_v18 = vmul.f32 0.0078125, %v4687_v7  ;;  %v9139_v13 = vsub.f32 %v9074_v14, %v4702_v16  ;;  %4758 = vadd.xlane.f32.xlu1 %v4731_v63  ;;  %4760 = vadd.xlane.f32.xlu0 %v4732_v21  ;;  %v4733_v58 = vmul.f32 %v9132_v56, %v9132_v56 }
 0xf6b   : > { %v9142_v61 = vsub.f32 %v9077_v1, %v4703_v18  ;;  %v4734_v8 = vmul.f32 %v9139_v13, %v9139_v13 }
 0xf6d   : > { %4762 = vadd.xlane.f32.xlu1 %v4733_v58  ;;  %4764 = vadd.xlane.f32.xlu0 %v4734_v8  ;;  %v4735_v50 = vmul.f32 %v9142_v61, %v9142_v61 }
 0xf71   : > { %4766 = vadd.xlane.f32.xlu1 %v4735_v50 }
 0xfde   : > { %v4737_v46 = vpop.xlane.xlu0 %4736 }
 0xfdf   : > { %v4768_v14 = vmul.f32 0.0078125, %v4737_v46 }
 0xfe1   : > { %v4784_v41 = vadd.f32 1e-05, %v4768_v14 }
 0xfe2   : > { %v4739_v45 = vpop.xlane.xlu1 %4738  ;;  %v4741_v23 = vpop.xlane.xlu0 %4740 }
 0xfe3   : > { %6771 = vrsqrt.f32 %v4784_v41  ;;  %v4769_v1 = vmul.f32 0.0078125, %v4739_v45  ;;  %v4770_v52 = vmul.f32 0.0078125, %v4741_v23 }
 0xfe5   : > { %v4785_v62 = vadd.f32 1e-05, %v4769_v1  ;;  %v4786_v33 = vadd.f32 1e-05, %v4770_v52 }
 0xfe6   : > { %v4743_v12 = vpop.xlane.xlu1 %4742  ;;  %v4745_v29 = vpop.xlane.xlu0 %4744 }
 0xfe7   : > { %6773 = vrsqrt.f32 %v4785_v62  ;;  %v4771_v49 = vmul.f32 0.0078125, %v4743_v12  ;;  %v4772_v27 = vmul.f32 0.0078125, %v4745_v29 }
 0xfe8   : > { %6775 = vrsqrt.f32 %v4786_v33 }
 0xfe9   : > { %v4787_v48 = vadd.f32 1e-05, %v4771_v49  ;;  %v4788_v15 = vadd.f32 1e-05, %v4772_v27 }
 0xfea   : > { %v4747_v39 = vpop.xlane.xlu1 %4746  ;;  %v4749_v57 = vpop.xlane.xlu0 %4748 }
 0xfeb   : > { %6777 = vrsqrt.f32 %v4787_v48  ;;  %v4773_v51 = vmul.f32 0.0078125, %v4747_v39  ;;  %v4774_v55 = vmul.f32 0.0078125, %v4749_v57 }
 0xfec   : > { %6779 = vrsqrt.f32 %v4788_v15 }
 0xfed   : > { %v6772_v2 = vpop.eup %6771  ;;  %v4789_v9 = vadd.f32 1e-05, %v4773_v51  ;;  %v4790_v22 = vadd.f32 1e-05, %v4774_v55 }
 0xfee   : > { %v4816_v26 = vmul.f32 %v6772_v2, %v9081_v25  ;;  %v4751_v36 = vpop.xlane.xlu1 %4750  ;;  %v4753_v60 = vpop.xlane.xlu0 %4752 }
 0xfef   : > { %6781 = vrsqrt.f32 %v4789_v9  ;;  %v4775_v5 = vmul.f32 0.0078125, %v4751_v36  ;;  %v4776_v20 = vmul.f32 0.0078125, %v4753_v60 }
 0xff0   : > { %v4839_v10 = vmul.f32 %v9153_v19, %v4816_v26  ;;  %6783 = vrsqrt.f32 %v4790_v22 }
 0xff1   : > { %v6774_v35 = vpop.eup %6773  ;;  %v4791_v53 = vadd.f32 1e-05, %v4775_v5  ;;  %v4792_v54 = vadd.f32 1e-05, %v4776_v20 }
 0xff2   : > { %v6776_v34 = vpop.eup %6775  ;;  %v4862_v25 = vadd.f32 %v9159_v38, %v4839_v10  ;;  %v4817_v40 = vmul.f32 %v6774_v35, %v9087_v3  ;;  %v4755_v17 = vpop.xlane.xlu1 %4754 }
 0xff3   : > { %v4757_v0 = vpop.xlane.xlu0 %4756  ;;  %v4818_v42 = vmul.f32 %v6776_v34, %v9083_v43  ;;  %6785 = vrsqrt.f32 %v4791_v53  ;;  %v4777_v28 = vmul.f32 0.0078125, %v4755_v17 }
 0xff4   : > { %v4778_v63 = vmul.f32 0.0078125, %v4757_v0  ;;  %4878 = vst [vmem:[%s7371_s29] sm:$0xff] %v4862_v25  ;;  %v4840_v11 = vmul.f32 %v9153_v19, %v4817_v40  ;;  %6787 = vrsqrt.f32 %v4792_v54 }
 0xff5   : > { %v6778_v7 = vpop.eup %6777  ;;  %v4841_v16 = vmul.f32 %v9153_v19, %v4818_v42  ;;  %v4793_v21 = vadd.f32 1e-05, %v4777_v28 }
 0xff6   : > { %v4794_v18 = vadd.f32 1e-05, %v4778_v63  ;;  %v6780_v58 = vpop.eup %6779  ;;  %v4863_v3 = vadd.f32 %v9159_v38, %v4840_v11  ;;  %v4819_v8 = vmul.f32 %v6778_v7, %v9089_v6  ;;  %v4759_v43 = vpop.xlane.xlu1 %4758 }
 0xff7   : > { %v4761_v50 = vpop.xlane.xlu0 %4760  ;;  %v4864_v46 = vadd.f32 %v9159_v38, %v4841_v16  ;;  %v4820_v14 = vmul.f32 %v6780_v58, %v9095_v47  ;;  %6789 = vrsqrt.f32 %v4793_v21  ;;  %v4779_v41 = vmul.f32 0.0078125, %v4759_v43 }
 0xff8   : > { %4879 = vst [vmem:[%s7371_s29 + $0x8] sm:$0xff] %v4863_v3  ;;  %v4842_v45 = vmul.f32 %v9153_v19, %v4819_v8  ;;  %6791 = vrsqrt.f32 %v4794_v18  ;;  %v4780_v23 = vmul.f32 0.0078125, %v4761_v50 }
 0xff9   : > { %v6782_v1 = vpop.eup %6781  ;;  %4880 = vst [vmem:[%s7371_s29 + $0x10] sm:$0xff] %v4864_v46  ;;  %v4843_v52 = vmul.f32 %v9153_v19, %v4820_v14  ;;  %v4795_v62 = vadd.f32 1e-05, %v4779_v41 }
 0xffa   : > { %v6784_v6 = vpop.eup %6783  ;;  %v4865_v33 = vadd.f32 %v9159_v38, %v4842_v45  ;;  %v4821_v12 = vmul.f32 %v6782_v1, %v9097_v37  ;;  %v4796_v47 = vadd.f32 1e-05, %v4780_v23  ;;  %v4763_v29 = vpop.xlane.xlu1 %4762 }
 0xffb   : > { %v4765_v49 = vpop.xlane.xlu0 %4764  ;;  %v4866_v27 = vadd.f32 %v9159_v38, %v4843_v52  ;;  %v4822_v48 = vmul.f32 %v6784_v6, %v9103_v30  ;;  %6793 = vrsqrt.f32 %v4795_v62  ;;  %v4781_v15 = vmul.f32 0.0078125, %v4763_v29 }
 0xffc   : > { %4881 = vst [vmem:[%s7371_s29 + $0x18] sm:$0xff] %v4865_v33  ;;  %v4844_v39 = vmul.f32 %v9153_v19, %v4821_v12  ;;  %6795 = vrsqrt.f32 %v4796_v47  ;;  %v4782_v57 = vmul.f32 0.0078125, %v4765_v49 }
 0xffd   : > { %v6786_v51 = vpop.eup %6785  ;;  %4882 = vst [vmem:[%s7371_s29 + $0x20] sm:$0xff] %v4866_v27  ;;  %v4845_v37 = vmul.f32 %v9153_v19, %v4822_v48  ;;  %v4797_v55 = vadd.f32 1e-05, %v4781_v15 }
 0xffe   : > { %v6788_v2 = vpop.eup %6787  ;;  %v4867_v9 = vadd.f32 %v9159_v38, %v4844_v39  ;;  %v4823_v22 = vmul.f32 %v6786_v51, %v9105_v59  ;;  %v4798_v30 = vadd.f32 1e-05, %v4782_v57  ;;  %v4767_v26 = vpop.xlane.xlu1 %4766 }
 0xfff   : > { %v4868_v36 = vadd.f32 %v9159_v38, %v4845_v37  ;;  %v4824_v60 = vmul.f32 %v6788_v2, %v9111_v4  ;;  %6797 = vrsqrt.f32 %v4797_v55  ;;  %v4783_v5 = vmul.f32 0.0078125, %v4767_v26 }
0x1000   : > { %4883 = vst [vmem:[%s7371_s29 + $0x28] sm:$0xff] %v4867_v9  ;;  %v4846_v20 = vmul.f32 %v9153_v19, %v4823_v22  ;;  %6799 = vrsqrt.f32 %v4798_v30 }
0x1001   : > { %v6790_v10 = vpop.eup %6789  ;;  %4884 = vst [vmem:[%s7371_s29 + $0x30] sm:$0xff] %v4868_v36  ;;  %v4847_v35 = vmul.f32 %v9153_v19, %v4824_v60  ;;  %v4799_v53 = vadd.f32 1e-05, %v4783_v5 }
0x1002   : > { %v6792_v59 = vpop.eup %6791  ;;  %v4869_v54 = vadd.f32 %v9159_v38, %v4846_v20  ;;  %v4825_v34 = vmul.f32 %v6790_v10, %v9113_v32 }
0x1003   : > { %v4870_v4 = vadd.f32 %v9159_v38, %v4847_v35  ;;  %v4826_v25 = vmul.f32 %v6792_v59, %v9119_v44  ;;  %6801 = vrsqrt.f32 %v4799_v53 }
0x1004   : > { %4885 = vst [vmem:[%s7371_s29 + $0x38] sm:$0xff] %v4869_v54  ;;  %v4848_v40 = vmul.f32 %v9153_v19, %v4825_v34 }
0x1005   : > { %v6794_v17 = vpop.eup %6793  ;;  %4886 = vst [vmem:[%s7371_s29 + $0x40] sm:$0xff] %v4870_v4  ;;  %v4849_v0 = vmul.f32 %v9153_v19, %v4826_v25 }
0x1006   : > { %v6796_v42 = vpop.eup %6795  ;;  %v4871_v28 = vadd.f32 %v9159_v38, %v4848_v40  ;;  %v4827_v63 = vmul.f32 %v6794_v17, %v9122_v24 }
0x1007   : > { %v4872_v32 = vadd.f32 %v9159_v38, %v4849_v0  ;;  %v4828_v11 = vmul.f32 %v6796_v42, %v9129_v31 }
0x1008   : > { %4887 = vst [vmem:[%s7371_s29 + $0x48] sm:$0xff] %v4871_v28  ;;  %v4850_v44 = vmul.f32 %v9153_v19, %v4827_v63 }
0x1009   : > { %v6798_v7 = vpop.eup %6797  ;;  %4888 = vst [vmem:[%s7371_s29 + $0x50] sm:$0xff] %v4872_v32  ;;  %v4851_v16 = vmul.f32 %v9153_v19, %v4828_v11 }
0x100a   : > { %v6800_v21 = vpop.eup %6799  ;;  %v4873_v18 = vadd.f32 %v9159_v38, %v4850_v44  ;;  %v4829_v24 = vmul.f32 %v6798_v7, %v9132_v56 }
0x100b   : > { %v4874_v58 = vadd.f32 %v9159_v38, %v4851_v16  ;;  %v4830_v3 = vmul.f32 %v6800_v21, %v9139_v13 }
0x100c   : > { %4889 = vst [vmem:[%s7371_s29 + $0x58] sm:$0xff] %v4873_v18  ;;  %v4852_v31 = vmul.f32 %v9153_v19, %v4829_v24 }
0x100d   : > { %v6802_v8 = vpop.eup %6801  ;;  %4890 = vst [vmem:[%s7371_s29 + $0x60] sm:$0xff] %v4874_v58  ;;  %v4853_v43 = vmul.f32 %v9153_v19, %v4830_v3 }
0x100e   : > { %v4875_v50 = vadd.f32 %v9159_v38, %v4852_v31  ;;  %v4831_v46 = vmul.f32 %v6802_v8, %v9142_v61 }
0x100f   : > { %v4876_v14 = vadd.f32 %v9159_v38, %v4853_v43 }
0x1010   : > { %4891 = vst [vmem:[%s7371_s29 + $0x68] sm:$0xff] %v4875_v50  ;;  %v4854_v56 = vmul.f32 %v9153_v19, %v4831_v46 }
0x1011   : > { %4892 = vst [vmem:[%s7371_s29 + $0x70] sm:$0xff] %v4876_v14 }
0x1012   : > { %v4877_v41 = vadd.f32 %v9159_v38, %v4854_v56 }
0x1014   : > { %4893 = vst [vmem:[%s7371_s29 + $0x78] sm:$0xff] %v4877_v41 }
0x1015 PF: > { %s9468_s14 = sld [smem:[#allocation16_spill]]  ;;  %s5329_s11 = sshll.u32 %s7007_s28, 11 }
0x1016   : > { %s9469_s20 = sld [smem:[#allocation60_spill]]  ;;  %s4908_s17 = sshll.u32 %s7371_s29, 4  ;;  %s9231_s17 = int_to_ptr.vmem [resolvable:$true] %s4908_s17 }
0x1017   : > { %s9470_s4 = sand.u32 1, %s6983_s22   ;;  %s6889_s1 = scalar_lea.vmem %s9231_s17, 2048 }
0x1018   : > { %s9235_s24 = scalar_lea.sflag [#allocation4], %s9470_s4  ;;  %p6890_p4 = scmp.ne.s32.totalorder %s9231_s17, %s6889_s1 }
0x1019   : > { %s7026_s28 = smov [#allocation8]  }
0x101a   : > { %s6893_s6 = sshll.u32 %s7026_s28, 4  ;;  %s6894_s6 = int_to_ptr.vmem [resolvable:$false] %s6893_s6 }
0x101b   : > { %p9471_p3 = scmp.ne.s32.totalorder %s9468_s14, 0  ;;  %s6895_s19 = scalar_lea.vmem %s6894_s6, 4096 }
0x101c   : > { %s9228_s18 = scalar_lea.hbm %s9469_s20, %s5329_s11  ;;  %p6896_p6 = scmp.lt.s32.totalorder %s9231_s17, %s6894_s6 }
0x101d   : > { %p6891_p13 = pnand %p6890_p4, %p9471_p3  ;;  %p6897_p9 = scmp.lt.s32.totalorder %s6895_s19, %s6889_s1 }
0x101f   : > { %p6892_p2 = pneg %p6891_p13  ;;  %p6898_p0 = por %p6897_p9, %p6896_p6 }
0x1021   : > { %p6899_p7 = pnand %p6898_p0, %p6892_p2 }
0x1023   : > { %6902 = shalt.err (!%p6899_p7)
}
0x1024   : > { %s6903_s29 = scalar_lea.hbm %s9228_s18, 2048  ;;  %s6907_s3 = scalar_lea.hbm %s9469_s20, 4096 }
0x1025   : > { %p6904_p10 = scmp.ne.s32.totalorder %s9228_s18, %s6903_s29  ;;  %p6908_p11 = scmp.lt.u32.totalorder %s9228_s18, %s9469_s20 }
0x1026   : > { %p6909_p1 = scmp.lt.u32.totalorder %s6907_s3, %s6903_s29  ;;  %p6911_p4 = scmp.lt.u32.totalorder %s6903_s29, %s9228_s18 }
0x1027   : > { %p6905_p12 = pnand %p6904_p10, %p9471_p3 }
0x1028   : > { %p6910_p8 = por %p6909_p1, %p6908_p11 }
0x1029   : > { %p6906_p5 = pneg %p6905_p12 }
0x102a   : > { %p6912_p13 = por %p6911_p4, %p6910_p8 }
0x102c   : > { %p6913_p2 = pnand %p6912_p13, %p6906_p5 }
0x102e   : > { %6916 = shalt.err (!%p6913_p2)
}
0x102f   : > { %s7027_s15 = smov 128   ;;  %s7028_s16 = smov 8  }
0x1030   : > { %6259 = dma.vmem_to_hbm [thread:$0]  (%p9471_p3), %s9231_s17, 2048, %s9228_s18, %s9235_s24, %s7027_s15, %s7027_s15, %s7028_s16  }
0x1031 PF: > { %s9472_s30 = sld [smem:[#allocation13_spill]]  ;;  %s9473_s2 = sld [smem:[#allocation17_spill]] }
0x1032   : > { %p6281_p6 = scmp.ge.s32.totalorder %s7019_s13, 2 }
0x1037   : > { %s4923_s11 = sand.u32 1, %s9472_s30   ;;  %p9474_p9 = scmp.ne.s32.totalorder %s9473_s2, 0 }
0x1038   : > { %s4924_s5 = scalar_lea.sflag [#allocation4], %s4923_s11 }
0x1039   : > { %p6273_p0 = pnand %p6281_p6, %p9474_p9 }
0x103b   : > { %6974 = dma.done.wait (!%p6273_p0), %s4924_s5, 2048  }
0x103c   : > { %6976 = vsyncadd (!%p6273_p0), %s4924_s5, 4294965248  ;;  %s27_s13 = sadd.s32 1, %s7019_s13   ;;  %s9475_s27 = sld [smem:[#allocation14_spill]] }
0x103d   : > { %p24_p7 = scmp.ge.s32.totalorder %s27_s13, 6   ;;  %s9476_s28 = sld [smem:[#allocation15_spill]] }
0x103e   : > { %s9477_s29 = sld [smem:[#allocation18_spill]]  ;;  %s9478_s30 = sld [smem:[#allocation19_spill]] }
0x103f   : > { %s9479_s21 = smov %s6983_s22  ;;  %s9480_s22 = smov %s6987_s23 }
0x1040   : > { %s9481_s23 = smov %s7280_s8  ;;  %s9482_s24 = smov %s6995_s25 }
0x1041   : > { %s9483_s25 = smov %s6999_s26  ;;  %s9484_s26 = smov %s7274_s12 }
0x1042   :  { %26 = sbr.rel (!%p24_p7) target bundleno = 23 (0x17), region = 160 }
0x1049   :  { %4929 = vsyncpa [#allocation3], 1 }
0x104a   :  { %4931 = vsyncpa [#allocation3 + $0x1], 1 }
0x104b   :  { %4932 = vsyncpa [#allocation6], 1 }
0x104c   :  { %4933 = vsyncpa [#allocation4], 1 }
0x104d   :  { %4935 = vsyncpa [#allocation4 + $0x1], 1 }

</bundles_post_ra>
